<compile_context>
chip_gen: v6e
topology: v6e:2x2x1
jax: 0.10.0
libtpu: 0.0.40
codegen_flags: <defaults>
</compile_context>

<pallas_src>
import jax
import jax.numpy as jnp
from jax.experimental import pallas as pl
from jax.experimental.pallas import tpu as pltpu

_LANE = 128


def _round_up(x, m):
    return (x + m - 1) // m * m


def _choose_time_tile(T):
    # Prefer a multiple of 8 that divides T (keeps (TT, lanes) blocks tileable);
    # otherwise fall back to a single full-extent time block.
    for tt in (32, 24, 16, 8):
        if T % tt == 0:
            return tt
    return T


def _sigmoid_cheap(x):
    # One EUP tanh instead of exp + add + exact divide.
    return 0.5 * (jnp.tanh(0.5 * x) + 1.0)


def _pad_gate_rows(w, H, Hp):
    """[3H, C] -> [3Hp, C], padding each of the (r, z, n) gate blocks separately."""
    if Hp == H:
        return w
    r, z, n = jnp.split(w, 3, axis=0)
    p = ((0, Hp - H), (0, 0))
    return jnp.concatenate([jnp.pad(r, p), jnp.pad(z, p), jnp.pad(n, p)], axis=0)


def _pad_gate_vec(b, H, Hp):
    """[3H] -> [3Hp], padding each gate block separately."""
    if Hp == H:
        return b
    r, z, n = jnp.split(b, 3)
    p = (0, Hp - H)
    return jnp.concatenate([jnp.pad(r, p), jnp.pad(z, p), jnp.pad(n, p)])


def _pad_cols(w, Hp):
    c = w.shape[1]
    return w if c == Hp else jnp.pad(w, ((0, 0), (0, Hp - c)))


def _make_gru_kernel(n_layers, hidden_p, time_tile):
    L, Hp, TT = n_layers, hidden_p, time_tile

    def kernel(gi0_ref, h0_ref, whh_ref, wih_ref, b_ref, out_ref, hn_ref):
        # gi0_ref : (TB, TT, 3Hp) f32  precomputed x @ W_ih0^T + b_ih0 (time tile)
        # h0_ref  : (L, TB, Hp)   f32  initial hidden state (resident, Buffered(1))
        # whh_ref : (L, Hp, 3Hp)  bf16 recurrent weights, pre-transposed
        # wih_ref : (max(L-1,1), Hp, 3Hp) bf16 input weights for layers >= 1
        # b_ref   : (L, 2, 3Hp)   f32  packed (b_ih, b_hh)
        # out_ref : (TB, TT, Hp)  f32  top-layer hidden states (time tile)
        # hn_ref  : (L, TB, Hp)   f32  running hidden state (resident accumulator)

        # Initialize the running hidden state from h0 at the first time tile
        # (re-initialized for each batch tile, since hn block follows the b axis).
        @pl.when(pl.program_id(1) == 0)
        def _init():
            hn_ref[...] = h0_ref[...]

        # Hoist loop-invariant bias loads out of the unrolled time loop.
        b_all = b_ref[...]                                   # (L, 2, 3Hp)
        bias_i = [b_all[l:l + 1, 0, :] for l in range(L)]    # (1, 3Hp) each
        bias_h = [b_all[l:l + 1, 1, :] for l in range(L)]    # (1, 3Hp) each

        for tt in range(TT):  # statically unrolled over the time tile
            layer_in = None
            for l in range(L):
                h_prev = hn_ref[l]                           # (TB, Hp) f32
                if l == 0:
                    # x-projection (incl. b_ih0) was precomputed in the wrapper.
                    gi = gi0_ref[:, tt, :]                   # (TB, 3Hp) f32
                else:
                    gi = jnp.dot(layer_in.astype(jnp.bfloat16), wih_ref[l - 1],
                                 preferred_element_type=jnp.float32) + bias_i[l]
                gh = jnp.dot(h_prev.astype(jnp.bfloat16), whh_ref[l],
                             preferred_element_type=jnp.float32) + bias_h[l]

                r = _sigmoid_cheap(gi[:, 0:Hp] + gh[:, 0:Hp])
                z = _sigmoid_cheap(gi[:, Hp:2 * Hp] + gh[:, Hp:2 * Hp])
                n = jnp.tanh(gi[:, 2 * Hp:] + r * gh[:, 2 * Hp:])
                h_new = n + z * (h_prev - n)  # == (1 - z) * n + z * h_prev

                hn_ref[l] = h_new
                layer_in = h_new
            out_ref[:, tt, :] = layer_in      # static, lane-dense (Hp) store

    return kernel


@jax.jit
def event_gru_forward(x, h0, params):
    """Pallas forward for Event_GRUNet.

    x:      [B, T, D]  (batch_first)
    h0:     [L, B, H]
    params: list of L tuples (w_ih [3H, D_l], w_hh [3H, H], b_ih [3H], b_hh [3H])
            in PyTorch gate order (r, z, n).
    Returns (out [B, T, H], h_n [L, B, H]).
    """
    B, T, D = x.shape
    L, _, H = h0.shape
    assert L == len(params)

    Hp = _round_up(H, _LANE)
    TT = _choose_time_tile(T)
    # v7x: shard the (independent) batch rows across the two TensorCores when
    # there is enough work per core; single tile otherwise (v5e/v6e unaffected).
    n_btiles = 2 if (B >= 32 and B % 16 == 0) else 1
    TB = B // n_btiles

    # ---- layer-0 input projection, hoisted out of the recurrence ------------
    w_ih0, _, b_ih0, _ = params[0]
    w0p = _pad_gate_rows(w_ih0.astype(jnp.float32), H, Hp)          # (3Hp, D)
    b0p = _pad_gate_vec(b_ih0.astype(jnp.float32), H, Hp)           # (3Hp,)
    gi0 = jnp.dot(x.reshape(B * T, D).astype(jnp.bfloat16),
                  w0p.T.astype(jnp.bfloat16),
                  preferred_element_type=jnp.float32)
    gi0 = (gi0 + b0p[None, :]).reshape(B, T, 3 * Hp)                # batch-first

    # ---- pack per-layer recurrent weights / biases (lane-padded, bf16) ------
    whh_list, wih_list, b_list = [], [], []
    for l, (w_ih, w_hh, b_ih, b_hh) in enumerate(params):
        whh = _pad_cols(_pad_gate_rows(w_hh.astype(jnp.float32), H, Hp), Hp)
        whh_list.append(whh.T.astype(jnp.bfloat16))                 # (Hp, 3Hp)
        b_list.append(jnp.stack([_pad_gate_vec(b_ih.astype(jnp.float32), H, Hp),
                                 _pad_gate_vec(b_hh.astype(jnp.float32), H, Hp)]))
        if l >= 1:
            wih = _pad_cols(_pad_gate_rows(w_ih.astype(jnp.float32), H, Hp), Hp)
            wih_list.append(wih.T.astype(jnp.bfloat16))             # (Hp, 3Hp)
    whh_all = jnp.stack(whh_list)                                   # (L, Hp, 3Hp)
    wih_all = (jnp.stack(wih_list) if L > 1
               else jnp.zeros((1, Hp, 3 * Hp), jnp.bfloat16))
    b_all = jnp.stack(b_list)                                       # (L, 2, 3Hp)

    h0p = jnp.pad(h0.astype(jnp.float32), ((0, 0), (0, 0), (0, Hp - H)))

    const = dict(pipeline_mode=pl.Buffered(1))   # time-invariant -> single buffer
    grid = (n_btiles, T // TT)
    in_specs = [
        pl.BlockSpec((TB, TT, 3 * Hp), lambda b, t: (b, t, 0)),              # gi0
        pl.BlockSpec((L, TB, Hp), lambda b, t: (0, b, 0), **const),          # h0
        pl.BlockSpec((L, Hp, 3 * Hp), lambda b, t: (0, 0, 0), **const),      # W_hh
        pl.BlockSpec((wih_all.shape[0], Hp, 3 * Hp),
                     lambda b, t: (0, 0, 0), **const),                       # W_ih (l>=1)
        pl.BlockSpec((L, 2, 3 * Hp), lambda b, t: (0, 0, 0), **const),       # biases
    ]
    out_specs = [
        pl.BlockSpec((TB, TT, Hp), lambda b, t: (b, t, 0)),                  # out
        pl.BlockSpec((L, TB, Hp), lambda b, t: (0, b, 0)),                   # h_n
    ]

    # Residency: single-buffered weights/biases/h + double-buffered activation
    # tiles.  TODO(synk): on v7x (64 MiB VMEM) large H/L configs should stream
    # layer weights per-layer instead of keeping all layers resident.
    resident = (whh_all.size * 2 + wih_all.size * 2 + b_all.size * 4
                + 2 * h0p.size * 4
                + 2 * TB * TT * 3 * Hp * 4 + 2 * TB * TT * Hp * 4)
    vmem_limit = int(min(max(2 * resident, 32 * 1024 * 1024), 100 * 1024 * 1024))

    out_p, hn_p = pl.pallas_call(
        _make_gru_kernel(L, Hp, TT),
        out_shape=(jax.ShapeDtypeStruct((B, T, Hp), jnp.float32),
                   jax.ShapeDtypeStruct((L, B, Hp), jnp.float32)),
        grid_spec=pltpu.PrefetchScalarGridSpec(
            num_scalar_prefetch=0,
            grid=grid,
            in_specs=in_specs,
            out_specs=out_specs,
        ),
        input_output_aliases={1: 1},   # h0 HBM buffer is reused for h_n
        compiler_params=pltpu.CompilerParams(
            dimension_semantics=("parallel", "arbitrary"),
            vmem_limit_bytes=vmem_limit,
        ),
    )(gi0, h0p, whh_all, wih_all, b_all)

    if Hp != H:
        out_p = out_p[:, :, :H]
        hn_p = hn_p[:, :, :H]
    return out_p, hn_p


def _gru_reference(x, h0, params):
    """Plain-JAX f32 reference matching torch.nn.GRU (batch_first, eval mode)."""
    B, T, _ = x.shape
    L = len(params)
    h = [h0[l] for l in range(L)]
    outs = []
    for t in range(T):
        inp = x[:, t, :]
        for l, (w_ih, w_hh, b_ih, b_hh) in enumerate(params):
            gi = inp @ w_ih.T + b_ih
            gh = h[l] @ w_hh.T + b_hh
            i_r, i_z, i_n = jnp.split(gi, 3, axis=-1)
            h_r, h_z, h_n = jnp.split(gh, 3, axis=-1)
            r = jax.nn.sigmoid(i_r + h_r)
            z = jax.nn.sigmoid(i_z + h_z)
            n = jnp.tanh(i_n + r * h_n)
            h[l] = (1.0 - z) * n + z * h[l]
            inp = h[l]
        outs.append(inp)
    return jnp.stack(outs, axis=1), jnp.stack(h, axis=0)


if __name__ == "__main__":
    B, T, D, H, L = 2, 8, 16, 32, 2

    rng = jax.random.PRNGKey(0)
    keys = jax.random.split(rng, 2 + 2 * L)

    x = jax.random.normal(keys[0], (B, T, D), dtype=jnp.float32)
    h0 = jax.random.normal(keys[1], (L, B, H), dtype=jnp.float32) * 0.1

    # Parameters (biases zero, matching nn.init.constant_(bias, 0.0)).
    params = []
    for l in range(L):
        d_in = D if l == 0 else H
        w_ih = jax.random.normal(keys[2 + 2 * l], (3 * H, d_in),
                                 dtype=jnp.float32) * (2.0 / d_in) ** 0.5
        w_hh = jax.random.normal(keys[3 + 2 * l], (3 * H, H),
                                 dtype=jnp.float32) * (1.0 / H) ** 0.5
        b_ih = jnp.zeros((3 * H,), dtype=jnp.float32)
        b_hh = jnp.zeros((3 * H,), dtype=jnp.float32)
        params.append((w_ih, w_hh, b_ih, b_hh))

    # Reference first (f32), kernel second (bf16 weights -> looser tolerance).
    out_ref, h_n_ref = _gru_reference(x, h0, params)

    out, h_n = event_gru_forward(x, h0, params)
    jax.block_until_ready((out, h_n))

    assert out.shape == (B, T, H)
    assert h_n.shape == (L, B, H)
    assert jnp.allclose(out, out_ref, atol=3e-2, rtol=3e-2), "out mismatch vs reference"
    assert jnp.allclose(h_n, h_n_ref, atol=3e-2, rtol=3e-2), "h_n mismatch vs reference"

    print("KERNEL_OK")
</pallas_src>

<mosaic_0001>
module attributes {stable_mosaic.version = 11 : i64} {
  func.func @kernel(%arg0: i32, %arg1: i32, %arg2: memref<2x8x384xf32, #tpu.memory_space<vmem>>, %arg3: memref<2x2x128xf32, #tpu.memory_space<vmem>>, %arg4: memref<2x128x384xbf16, #tpu.memory_space<vmem>>, %arg5: memref<1x128x384xbf16, #tpu.memory_space<vmem>>, %arg6: memref<2x2x384xf32, #tpu.memory_space<vmem>>, %arg7: memref<2x8x128xf32, #tpu.memory_space<vmem>>, %arg8: memref<2x2x128xf32, #tpu.memory_space<vmem>>) attributes {dimension_semantics = [#tpu.dimension_semantics<parallel>, #tpu.dimension_semantics<arbitrary>], iteration_bounds = array<i64: 1, 1>, scalar_prefetch = 0 : i64, scratch_operands = 0 : i64, tpu.core_type = #tpu.core_type<tc>, window_params = [{transform_indices = @transform_0, window_bounds = array<i64: 2, 8, 384>}, {pipeline_mode = #tpu.pipeline_mode<synchronous>, transform_indices = @transform_1, window_bounds = array<i64: 2, 2, 128>}, {pipeline_mode = #tpu.pipeline_mode<synchronous>, transform_indices = @transform_2, window_bounds = array<i64: 2, 128, 384>}, {pipeline_mode = #tpu.pipeline_mode<synchronous>, transform_indices = @transform_3, window_bounds = array<i64: 1, 128, 384>}, {pipeline_mode = #tpu.pipeline_mode<synchronous>, transform_indices = @transform_4, window_bounds = array<i64: 2, 2, 384>}, {transform_indices = @transform_5, window_bounds = array<i64: 2, 8, 128>}, {transform_indices = @transform_6, window_bounds = array<i64: 2, 2, 128>}]} {
    %c0_i32 = arith.constant 0 : i32
    %0 = arith.cmpi eq, %arg1, %c0_i32 : i32
    %1 = arith.extui %0 : i1 to i32
    %c0_i32_0 = arith.constant 0 : i32
    %2 = arith.cmpi ne, %1, %c0_i32_0 : i32
    scf.if %2 {
      %c0_331 = arith.constant 0 : index
      %c0_332 = arith.constant 0 : index
      %c0_333 = arith.constant 0 : index
      %722 = vector.load %arg3[%c0_331, %c0_332, %c0_333] : memref<2x2x128xf32, #tpu.memory_space<vmem>>, vector<2x2x128xf32>
      %c0_334 = arith.constant 0 : index
      %c0_335 = arith.constant 0 : index
      %c0_336 = arith.constant 0 : index
      %723 = vector.load %arg8[%c0_334, %c0_335, %c0_336] : memref<2x2x128xf32, #tpu.memory_space<vmem>>, vector<2x2x128xf32>
      tpu.vector_store %arg8[%c0_334, %c0_335, %c0_336], %722 {strides = array<i32>} : memref<2x2x128xf32, #tpu.memory_space<vmem>>, vector<2x2x128xf32>,
    } else {
    }
    %c0 = arith.constant 0 : index
    %c0_1 = arith.constant 0 : index
    %c0_2 = arith.constant 0 : index
    %3 = vector.load %arg6[%c0, %c0_1, %c0_2] : memref<2x2x384xf32, #tpu.memory_space<vmem>>, vector<2x2x384xf32>
    %4 = vector.extract_strided_slice %3 {offsets = [1, 0, 0], sizes = [1, 1, 384], strides = [1, 1, 1]} : vector<2x2x384xf32> to vector<1x1x384xf32>
    %5 = vector.shape_cast %4 : vector<1x1x384xf32> to vector<1x384xf32>
    %6 = vector.extract_strided_slice %3 {offsets = [0, 1, 0], sizes = [1, 1, 384], strides = [1, 1, 1]} : vector<2x2x384xf32> to vector<1x1x384xf32>
    %7 = vector.shape_cast %6 : vector<1x1x384xf32> to vector<1x384xf32>
    %8 = vector.extract_strided_slice %3 {offsets = [1, 1, 0], sizes = [1, 1, 384], strides = [1, 1, 1]} : vector<2x2x384xf32> to vector<1x1x384xf32>
    %9 = vector.shape_cast %8 : vector<1x1x384xf32> to vector<1x384xf32>
    %c0_3 = arith.constant 0 : index
    %c0_4 = arith.constant 0 : index
    %c0_5 = arith.constant 0 : index
    %10 = vector.load %arg8[%c0_3, %c0_4, %c0_5] : memref<2x2x128xf32, #tpu.memory_space<vmem>>, vector<1x2x128xf32>
    %11 = vector.shape_cast %10 : vector<1x2x128xf32> to vector<2x128xf32>
    %c0_6 = arith.constant 0 : index
    %c0_7 = arith.constant 0 : index
    %c0_8 = arith.constant 0 : index
    %12 = vector.load %arg2[%c0_6, %c0_7, %c0_8] : memref<2x8x384xf32, #tpu.memory_space<vmem>>, vector<2x1x384xf32>
    %13 = vector.shape_cast %12 : vector<2x1x384xf32> to vector<2x384xf32>
    %14 = arith.truncf %11 : vector<2x128xf32> to vector<2x128xbf16>
    %c0_9 = arith.constant 0 : index
    %c0_10 = arith.constant 0 : index
    %c0_11 = arith.constant 0 : index
    %15 = vector.load %arg4[%c0_9, %c0_10, %c0_11] : memref<2x128x384xbf16, #tpu.memory_space<vmem>>, vector<1x128x384xbf16>
    %16 = vector.shape_cast %15 : vector<1x128x384xbf16> to vector<128x384xbf16>
    %cst = arith.constant dense<0.000000e+00> : vector<2x384xf32>
    %17 = tpu.matmul %14, %16, %cst {dimension_numbers = #tpu.dot_dimension_numbers<[1], [0], [0], [1], [0, 0, 1, 1], [], []>} : vector<2x128xbf16>, vector<128x384xbf16>, vector<2x384xf32> -> vector<2x384xf32>
    %18 = vector.broadcast %7 : vector<1x384xf32> to vector<2x384xf32>
    %19 = arith.addf %17, %18 : vector<2x384xf32>
    %20 = vector.extract_strided_slice %13 {offsets = [0, 0], sizes = [2, 128], strides = [1, 1]} : vector<2x384xf32> to vector<2x128xf32>
    %21 = vector.extract_strided_slice %19 {offsets = [0, 0], sizes = [2, 128], strides = [1, 1]} : vector<2x384xf32> to vector<2x128xf32>
    %22 = arith.addf %20, %21 : vector<2x128xf32>
    %cst_12 = arith.constant 5.000000e-01 : f32
    %23 = vector.broadcast %cst_12 : f32 to vector<2x128xf32>
    %24 = arith.mulf %23, %22 : vector<2x128xf32>
    %25 = math.tanh %24 : vector<2x128xf32>
    %cst_13 = arith.constant 1.000000e+00 : f32
    %26 = vector.broadcast %cst_13 : f32 to vector<2x128xf32>
    %27 = arith.addf %25, %26 : vector<2x128xf32>
    %cst_14 = arith.constant 5.000000e-01 : f32
    %28 = vector.broadcast %cst_14 : f32 to vector<2x128xf32>
    %29 = arith.mulf %28, %27 : vector<2x128xf32>
    %30 = vector.extract_strided_slice %13 {offsets = [0, 128], sizes = [2, 128], strides = [1, 1]} : vector<2x384xf32> to vector<2x128xf32>
    %31 = vector.extract_strided_slice %19 {offsets = [0, 128], sizes = [2, 128], strides = [1, 1]} : vector<2x384xf32> to vector<2x128xf32>
    %32 = arith.addf %30, %31 : vector<2x128xf32>
    %cst_15 = arith.constant 5.000000e-01 : f32
    %33 = vector.broadcast %cst_15 : f32 to vector<2x128xf32>
    %34 = arith.mulf %33, %32 : vector<2x128xf32>
    %35 = math.tanh %34 : vector<2x128xf32>
    %cst_16 = arith.constant 1.000000e+00 : f32
    %36 = vector.broadcast %cst_16 : f32 to vector<2x128xf32>
    %37 = arith.addf %35, %36 : vector<2x128xf32>
    %cst_17 = arith.constant 5.000000e-01 : f32
    %38 = vector.broadcast %cst_17 : f32 to vector<2x128xf32>
    %39 = arith.mulf %38, %37 : vector<2x128xf32>
    %40 = vector.extract_strided_slice %13 {offsets = [0, 256], sizes = [2, 128], strides = [1, 1]} : vector<2x384xf32> to vector<2x128xf32>
    %41 = vector.extract_strided_slice %19 {offsets = [0, 256], sizes = [2, 128], strides = [1, 1]} : vector<2x384xf32> to vector<2x128xf32>
    %42 = arith.mulf %29, %41 : vector<2x128xf32>
    %43 = arith.addf %40, %42 : vector<2x128xf32>
    %44 = math.tanh %43 : vector<2x128xf32>
    %45 = arith.subf %11, %44 : vector<2x128xf32>
    %46 = arith.mulf %39, %45 : vector<2x128xf32>
    %47 = arith.addf %44, %46 : vector<2x128xf32>
    %c0_18 = arith.constant 0 : index
    %c0_19 = arith.constant 0 : index
    %c0_20 = arith.constant 0 : index
    %48 = vector.load %arg8[%c0_18, %c0_19, %c0_20] : memref<2x2x128xf32, #tpu.memory_space<vmem>>, vector<1x2x128xf32>
    %49 = vector.shape_cast %48 : vector<1x2x128xf32> to vector<2x128xf32>
    %50 = vector.shape_cast %47 : vector<2x128xf32> to vector<1x2x128xf32>
    tpu.vector_store %arg8[%c0_18, %c0_19, %c0_20], %50 {strides = array<i32>} : memref<2x2x128xf32, #tpu.memory_space<vmem>>, vector<1x2x128xf32>,
    %c1 = arith.constant 1 : index
    %c0_21 = arith.constant 0 : index
    %c0_22 = arith.constant 0 : index
    %51 = vector.load %arg8[%c1, %c0_21, %c0_22] : memref<2x2x128xf32, #tpu.memory_space<vmem>>, vector<1x2x128xf32>
    %52 = vector.shape_cast %51 : vector<1x2x128xf32> to vector<2x128xf32>
    %53 = arith.truncf %47 : vector<2x128xf32> to vector<2x128xbf16>
    %c0_23 = arith.constant 0 : index
    %c0_24 = arith.constant 0 : index
    %c0_25 = arith.constant 0 : index
    %54 = vector.load %arg5[%c0_23, %c0_24, %c0_25] : memref<1x128x384xbf16, #tpu.memory_space<vmem>>, vector<1x128x384xbf16>
    %55 = vector.shape_cast %54 : vector<1x128x384xbf16> to vector<128x384xbf16>
    %cst_26 = arith.constant dense<0.000000e+00> : vector<2x384xf32>
    %56 = tpu.matmul %53, %55, %cst_26 {dimension_numbers = #tpu.dot_dimension_numbers<[1], [0], [0], [1], [0, 0, 1, 1], [], []>} : vector<2x128xbf16>, vector<128x384xbf16>, vector<2x384xf32> -> vector<2x384xf32>
    %57 = vector.broadcast %5 : vector<1x384xf32> to vector<2x384xf32>
    %58 = arith.addf %56, %57 : vector<2x384xf32>
    %59 = arith.truncf %52 : vector<2x128xf32> to vector<2x128xbf16>
    %c1_27 = arith.constant 1 : index
    %c0_28 = arith.constant 0 : index
    %c0_29 = arith.constant 0 : index
    %60 = vector.load %arg4[%c1_27, %c0_28, %c0_29] : memref<2x128x384xbf16, #tpu.memory_space<vmem>>, vector<1x128x384xbf16>
    %61 = vector.shape_cast %60 : vector<1x128x384xbf16> to vector<128x384xbf16>
    %cst_30 = arith.constant dense<0.000000e+00> : vector<2x384xf32>
    %62 = tpu.matmul %59, %61, %cst_30 {dimension_numbers = #tpu.dot_dimension_numbers<[1], [0], [0], [1], [0, 0, 1, 1], [], []>} : vector<2x128xbf16>, vector<128x384xbf16>, vector<2x384xf32> -> vector<2x384xf32>
    %63 = vector.broadcast %9 : vector<1x384xf32> to vector<2x384xf32>
    %64 = arith.addf %62, %63 : vector<2x384xf32>
    %65 = vector.extract_strided_slice %58 {offsets = [0, 0], sizes = [2, 128], strides = [1, 1]} : vector<2x384xf32> to vector<2x128xf32>
    %66 = vector.extract_strided_slice %64 {offsets = [0, 0], sizes = [2, 128], strides = [1, 1]} : vector<2x384xf32> to vector<2x128xf32>
    %67 = arith.addf %65, %66 : vector<2x128xf32>
    %cst_31 = arith.constant 5.000000e-01 : f32
    %68 = vector.broadcast %cst_31 : f32 to vector<2x128xf32>
    %69 = arith.mulf %68, %67 : vector<2x128xf32>
    %70 = math.tanh %69 : vector<2x128xf32>
    %cst_32 = arith.constant 1.000000e+00 : f32
    %71 = vector.broadcast %cst_32 : f32 to vector<2x128xf32>
    %72 = arith.addf %70, %71 : vector<2x128xf32>
    %cst_33 = arith.constant 5.000000e-01 : f32
    %73 = vector.broadcast %cst_33 : f32 to vector<2x128xf32>
    %74 = arith.mulf %73, %72 : vector<2x128xf32>
    %75 = vector.extract_strided_slice %58 {offsets = [0, 128], sizes = [2, 128], strides = [1, 1]} : vector<2x384xf32> to vector<2x128xf32>
    %76 = vector.extract_strided_slice %64 {offsets = [0, 128], sizes = [2, 128], strides = [1, 1]} : vector<2x384xf32> to vector<2x128xf32>
    %77 = arith.addf %75, %76 : vector<2x128xf32>
    %cst_34 = arith.constant 5.000000e-01 : f32
    %78 = vector.broadcast %cst_34 : f32 to vector<2x128xf32>
    %79 = arith.mulf %78, %77 : vector<2x128xf32>
    %80 = math.tanh %79 : vector<2x128xf32>
    %cst_35 = arith.constant 1.000000e+00 : f32
    %81 = vector.broadcast %cst_35 : f32 to vector<2x128xf32>
    %82 = arith.addf %80, %81 : vector<2x128xf32>
    %cst_36 = arith.constant 5.000000e-01 : f32
    %83 = vector.broadcast %cst_36 : f32 to vector<2x128xf32>
    %84 = arith.mulf %83, %82 : vector<2x128xf32>
    %85 = vector.extract_strided_slice %58 {offsets = [0, 256], sizes = [2, 128], strides = [1, 1]} : vector<2x384xf32> to vector<2x128xf32>
    %86 = vector.extract_strided_slice %64 {offsets = [0, 256], sizes = [2, 128], strides = [1, 1]} : vector<2x384xf32> to vector<2x128xf32>
    %87 = arith.mulf %74, %86 : vector<2x128xf32>
    %88 = arith.addf %85, %87 : vector<2x128xf32>
    %89 = math.tanh %88 : vector<2x128xf32>
    %90 = arith.subf %52, %89 : vector<2x128xf32>
    %91 = arith.mulf %84, %90 : vector<2x128xf32>
    %92 = arith.addf %89, %91 : vector<2x128xf32>
    %c1_37 = arith.constant 1 : index
    %c0_38 = arith.constant 0 : index
    %c0_39 = arith.constant 0 : index
    %93 = vector.load %arg8[%c1_37, %c0_38, %c0_39] : memref<2x2x128xf32, #tpu.memory_space<vmem>>, vector<1x2x128xf32>
    %94 = vector.shape_cast %93 : vector<1x2x128xf32> to vector<2x128xf32>
    %95 = vector.shape_cast %92 : vector<2x128xf32> to vector<1x2x128xf32>
    tpu.vector_store %arg8[%c1_37, %c0_38, %c0_39], %95 {strides = array<i32>} : memref<2x2x128xf32, #tpu.memory_space<vmem>>, vector<1x2x128xf32>,
    %c0_40 = arith.constant 0 : index
    %c0_41 = arith.constant 0 : index
    %c0_42 = arith.constant 0 : index
    %96 = vector.load %arg7[%c0_40, %c0_41, %c0_42] : memref<2x8x128xf32, #tpu.memory_space<vmem>>, vector<2x1x128xf32>
    %97 = vector.shape_cast %96 : vector<2x1x128xf32> to vector<2x128xf32>
    %98 = vector.shape_cast %92 : vector<2x128xf32> to vector<2x1x128xf32>
    tpu.vector_store %arg7[%c0_40, %c0_41, %c0_42], %98 {strides = array<i32>} : memref<2x8x128xf32, #tpu.memory_space<vmem>>, vector<2x1x128xf32>,
    %c0_43 = arith.constant 0 : index
    %c0_44 = arith.constant 0 : index
    %c0_45 = arith.constant 0 : index
    %99 = vector.load %arg8[%c0_43, %c0_44, %c0_45] : memref<2x2x128xf32, #tpu.memory_space<vmem>>, vector<1x2x128xf32>
    %100 = vector.shape_cast %99 : vector<1x2x128xf32> to vector<2x128xf32>
    %c0_46 = arith.constant 0 : index
    %c1_47 = arith.constant 1 : index
    %c0_48 = arith.constant 0 : index
    %101 = vector.load %arg2[%c0_46, %c1_47, %c0_48] : memref<2x8x384xf32, #tpu.memory_space<vmem>>, vector<2x1x384xf32>
    %102 = vector.shape_cast %101 : vector<2x1x384xf32> to vector<2x384xf32>
    %103 = arith.truncf %100 : vector<2x128xf32> to vector<2x128xbf16>
    %c0_49 = arith.constant 0 : index
    %c0_50 = arith.constant 0 : index
    %c0_51 = arith.constant 0 : index
    %104 = vector.load %arg4[%c0_49, %c0_50, %c0_51] : memref<2x128x384xbf16, #tpu.memory_space<vmem>>, vector<1x128x384xbf16>
    %105 = vector.shape_cast %104 : vector<1x128x384xbf16> to vector<128x384xbf16>
    %cst_52 = arith.constant dense<0.000000e+00> : vector<2x384xf32>
    %106 = tpu.matmul %103, %105, %cst_52 {dimension_numbers = #tpu.dot_dimension_numbers<[1], [0], [0], [1], [0, 0, 1, 1], [], []>} : vector<2x128xbf16>, vector<128x384xbf16>, vector<2x384xf32> -> vector<2x384xf32>
    %107 = vector.broadcast %7 : vector<1x384xf32> to vector<2x384xf32>
    %108 = arith.addf %106, %107 : vector<2x384xf32>
    %109 = vector.extract_strided_slice %102 {offsets = [0, 0], sizes = [2, 128], strides = [1, 1]} : vector<2x384xf32> to vector<2x128xf32>
    %110 = vector.extract_strided_slice %108 {offsets = [0, 0], sizes = [2, 128], strides = [1, 1]} : vector<2x384xf32> to vector<2x128xf32>
    %111 = arith.addf %109, %110 : vector<2x128xf32>
    %cst_53 = arith.constant 5.000000e-01 : f32
    %112 = vector.broadcast %cst_53 : f32 to vector<2x128xf32>
    %113 = arith.mulf %112, %111 : vector<2x128xf32>
    %114 = math.tanh %113 : vector<2x128xf32>
    %cst_54 = arith.constant 1.000000e+00 : f32
    %115 = vector.broadcast %cst_54 : f32 to vector<2x128xf32>
    %116 = arith.addf %114, %115 : vector<2x128xf32>
    %cst_55 = arith.constant 5.000000e-01 : f32
    %117 = vector.broadcast %cst_55 : f32 to vector<2x128xf32>
    %118 = arith.mulf %117, %116 : vector<2x128xf32>
    %119 = vector.extract_strided_slice %102 {offsets = [0, 128], sizes = [2, 128], strides = [1, 1]} : vector<2x384xf32> to vector<2x128xf32>
    %120 = vector.extract_strided_slice %108 {offsets = [0, 128], sizes = [2, 128], strides = [1, 1]} : vector<2x384xf32> to vector<2x128xf32>
    %121 = arith.addf %119, %120 : vector<2x128xf32>
    %cst_56 = arith.constant 5.000000e-01 : f32
    %122 = vector.broadcast %cst_56 : f32 to vector<2x128xf32>
    %123 = arith.mulf %122, %121 : vector<2x128xf32>
    %124 = math.tanh %123 : vector<2x128xf32>
    %cst_57 = arith.constant 1.000000e+00 : f32
    %125 = vector.broadcast %cst_57 : f32 to vector<2x128xf32>
    %126 = arith.addf %124, %125 : vector<2x128xf32>
    %cst_58 = arith.constant 5.000000e-01 : f32
    %127 = vector.broadcast %cst_58 : f32 to vector<2x128xf32>
    %128 = arith.mulf %127, %126 : vector<2x128xf32>
    %129 = vector.extract_strided_slice %102 {offsets = [0, 256], sizes = [2, 128], strides = [1, 1]} : vector<2x384xf32> to vector<2x128xf32>
    %130 = vector.extract_strided_slice %108 {offsets = [0, 256], sizes = [2, 128], strides = [1, 1]} : vector<2x384xf32> to vector<2x128xf32>
    %131 = arith.mulf %118, %130 : vector<2x128xf32>
    %132 = arith.addf %129, %131 : vector<2x128xf32>
    %133 = math.tanh %132 : vector<2x128xf32>
    %134 = arith.subf %100, %133 : vector<2x128xf32>
    %135 = arith.mulf %128, %134 : vector<2x128xf32>
    %136 = arith.addf %133, %135 : vector<2x128xf32>
    %c0_59 = arith.constant 0 : index
    %c0_60 = arith.constant 0 : index
    %c0_61 = arith.constant 0 : index
    %137 = vector.load %arg8[%c0_59, %c0_60, %c0_61] : memref<2x2x128xf32, #tpu.memory_space<vmem>>, vector<1x2x128xf32>
    %138 = vector.shape_cast %137 : vector<1x2x128xf32> to vector<2x128xf32>
    %139 = vector.shape_cast %136 : vector<2x128xf32> to vector<1x2x128xf32>
    tpu.vector_store %arg8[%c0_59, %c0_60, %c0_61], %139 {strides = array<i32>} : memref<2x2x128xf32, #tpu.memory_space<vmem>>, vector<1x2x128xf32>,
    %c1_62 = arith.constant 1 : index
    %c0_63 = arith.constant 0 : index
    %c0_64 = arith.constant 0 : index
    %140 = vector.load %arg8[%c1_62, %c0_63, %c0_64] : memref<2x2x128xf32, #tpu.memory_space<vmem>>, vector<1x2x128xf32>
    %141 = vector.shape_cast %140 : vector<1x2x128xf32> to vector<2x128xf32>
    %142 = arith.truncf %136 : vector<2x128xf32> to vector<2x128xbf16>
    %c0_65 = arith.constant 0 : index
    %c0_66 = arith.constant 0 : index
    %c0_67 = arith.constant 0 : index
    %143 = vector.load %arg5[%c0_65, %c0_66, %c0_67] : memref<1x128x384xbf16, #tpu.memory_space<vmem>>, vector<1x128x384xbf16>
    %144 = vector.shape_cast %143 : vector<1x128x384xbf16> to vector<128x384xbf16>
    %cst_68 = arith.constant dense<0.000000e+00> : vector<2x384xf32>
    %145 = tpu.matmul %142, %144, %cst_68 {dimension_numbers = #tpu.dot_dimension_numbers<[1], [0], [0], [1], [0, 0, 1, 1], [], []>} : vector<2x128xbf16>, vector<128x384xbf16>, vector<2x384xf32> -> vector<2x384xf32>
    %146 = vector.broadcast %5 : vector<1x384xf32> to vector<2x384xf32>
    %147 = arith.addf %145, %146 : vector<2x384xf32>
    %148 = arith.truncf %141 : vector<2x128xf32> to vector<2x128xbf16>
    %c1_69 = arith.constant 1 : index
    %c0_70 = arith.constant 0 : index
    %c0_71 = arith.constant 0 : index
    %149 = vector.load %arg4[%c1_69, %c0_70, %c0_71] : memref<2x128x384xbf16, #tpu.memory_space<vmem>>, vector<1x128x384xbf16>
    %150 = vector.shape_cast %149 : vector<1x128x384xbf16> to vector<128x384xbf16>
    %cst_72 = arith.constant dense<0.000000e+00> : vector<2x384xf32>
    %151 = tpu.matmul %148, %150, %cst_72 {dimension_numbers = #tpu.dot_dimension_numbers<[1], [0], [0], [1], [0, 0, 1, 1], [], []>} : vector<2x128xbf16>, vector<128x384xbf16>, vector<2x384xf32> -> vector<2x384xf32>
    %152 = vector.broadcast %9 : vector<1x384xf32> to vector<2x384xf32>
    %153 = arith.addf %151, %152 : vector<2x384xf32>
    %154 = vector.extract_strided_slice %147 {offsets = [0, 0], sizes = [2, 128], strides = [1, 1]} : vector<2x384xf32> to vector<2x128xf32>
    %155 = vector.extract_strided_slice %153 {offsets = [0, 0], sizes = [2, 128], strides = [1, 1]} : vector<2x384xf32> to vector<2x128xf32>
    %156 = arith.addf %154, %155 : vector<2x128xf32>
    %cst_73 = arith.constant 5.000000e-01 : f32
    %157 = vector.broadcast %cst_73 : f32 to vector<2x128xf32>
    %158 = arith.mulf %157, %156 : vector<2x128xf32>
    %159 = math.tanh %158 : vector<2x128xf32>
    %cst_74 = arith.constant 1.000000e+00 : f32
    %160 = vector.broadcast %cst_74 : f32 to vector<2x128xf32>
    %161 = arith.addf %159, %160 : vector<2x128xf32>
    %cst_75 = arith.constant 5.000000e-01 : f32
    %162 = vector.broadcast %cst_75 : f32 to vector<2x128xf32>
    %163 = arith.mulf %162, %161 : vector<2x128xf32>
    %164 = vector.extract_strided_slice %147 {offsets = [0, 128], sizes = [2, 128], strides = [1, 1]} : vector<2x384xf32> to vector<2x128xf32>
    %165 = vector.extract_strided_slice %153 {offsets = [0, 128], sizes = [2, 128], strides = [1, 1]} : vector<2x384xf32> to vector<2x128xf32>
    %166 = arith.addf %164, %165 : vector<2x128xf32>
    %cst_76 = arith.constant 5.000000e-01 : f32
    %167 = vector.broadcast %cst_76 : f32 to vector<2x128xf32>
    %168 = arith.mulf %167, %166 : vector<2x128xf32>
    %169 = math.tanh %168 : vector<2x128xf32>
    %cst_77 = arith.constant 1.000000e+00 : f32
    %170 = vector.broadcast %cst_77 : f32 to vector<2x128xf32>
    %171 = arith.addf %169, %170 : vector<2x128xf32>
    %cst_78 = arith.constant 5.000000e-01 : f32
    %172 = vector.broadcast %cst_78 : f32 to vector<2x128xf32>
    %173 = arith.mulf %172, %171 : vector<2x128xf32>
    %174 = vector.extract_strided_slice %147 {offsets = [0, 256], sizes = [2, 128], strides = [1, 1]} : vector<2x384xf32> to vector<2x128xf32>
    %175 = vector.extract_strided_slice %153 {offsets = [0, 256], sizes = [2, 128], strides = [1, 1]} : vector<2x384xf32> to vector<2x128xf32>
    %176 = arith.mulf %163, %175 : vector<2x128xf32>
    %177 = arith.addf %174, %176 : vector<2x128xf32>
    %178 = math.tanh %177 : vector<2x128xf32>
    %179 = arith.subf %141, %178 : vector<2x128xf32>
    %180 = arith.mulf %173, %179 : vector<2x128xf32>
    %181 = arith.addf %178, %180 : vector<2x128xf32>
    %c1_79 = arith.constant 1 : index
    %c0_80 = arith.constant 0 : index
    %c0_81 = arith.constant 0 : index
    %182 = vector.load %arg8[%c1_79, %c0_80, %c0_81] : memref<2x2x128xf32, #tpu.memory_space<vmem>>, vector<1x2x128xf32>
    %183 = vector.shape_cast %182 : vector<1x2x128xf32> to vector<2x128xf32>
    %184 = vector.shape_cast %181 : vector<2x128xf32> to vector<1x2x128xf32>
    tpu.vector_store %arg8[%c1_79, %c0_80, %c0_81], %184 {strides = array<i32>} : memref<2x2x128xf32, #tpu.memory_space<vmem>>, vector<1x2x128xf32>,
    %c0_82 = arith.constant 0 : index
    %c1_83 = arith.constant 1 : index
    %c0_84 = arith.constant 0 : index
    %185 = vector.load %arg7[%c0_82, %c1_83, %c0_84] : memref<2x8x128xf32, #tpu.memory_space<vmem>>, vector<2x1x128xf32>
    %186 = vector.shape_cast %185 : vector<2x1x128xf32> to vector<2x128xf32>
    %187 = vector.shape_cast %181 : vector<2x128xf32> to vector<2x1x128xf32>
    tpu.vector_store %arg7[%c0_82, %c1_83, %c0_84], %187 {strides = array<i32>} : memref<2x8x128xf32, #tpu.memory_space<vmem>>, vector<2x1x128xf32>,
    %c0_85 = arith.constant 0 : index
    %c0_86 = arith.constant 0 : index
    %c0_87 = arith.constant 0 : index
    %188 = vector.load %arg8[%c0_85, %c0_86, %c0_87] : memref<2x2x128xf32, #tpu.memory_space<vmem>>, vector<1x2x128xf32>
    %189 = vector.shape_cast %188 : vector<1x2x128xf32> to vector<2x128xf32>
    %c0_88 = arith.constant 0 : index
    %c2 = arith.constant 2 : index
    %c0_89 = arith.constant 0 : index
    %190 = vector.load %arg2[%c0_88, %c2, %c0_89] : memref<2x8x384xf32, #tpu.memory_space<vmem>>, vector<2x1x384xf32>
    %191 = vector.shape_cast %190 : vector<2x1x384xf32> to vector<2x384xf32>
    %192 = arith.truncf %189 : vector<2x128xf32> to vector<2x128xbf16>
    %c0_90 = arith.constant 0 : index
    %c0_91 = arith.constant 0 : index
    %c0_92 = arith.constant 0 : index
    %193 = vector.load %arg4[%c0_90, %c0_91, %c0_92] : memref<2x128x384xbf16, #tpu.memory_space<vmem>>, vector<1x128x384xbf16>
    %194 = vector.shape_cast %193 : vector<1x128x384xbf16> to vector<128x384xbf16>
    %cst_93 = arith.constant dense<0.000000e+00> : vector<2x384xf32>
    %195 = tpu.matmul %192, %194, %cst_93 {dimension_numbers = #tpu.dot_dimension_numbers<[1], [0], [0], [1], [0, 0, 1, 1], [], []>} : vector<2x128xbf16>, vector<128x384xbf16>, vector<2x384xf32> -> vector<2x384xf32>
    %196 = vector.broadcast %7 : vector<1x384xf32> to vector<2x384xf32>
    %197 = arith.addf %195, %196 : vector<2x384xf32>
    %198 = vector.extract_strided_slice %191 {offsets = [0, 0], sizes = [2, 128], strides = [1, 1]} : vector<2x384xf32> to vector<2x128xf32>
    %199 = vector.extract_strided_slice %197 {offsets = [0, 0], sizes = [2, 128], strides = [1, 1]} : vector<2x384xf32> to vector<2x128xf32>
    %200 = arith.addf %198, %199 : vector<2x128xf32>
    %cst_94 = arith.constant 5.000000e-01 : f32
    %201 = vector.broadcast %cst_94 : f32 to vector<2x128xf32>
    %202 = arith.mulf %201, %200 : vector<2x128xf32>
    %203 = math.tanh %202 : vector<2x128xf32>
    %cst_95 = arith.constant 1.000000e+00 : f32
    %204 = vector.broadcast %cst_95 : f32 to vector<2x128xf32>
    %205 = arith.addf %203, %204 : vector<2x128xf32>
    %cst_96 = arith.constant 5.000000e-01 : f32
    %206 = vector.broadcast %cst_96 : f32 to vector<2x128xf32>
    %207 = arith.mulf %206, %205 : vector<2x128xf32>
    %208 = vector.extract_strided_slice %191 {offsets = [0, 128], sizes = [2, 128], strides = [1, 1]} : vector<2x384xf32> to vector<2x128xf32>
    %209 = vector.extract_strided_slice %197 {offsets = [0, 128], sizes = [2, 128], strides = [1, 1]} : vector<2x384xf32> to vector<2x128xf32>
    %210 = arith.addf %208, %209 : vector<2x128xf32>
    %cst_97 = arith.constant 5.000000e-01 : f32
    %211 = vector.broadcast %cst_97 : f32 to vector<2x128xf32>
    %212 = arith.mulf %211, %210 : vector<2x128xf32>
    %213 = math.tanh %212 : vector<2x128xf32>
    %cst_98 = arith.constant 1.000000e+00 : f32
    %214 = vector.broadcast %cst_98 : f32 to vector<2x128xf32>
    %215 = arith.addf %213, %214 : vector<2x128xf32>
    %cst_99 = arith.constant 5.000000e-01 : f32
    %216 = vector.broadcast %cst_99 : f32 to vector<2x128xf32>
    %217 = arith.mulf %216, %215 : vector<2x128xf32>
    %218 = vector.extract_strided_slice %191 {offsets = [0, 256], sizes = [2, 128], strides = [1, 1]} : vector<2x384xf32> to vector<2x128xf32>
    %219 = vector.extract_strided_slice %197 {offsets = [0, 256], sizes = [2, 128], strides = [1, 1]} : vector<2x384xf32> to vector<2x128xf32>
    %220 = arith.mulf %207, %219 : vector<2x128xf32>
    %221 = arith.addf %218, %220 : vector<2x128xf32>
    %222 = math.tanh %221 : vector<2x128xf32>
    %223 = arith.subf %189, %222 : vector<2x128xf32>
    %224 = arith.mulf %217, %223 : vector<2x128xf32>
    %225 = arith.addf %222, %224 : vector<2x128xf32>
    %c0_100 = arith.constant 0 : index
    %c0_101 = arith.constant 0 : index
    %c0_102 = arith.constant 0 : index
    %226 = vector.load %arg8[%c0_100, %c0_101, %c0_102] : memref<2x2x128xf32, #tpu.memory_space<vmem>>, vector<1x2x128xf32>
    %227 = vector.shape_cast %226 : vector<1x2x128xf32> to vector<2x128xf32>
    %228 = vector.shape_cast %225 : vector<2x128xf32> to vector<1x2x128xf32>
    tpu.vector_store %arg8[%c0_100, %c0_101, %c0_102], %228 {strides = array<i32>} : memref<2x2x128xf32, #tpu.memory_space<vmem>>, vector<1x2x128xf32>,
    %c1_103 = arith.constant 1 : index
    %c0_104 = arith.constant 0 : index
    %c0_105 = arith.constant 0 : index
    %229 = vector.load %arg8[%c1_103, %c0_104, %c0_105] : memref<2x2x128xf32, #tpu.memory_space<vmem>>, vector<1x2x128xf32>
    %230 = vector.shape_cast %229 : vector<1x2x128xf32> to vector<2x128xf32>
    %231 = arith.truncf %225 : vector<2x128xf32> to vector<2x128xbf16>
    %c0_106 = arith.constant 0 : index
    %c0_107 = arith.constant 0 : index
    %c0_108 = arith.constant 0 : index
    %232 = vector.load %arg5[%c0_106, %c0_107, %c0_108] : memref<1x128x384xbf16, #tpu.memory_space<vmem>>, vector<1x128x384xbf16>
    %233 = vector.shape_cast %232 : vector<1x128x384xbf16> to vector<128x384xbf16>
    %cst_109 = arith.constant dense<0.000000e+00> : vector<2x384xf32>
    %234 = tpu.matmul %231, %233, %cst_109 {dimension_numbers = #tpu.dot_dimension_numbers<[1], [0], [0], [1], [0, 0, 1, 1], [], []>} : vector<2x128xbf16>, vector<128x384xbf16>, vector<2x384xf32> -> vector<2x384xf32>
    %235 = vector.broadcast %5 : vector<1x384xf32> to vector<2x384xf32>
    %236 = arith.addf %234, %235 : vector<2x384xf32>
    %237 = arith.truncf %230 : vector<2x128xf32> to vector<2x128xbf16>
    %c1_110 = arith.constant 1 : index
    %c0_111 = arith.constant 0 : index
    %c0_112 = arith.constant 0 : index
    %238 = vector.load %arg4[%c1_110, %c0_111, %c0_112] : memref<2x128x384xbf16, #tpu.memory_space<vmem>>, vector<1x128x384xbf16>
    %239 = vector.shape_cast %238 : vector<1x128x384xbf16> to vector<128x384xbf16>
    %cst_113 = arith.constant dense<0.000000e+00> : vector<2x384xf32>
    %240 = tpu.matmul %237, %239, %cst_113 {dimension_numbers = #tpu.dot_dimension_numbers<[1], [0], [0], [1], [0, 0, 1, 1], [], []>} : vector<2x128xbf16>, vector<128x384xbf16>, vector<2x384xf32> -> vector<2x384xf32>
    %241 = vector.broadcast %9 : vector<1x384xf32> to vector<2x384xf32>
    %242 = arith.addf %240, %241 : vector<2x384xf32>
    %243 = vector.extract_strided_slice %236 {offsets = [0, 0], sizes = [2, 128], strides = [1, 1]} : vector<2x384xf32> to vector<2x128xf32>
    %244 = vector.extract_strided_slice %242 {offsets = [0, 0], sizes = [2, 128], strides = [1, 1]} : vector<2x384xf32> to vector<2x128xf32>
    %245 = arith.addf %243, %244 : vector<2x128xf32>
    %cst_114 = arith.constant 5.000000e-01 : f32
    %246 = vector.broadcast %cst_114 : f32 to vector<2x128xf32>
    %247 = arith.mulf %246, %245 : vector<2x128xf32>
    %248 = math.tanh %247 : vector<2x128xf32>
    %cst_115 = arith.constant 1.000000e+00 : f32
    %249 = vector.broadcast %cst_115 : f32 to vector<2x128xf32>
    %250 = arith.addf %248, %249 : vector<2x128xf32>
    %cst_116 = arith.constant 5.000000e-01 : f32
    %251 = vector.broadcast %cst_116 : f32 to vector<2x128xf32>
    %252 = arith.mulf %251, %250 : vector<2x128xf32>
    %253 = vector.extract_strided_slice %236 {offsets = [0, 128], sizes = [2, 128], strides = [1, 1]} : vector<2x384xf32> to vector<2x128xf32>
    %254 = vector.extract_strided_slice %242 {offsets = [0, 128], sizes = [2, 128], strides = [1, 1]} : vector<2x384xf32> to vector<2x128xf32>
    %255 = arith.addf %253, %254 : vector<2x128xf32>
    %cst_117 = arith.constant 5.000000e-01 : f32
    %256 = vector.broadcast %cst_117 : f32 to vector<2x128xf32>
    %257 = arith.mulf %256, %255 : vector<2x128xf32>
    %258 = math.tanh %257 : vector<2x128xf32>
    %cst_118 = arith.constant 1.000000e+00 : f32
    %259 = vector.broadcast %cst_118 : f32 to vector<2x128xf32>
    %260 = arith.addf %258, %259 : vector<2x128xf32>
    %cst_119 = arith.constant 5.000000e-01 : f32
    %261 = vector.broadcast %cst_119 : f32 to vector<2x128xf32>
    %262 = arith.mulf %261, %260 : vector<2x128xf32>
    %263 = vector.extract_strided_slice %236 {offsets = [0, 256], sizes = [2, 128], strides = [1, 1]} : vector<2x384xf32> to vector<2x128xf32>
    %264 = vector.extract_strided_slice %242 {offsets = [0, 256], sizes = [2, 128], strides = [1, 1]} : vector<2x384xf32> to vector<2x128xf32>
    %265 = arith.mulf %252, %264 : vector<2x128xf32>
    %266 = arith.addf %263, %265 : vector<2x128xf32>
    %267 = math.tanh %266 : vector<2x128xf32>
    %268 = arith.subf %230, %267 : vector<2x128xf32>
    %269 = arith.mulf %262, %268 : vector<2x128xf32>
    %270 = arith.addf %267, %269 : vector<2x128xf32>
    %c1_120 = arith.constant 1 : index
    %c0_121 = arith.constant 0 : index
    %c0_122 = arith.constant 0 : index
    %271 = vector.load %arg8[%c1_120, %c0_121, %c0_122] : memref<2x2x128xf32, #tpu.memory_space<vmem>>, vector<1x2x128xf32>
    %272 = vector.shape_cast %271 : vector<1x2x128xf32> to vector<2x128xf32>
    %273 = vector.shape_cast %270 : vector<2x128xf32> to vector<1x2x128xf32>
    tpu.vector_store %arg8[%c1_120, %c0_121, %c0_122], %273 {strides = array<i32>} : memref<2x2x128xf32, #tpu.memory_space<vmem>>, vector<1x2x128xf32>,
    %c0_123 = arith.constant 0 : index
    %c2_124 = arith.constant 2 : index
    %c0_125 = arith.constant 0 : index
    %274 = vector.load %arg7[%c0_123, %c2_124, %c0_125] : memref<2x8x128xf32, #tpu.memory_space<vmem>>, vector<2x1x128xf32>
    %275 = vector.shape_cast %274 : vector<2x1x128xf32> to vector<2x128xf32>
    %276 = vector.shape_cast %270 : vector<2x128xf32> to vector<2x1x128xf32>
    tpu.vector_store %arg7[%c0_123, %c2_124, %c0_125], %276 {strides = array<i32>} : memref<2x8x128xf32, #tpu.memory_space<vmem>>, vector<2x1x128xf32>,
    %c0_126 = arith.constant 0 : index
    %c0_127 = arith.constant 0 : index
    %c0_128 = arith.constant 0 : index
    %277 = vector.load %arg8[%c0_126, %c0_127, %c0_128] : memref<2x2x128xf32, #tpu.memory_space<vmem>>, vector<1x2x128xf32>
    %278 = vector.shape_cast %277 : vector<1x2x128xf32> to vector<2x128xf32>
    %c0_129 = arith.constant 0 : index
    %c3 = arith.constant 3 : index
    %c0_130 = arith.constant 0 : index
    %279 = vector.load %arg2[%c0_129, %c3, %c0_130] : memref<2x8x384xf32, #tpu.memory_space<vmem>>, vector<2x1x384xf32>
    %280 = vector.shape_cast %279 : vector<2x1x384xf32> to vector<2x384xf32>
    %281 = arith.truncf %278 : vector<2x128xf32> to vector<2x128xbf16>
    %c0_131 = arith.constant 0 : index
    %c0_132 = arith.constant 0 : index
    %c0_133 = arith.constant 0 : index
    %282 = vector.load %arg4[%c0_131, %c0_132, %c0_133] : memref<2x128x384xbf16, #tpu.memory_space<vmem>>, vector<1x128x384xbf16>
    %283 = vector.shape_cast %282 : vector<1x128x384xbf16> to vector<128x384xbf16>
    %cst_134 = arith.constant dense<0.000000e+00> : vector<2x384xf32>
    %284 = tpu.matmul %281, %283, %cst_134 {dimension_numbers = #tpu.dot_dimension_numbers<[1], [0], [0], [1], [0, 0, 1, 1], [], []>} : vector<2x128xbf16>, vector<128x384xbf16>, vector<2x384xf32> -> vector<2x384xf32>
    %285 = vector.broadcast %7 : vector<1x384xf32> to vector<2x384xf32>
    %286 = arith.addf %284, %285 : vector<2x384xf32>
    %287 = vector.extract_strided_slice %280 {offsets = [0, 0], sizes = [2, 128], strides = [1, 1]} : vector<2x384xf32> to vector<2x128xf32>
    %288 = vector.extract_strided_slice %286 {offsets = [0, 0], sizes = [2, 128], strides = [1, 1]} : vector<2x384xf32> to vector<2x128xf32>
    %289 = arith.addf %287, %288 : vector<2x128xf32>
    %cst_135 = arith.constant 5.000000e-01 : f32
    %290 = vector.broadcast %cst_135 : f32 to vector<2x128xf32>
    %291 = arith.mulf %290, %289 : vector<2x128xf32>
    %292 = math.tanh %291 : vector<2x128xf32>
    %cst_136 = arith.constant 1.000000e+00 : f32
    %293 = vector.broadcast %cst_136 : f32 to vector<2x128xf32>
    %294 = arith.addf %292, %293 : vector<2x128xf32>
    %cst_137 = arith.constant 5.000000e-01 : f32
    %295 = vector.broadcast %cst_137 : f32 to vector<2x128xf32>
    %296 = arith.mulf %295, %294 : vector<2x128xf32>
    %297 = vector.extract_strided_slice %280 {offsets = [0, 128], sizes = [2, 128], strides = [1, 1]} : vector<2x384xf32> to vector<2x128xf32>
    %298 = vector.extract_strided_slice %286 {offsets = [0, 128], sizes = [2, 128], strides = [1, 1]} : vector<2x384xf32> to vector<2x128xf32>
    %299 = arith.addf %297, %298 : vector<2x128xf32>
    %cst_138 = arith.constant 5.000000e-01 : f32
    %300 = vector.broadcast %cst_138 : f32 to vector<2x128xf32>
    %301 = arith.mulf %300, %299 : vector<2x128xf32>
    %302 = math.tanh %301 : vector<2x128xf32>
    %cst_139 = arith.constant 1.000000e+00 : f32
    %303 = vector.broadcast %cst_139 : f32 to vector<2x128xf32>
    %304 = arith.addf %302, %303 : vector<2x128xf32>
    %cst_140 = arith.constant 5.000000e-01 : f32
    %305 = vector.broadcast %cst_140 : f32 to vector<2x128xf32>
    %306 = arith.mulf %305, %304 : vector<2x128xf32>
    %307 = vector.extract_strided_slice %280 {offsets = [0, 256], sizes = [2, 128], strides = [1, 1]} : vector<2x384xf32> to vector<2x128xf32>
    %308 = vector.extract_strided_slice %286 {offsets = [0, 256], sizes = [2, 128], strides = [1, 1]} : vector<2x384xf32> to vector<2x128xf32>
    %309 = arith.mulf %296, %308 : vector<2x128xf32>
    %310 = arith.addf %307, %309 : vector<2x128xf32>
    %311 = math.tanh %310 : vector<2x128xf32>
    %312 = arith.subf %278, %311 : vector<2x128xf32>
    %313 = arith.mulf %306, %312 : vector<2x128xf32>
    %314 = arith.addf %311, %313 : vector<2x128xf32>
    %c0_141 = arith.constant 0 : index
    %c0_142 = arith.constant 0 : index
    %c0_143 = arith.constant 0 : index
    %315 = vector.load %arg8[%c0_141, %c0_142, %c0_143] : memref<2x2x128xf32, #tpu.memory_space<vmem>>, vector<1x2x128xf32>
    %316 = vector.shape_cast %315 : vector<1x2x128xf32> to vector<2x128xf32>
    %317 = vector.shape_cast %314 : vector<2x128xf32> to vector<1x2x128xf32>
    tpu.vector_store %arg8[%c0_141, %c0_142, %c0_143], %317 {strides = array<i32>} : memref<2x2x128xf32, #tpu.memory_space<vmem>>, vector<1x2x128xf32>,
    %c1_144 = arith.constant 1 : index
    %c0_145 = arith.constant 0 : index
    %c0_146 = arith.constant 0 : index
    %318 = vector.load %arg8[%c1_144, %c0_145, %c0_146] : memref<2x2x128xf32, #tpu.memory_space<vmem>>, vector<1x2x128xf32>
    %319 = vector.shape_cast %318 : vector<1x2x128xf32> to vector<2x128xf32>
    %320 = arith.truncf %314 : vector<2x128xf32> to vector<2x128xbf16>
    %c0_147 = arith.constant 0 : index
    %c0_148 = arith.constant 0 : index
    %c0_149 = arith.constant 0 : index
    %321 = vector.load %arg5[%c0_147, %c0_148, %c0_149] : memref<1x128x384xbf16, #tpu.memory_space<vmem>>, vector<1x128x384xbf16>
    %322 = vector.shape_cast %321 : vector<1x128x384xbf16> to vector<128x384xbf16>
    %cst_150 = arith.constant dense<0.000000e+00> : vector<2x384xf32>
    %323 = tpu.matmul %320, %322, %cst_150 {dimension_numbers = #tpu.dot_dimension_numbers<[1], [0], [0], [1], [0, 0, 1, 1], [], []>} : vector<2x128xbf16>, vector<128x384xbf16>, vector<2x384xf32> -> vector<2x384xf32>
    %324 = vector.broadcast %5 : vector<1x384xf32> to vector<2x384xf32>
    %325 = arith.addf %323, %324 : vector<2x384xf32>
    %326 = arith.truncf %319 : vector<2x128xf32> to vector<2x128xbf16>
    %c1_151 = arith.constant 1 : index
    %c0_152 = arith.constant 0 : index
    %c0_153 = arith.constant 0 : index
    %327 = vector.load %arg4[%c1_151, %c0_152, %c0_153] : memref<2x128x384xbf16, #tpu.memory_space<vmem>>, vector<1x128x384xbf16>
    %328 = vector.shape_cast %327 : vector<1x128x384xbf16> to vector<128x384xbf16>
    %cst_154 = arith.constant dense<0.000000e+00> : vector<2x384xf32>
    %329 = tpu.matmul %326, %328, %cst_154 {dimension_numbers = #tpu.dot_dimension_numbers<[1], [0], [0], [1], [0, 0, 1, 1], [], []>} : vector<2x128xbf16>, vector<128x384xbf16>, vector<2x384xf32> -> vector<2x384xf32>
    %330 = vector.broadcast %9 : vector<1x384xf32> to vector<2x384xf32>
    %331 = arith.addf %329, %330 : vector<2x384xf32>
    %332 = vector.extract_strided_slice %325 {offsets = [0, 0], sizes = [2, 128], strides = [1, 1]} : vector<2x384xf32> to vector<2x128xf32>
    %333 = vector.extract_strided_slice %331 {offsets = [0, 0], sizes = [2, 128], strides = [1, 1]} : vector<2x384xf32> to vector<2x128xf32>
    %334 = arith.addf %332, %333 : vector<2x128xf32>
    %cst_155 = arith.constant 5.000000e-01 : f32
    %335 = vector.broadcast %cst_155 : f32 to vector<2x128xf32>
    %336 = arith.mulf %335, %334 : vector<2x128xf32>
    %337 = math.tanh %336 : vector<2x128xf32>
    %cst_156 = arith.constant 1.000000e+00 : f32
    %338 = vector.broadcast %cst_156 : f32 to vector<2x128xf32>
    %339 = arith.addf %337, %338 : vector<2x128xf32>
    %cst_157 = arith.constant 5.000000e-01 : f32
    %340 = vector.broadcast %cst_157 : f32 to vector<2x128xf32>
    %341 = arith.mulf %340, %339 : vector<2x128xf32>
    %342 = vector.extract_strided_slice %325 {offsets = [0, 128], sizes = [2, 128], strides = [1, 1]} : vector<2x384xf32> to vector<2x128xf32>
    %343 = vector.extract_strided_slice %331 {offsets = [0, 128], sizes = [2, 128], strides = [1, 1]} : vector<2x384xf32> to vector<2x128xf32>
    %344 = arith.addf %342, %343 : vector<2x128xf32>
    %cst_158 = arith.constant 5.000000e-01 : f32
    %345 = vector.broadcast %cst_158 : f32 to vector<2x128xf32>
    %346 = arith.mulf %345, %344 : vector<2x128xf32>
    %347 = math.tanh %346 : vector<2x128xf32>
    %cst_159 = arith.constant 1.000000e+00 : f32
    %348 = vector.broadcast %cst_159 : f32 to vector<2x128xf32>
    %349 = arith.addf %347, %348 : vector<2x128xf32>
    %cst_160 = arith.constant 5.000000e-01 : f32
    %350 = vector.broadcast %cst_160 : f32 to vector<2x128xf32>
    %351 = arith.mulf %350, %349 : vector<2x128xf32>
    %352 = vector.extract_strided_slice %325 {offsets = [0, 256], sizes = [2, 128], strides = [1, 1]} : vector<2x384xf32> to vector<2x128xf32>
    %353 = vector.extract_strided_slice %331 {offsets = [0, 256], sizes = [2, 128], strides = [1, 1]} : vector<2x384xf32> to vector<2x128xf32>
    %354 = arith.mulf %341, %353 : vector<2x128xf32>
    %355 = arith.addf %352, %354 : vector<2x128xf32>
    %356 = math.tanh %355 : vector<2x128xf32>
    %357 = arith.subf %319, %356 : vector<2x128xf32>
    %358 = arith.mulf %351, %357 : vector<2x128xf32>
    %359 = arith.addf %356, %358 : vector<2x128xf32>
    %c1_161 = arith.constant 1 : index
    %c0_162 = arith.constant 0 : index
    %c0_163 = arith.constant 0 : index
    %360 = vector.load %arg8[%c1_161, %c0_162, %c0_163] : memref<2x2x128xf32, #tpu.memory_space<vmem>>, vector<1x2x128xf32>
    %361 = vector.shape_cast %360 : vector<1x2x128xf32> to vector<2x128xf32>
    %362 = vector.shape_cast %359 : vector<2x128xf32> to vector<1x2x128xf32>
    tpu.vector_store %arg8[%c1_161, %c0_162, %c0_163], %362 {strides = array<i32>} : memref<2x2x128xf32, #tpu.memory_space<vmem>>, vector<1x2x128xf32>,
    %c0_164 = arith.constant 0 : index
    %c3_165 = arith.constant 3 : index
    %c0_166 = arith.constant 0 : index
    %363 = vector.load %arg7[%c0_164, %c3_165, %c0_166] : memref<2x8x128xf32, #tpu.memory_space<vmem>>, vector<2x1x128xf32>
    %364 = vector.shape_cast %363 : vector<2x1x128xf32> to vector<2x128xf32>
    %365 = vector.shape_cast %359 : vector<2x128xf32> to vector<2x1x128xf32>
    tpu.vector_store %arg7[%c0_164, %c3_165, %c0_166], %365 {strides = array<i32>} : memref<2x8x128xf32, #tpu.memory_space<vmem>>, vector<2x1x128xf32>,
    %c0_167 = arith.constant 0 : index
    %c0_168 = arith.constant 0 : index
    %c0_169 = arith.constant 0 : index
    %366 = vector.load %arg8[%c0_167, %c0_168, %c0_169] : memref<2x2x128xf32, #tpu.memory_space<vmem>>, vector<1x2x128xf32>
    %367 = vector.shape_cast %366 : vector<1x2x128xf32> to vector<2x128xf32>
    %c0_170 = arith.constant 0 : index
    %c4 = arith.constant 4 : index
    %c0_171 = arith.constant 0 : index
    %368 = vector.load %arg2[%c0_170, %c4, %c0_171] : memref<2x8x384xf32, #tpu.memory_space<vmem>>, vector<2x1x384xf32>
    %369 = vector.shape_cast %368 : vector<2x1x384xf32> to vector<2x384xf32>
    %370 = arith.truncf %367 : vector<2x128xf32> to vector<2x128xbf16>
    %c0_172 = arith.constant 0 : index
    %c0_173 = arith.constant 0 : index
    %c0_174 = arith.constant 0 : index
    %371 = vector.load %arg4[%c0_172, %c0_173, %c0_174] : memref<2x128x384xbf16, #tpu.memory_space<vmem>>, vector<1x128x384xbf16>
    %372 = vector.shape_cast %371 : vector<1x128x384xbf16> to vector<128x384xbf16>
    %cst_175 = arith.constant dense<0.000000e+00> : vector<2x384xf32>
    %373 = tpu.matmul %370, %372, %cst_175 {dimension_numbers = #tpu.dot_dimension_numbers<[1], [0], [0], [1], [0, 0, 1, 1], [], []>} : vector<2x128xbf16>, vector<128x384xbf16>, vector<2x384xf32> -> vector<2x384xf32>
    %374 = vector.broadcast %7 : vector<1x384xf32> to vector<2x384xf32>
    %375 = arith.addf %373, %374 : vector<2x384xf32>
    %376 = vector.extract_strided_slice %369 {offsets = [0, 0], sizes = [2, 128], strides = [1, 1]} : vector<2x384xf32> to vector<2x128xf32>
    %377 = vector.extract_strided_slice %375 {offsets = [0, 0], sizes = [2, 128], strides = [1, 1]} : vector<2x384xf32> to vector<2x128xf32>
    %378 = arith.addf %376, %377 : vector<2x128xf32>
    %cst_176 = arith.constant 5.000000e-01 : f32
    %379 = vector.broadcast %cst_176 : f32 to vector<2x128xf32>
    %380 = arith.mulf %379, %378 : vector<2x128xf32>
    %381 = math.tanh %380 : vector<2x128xf32>
    %cst_177 = arith.constant 1.000000e+00 : f32
    %382 = vector.broadcast %cst_177 : f32 to vector<2x128xf32>
    %383 = arith.addf %381, %382 : vector<2x128xf32>
    %cst_178 = arith.constant 5.000000e-01 : f32
    %384 = vector.broadcast %cst_178 : f32 to vector<2x128xf32>
    %385 = arith.mulf %384, %383 : vector<2x128xf32>
    %386 = vector.extract_strided_slice %369 {offsets = [0, 128], sizes = [2, 128], strides = [1, 1]} : vector<2x384xf32> to vector<2x128xf32>
    %387 = vector.extract_strided_slice %375 {offsets = [0, 128], sizes = [2, 128], strides = [1, 1]} : vector<2x384xf32> to vector<2x128xf32>
    %388 = arith.addf %386, %387 : vector<2x128xf32>
    %cst_179 = arith.constant 5.000000e-01 : f32
    %389 = vector.broadcast %cst_179 : f32 to vector<2x128xf32>
    %390 = arith.mulf %389, %388 : vector<2x128xf32>
    %391 = math.tanh %390 : vector<2x128xf32>
    %cst_180 = arith.constant 1.000000e+00 : f32
    %392 = vector.broadcast %cst_180 : f32 to vector<2x128xf32>
    %393 = arith.addf %391, %392 : vector<2x128xf32>
    %cst_181 = arith.constant 5.000000e-01 : f32
    %394 = vector.broadcast %cst_181 : f32 to vector<2x128xf32>
    %395 = arith.mulf %394, %393 : vector<2x128xf32>
    %396 = vector.extract_strided_slice %369 {offsets = [0, 256], sizes = [2, 128], strides = [1, 1]} : vector<2x384xf32> to vector<2x128xf32>
    %397 = vector.extract_strided_slice %375 {offsets = [0, 256], sizes = [2, 128], strides = [1, 1]} : vector<2x384xf32> to vector<2x128xf32>
    %398 = arith.mulf %385, %397 : vector<2x128xf32>
    %399 = arith.addf %396, %398 : vector<2x128xf32>
    %400 = math.tanh %399 : vector<2x128xf32>
    %401 = arith.subf %367, %400 : vector<2x128xf32>
    %402 = arith.mulf %395, %401 : vector<2x128xf32>
    %403 = arith.addf %400, %402 : vector<2x128xf32>
    %c0_182 = arith.constant 0 : index
    %c0_183 = arith.constant 0 : index
    %c0_184 = arith.constant 0 : index
    %404 = vector.load %arg8[%c0_182, %c0_183, %c0_184] : memref<2x2x128xf32, #tpu.memory_space<vmem>>, vector<1x2x128xf32>
    %405 = vector.shape_cast %404 : vector<1x2x128xf32> to vector<2x128xf32>
    %406 = vector.shape_cast %403 : vector<2x128xf32> to vector<1x2x128xf32>
    tpu.vector_store %arg8[%c0_182, %c0_183, %c0_184], %406 {strides = array<i32>} : memref<2x2x128xf32, #tpu.memory_space<vmem>>, vector<1x2x128xf32>,
    %c1_185 = arith.constant 1 : index
    %c0_186 = arith.constant 0 : index
    %c0_187 = arith.constant 0 : index
    %407 = vector.load %arg8[%c1_185, %c0_186, %c0_187] : memref<2x2x128xf32, #tpu.memory_space<vmem>>, vector<1x2x128xf32>
    %408 = vector.shape_cast %407 : vector<1x2x128xf32> to vector<2x128xf32>
    %409 = arith.truncf %403 : vector<2x128xf32> to vector<2x128xbf16>
    %c0_188 = arith.constant 0 : index
    %c0_189 = arith.constant 0 : index
    %c0_190 = arith.constant 0 : index
    %410 = vector.load %arg5[%c0_188, %c0_189, %c0_190] : memref<1x128x384xbf16, #tpu.memory_space<vmem>>, vector<1x128x384xbf16>
    %411 = vector.shape_cast %410 : vector<1x128x384xbf16> to vector<128x384xbf16>
    %cst_191 = arith.constant dense<0.000000e+00> : vector<2x384xf32>
    %412 = tpu.matmul %409, %411, %cst_191 {dimension_numbers = #tpu.dot_dimension_numbers<[1], [0], [0], [1], [0, 0, 1, 1], [], []>} : vector<2x128xbf16>, vector<128x384xbf16>, vector<2x384xf32> -> vector<2x384xf32>
    %413 = vector.broadcast %5 : vector<1x384xf32> to vector<2x384xf32>
    %414 = arith.addf %412, %413 : vector<2x384xf32>
    %415 = arith.truncf %408 : vector<2x128xf32> to vector<2x128xbf16>
    %c1_192 = arith.constant 1 : index
    %c0_193 = arith.constant 0 : index
    %c0_194 = arith.constant 0 : index
    %416 = vector.load %arg4[%c1_192, %c0_193, %c0_194] : memref<2x128x384xbf16, #tpu.memory_space<vmem>>, vector<1x128x384xbf16>
    %417 = vector.shape_cast %416 : vector<1x128x384xbf16> to vector<128x384xbf16>
    %cst_195 = arith.constant dense<0.000000e+00> : vector<2x384xf32>
    %418 = tpu.matmul %415, %417, %cst_195 {dimension_numbers = #tpu.dot_dimension_numbers<[1], [0], [0], [1], [0, 0, 1, 1], [], []>} : vector<2x128xbf16>, vector<128x384xbf16>, vector<2x384xf32> -> vector<2x384xf32>
    %419 = vector.broadcast %9 : vector<1x384xf32> to vector<2x384xf32>
    %420 = arith.addf %418, %419 : vector<2x384xf32>
    %421 = vector.extract_strided_slice %414 {offsets = [0, 0], sizes = [2, 128], strides = [1, 1]} : vector<2x384xf32> to vector<2x128xf32>
    %422 = vector.extract_strided_slice %420 {offsets = [0, 0], sizes = [2, 128], strides = [1, 1]} : vector<2x384xf32> to vector<2x128xf32>
    %423 = arith.addf %421, %422 : vector<2x128xf32>
    %cst_196 = arith.constant 5.000000e-01 : f32
    %424 = vector.broadcast %cst_196 : f32 to vector<2x128xf32>
    %425 = arith.mulf %424, %423 : vector<2x128xf32>
    %426 = math.tanh %425 : vector<2x128xf32>
    %cst_197 = arith.constant 1.000000e+00 : f32
    %427 = vector.broadcast %cst_197 : f32 to vector<2x128xf32>
    %428 = arith.addf %426, %427 : vector<2x128xf32>
    %cst_198 = arith.constant 5.000000e-01 : f32
    %429 = vector.broadcast %cst_198 : f32 to vector<2x128xf32>
    %430 = arith.mulf %429, %428 : vector<2x128xf32>
    %431 = vector.extract_strided_slice %414 {offsets = [0, 128], sizes = [2, 128], strides = [1, 1]} : vector<2x384xf32> to vector<2x128xf32>
    %432 = vector.extract_strided_slice %420 {offsets = [0, 128], sizes = [2, 128], strides = [1, 1]} : vector<2x384xf32> to vector<2x128xf32>
    %433 = arith.addf %431, %432 : vector<2x128xf32>
    %cst_199 = arith.constant 5.000000e-01 : f32
    %434 = vector.broadcast %cst_199 : f32 to vector<2x128xf32>
    %435 = arith.mulf %434, %433 : vector<2x128xf32>
    %436 = math.tanh %435 : vector<2x128xf32>
    %cst_200 = arith.constant 1.000000e+00 : f32
    %437 = vector.broadcast %cst_200 : f32 to vector<2x128xf32>
    %438 = arith.addf %436, %437 : vector<2x128xf32>
    %cst_201 = arith.constant 5.000000e-01 : f32
    %439 = vector.broadcast %cst_201 : f32 to vector<2x128xf32>
    %440 = arith.mulf %439, %438 : vector<2x128xf32>
    %441 = vector.extract_strided_slice %414 {offsets = [0, 256], sizes = [2, 128], strides = [1, 1]} : vector<2x384xf32> to vector<2x128xf32>
    %442 = vector.extract_strided_slice %420 {offsets = [0, 256], sizes = [2, 128], strides = [1, 1]} : vector<2x384xf32> to vector<2x128xf32>
    %443 = arith.mulf %430, %442 : vector<2x128xf32>
    %444 = arith.addf %441, %443 : vector<2x128xf32>
    %445 = math.tanh %444 : vector<2x128xf32>
    %446 = arith.subf %408, %445 : vector<2x128xf32>
    %447 = arith.mulf %440, %446 : vector<2x128xf32>
    %448 = arith.addf %445, %447 : vector<2x128xf32>
    %c1_202 = arith.constant 1 : index
    %c0_203 = arith.constant 0 : index
    %c0_204 = arith.constant 0 : index
    %449 = vector.load %arg8[%c1_202, %c0_203, %c0_204] : memref<2x2x128xf32, #tpu.memory_space<vmem>>, vector<1x2x128xf32>
    %450 = vector.shape_cast %449 : vector<1x2x128xf32> to vector<2x128xf32>
    %451 = vector.shape_cast %448 : vector<2x128xf32> to vector<1x2x128xf32>
    tpu.vector_store %arg8[%c1_202, %c0_203, %c0_204], %451 {strides = array<i32>} : memref<2x2x128xf32, #tpu.memory_space<vmem>>, vector<1x2x128xf32>,
    %c0_205 = arith.constant 0 : index
    %c4_206 = arith.constant 4 : index
    %c0_207 = arith.constant 0 : index
    %452 = vector.load %arg7[%c0_205, %c4_206, %c0_207] : memref<2x8x128xf32, #tpu.memory_space<vmem>>, vector<2x1x128xf32>
    %453 = vector.shape_cast %452 : vector<2x1x128xf32> to vector<2x128xf32>
    %454 = vector.shape_cast %448 : vector<2x128xf32> to vector<2x1x128xf32>
    tpu.vector_store %arg7[%c0_205, %c4_206, %c0_207], %454 {strides = array<i32>} : memref<2x8x128xf32, #tpu.memory_space<vmem>>, vector<2x1x128xf32>,
    %c0_208 = arith.constant 0 : index
    %c0_209 = arith.constant 0 : index
    %c0_210 = arith.constant 0 : index
    %455 = vector.load %arg8[%c0_208, %c0_209, %c0_210] : memref<2x2x128xf32, #tpu.memory_space<vmem>>, vector<1x2x128xf32>
    %456 = vector.shape_cast %455 : vector<1x2x128xf32> to vector<2x128xf32>
    %c0_211 = arith.constant 0 : index
    %c5 = arith.constant 5 : index
    %c0_212 = arith.constant 0 : index
    %457 = vector.load %arg2[%c0_211, %c5, %c0_212] : memref<2x8x384xf32, #tpu.memory_space<vmem>>, vector<2x1x384xf32>
    %458 = vector.shape_cast %457 : vector<2x1x384xf32> to vector<2x384xf32>
    %459 = arith.truncf %456 : vector<2x128xf32> to vector<2x128xbf16>
    %c0_213 = arith.constant 0 : index
    %c0_214 = arith.constant 0 : index
    %c0_215 = arith.constant 0 : index
    %460 = vector.load %arg4[%c0_213, %c0_214, %c0_215] : memref<2x128x384xbf16, #tpu.memory_space<vmem>>, vector<1x128x384xbf16>
    %461 = vector.shape_cast %460 : vector<1x128x384xbf16> to vector<128x384xbf16>
    %cst_216 = arith.constant dense<0.000000e+00> : vector<2x384xf32>
    %462 = tpu.matmul %459, %461, %cst_216 {dimension_numbers = #tpu.dot_dimension_numbers<[1], [0], [0], [1], [0, 0, 1, 1], [], []>} : vector<2x128xbf16>, vector<128x384xbf16>, vector<2x384xf32> -> vector<2x384xf32>
    %463 = vector.broadcast %7 : vector<1x384xf32> to vector<2x384xf32>
    %464 = arith.addf %462, %463 : vector<2x384xf32>
    %465 = vector.extract_strided_slice %458 {offsets = [0, 0], sizes = [2, 128], strides = [1, 1]} : vector<2x384xf32> to vector<2x128xf32>
    %466 = vector.extract_strided_slice %464 {offsets = [0, 0], sizes = [2, 128], strides = [1, 1]} : vector<2x384xf32> to vector<2x128xf32>
    %467 = arith.addf %465, %466 : vector<2x128xf32>
    %cst_217 = arith.constant 5.000000e-01 : f32
    %468 = vector.broadcast %cst_217 : f32 to vector<2x128xf32>
    %469 = arith.mulf %468, %467 : vector<2x128xf32>
    %470 = math.tanh %469 : vector<2x128xf32>
    %cst_218 = arith.constant 1.000000e+00 : f32
    %471 = vector.broadcast %cst_218 : f32 to vector<2x128xf32>
    %472 = arith.addf %470, %471 : vector<2x128xf32>
    %cst_219 = arith.constant 5.000000e-01 : f32
    %473 = vector.broadcast %cst_219 : f32 to vector<2x128xf32>
    %474 = arith.mulf %473, %472 : vector<2x128xf32>
    %475 = vector.extract_strided_slice %458 {offsets = [0, 128], sizes = [2, 128], strides = [1, 1]} : vector<2x384xf32> to vector<2x128xf32>
    %476 = vector.extract_strided_slice %464 {offsets = [0, 128], sizes = [2, 128], strides = [1, 1]} : vector<2x384xf32> to vector<2x128xf32>
    %477 = arith.addf %475, %476 : vector<2x128xf32>
    %cst_220 = arith.constant 5.000000e-01 : f32
    %478 = vector.broadcast %cst_220 : f32 to vector<2x128xf32>
    %479 = arith.mulf %478, %477 : vector<2x128xf32>
    %480 = math.tanh %479 : vector<2x128xf32>
    %cst_221 = arith.constant 1.000000e+00 : f32
    %481 = vector.broadcast %cst_221 : f32 to vector<2x128xf32>
    %482 = arith.addf %480, %481 : vector<2x128xf32>
    %cst_222 = arith.constant 5.000000e-01 : f32
    %483 = vector.broadcast %cst_222 : f32 to vector<2x128xf32>
    %484 = arith.mulf %483, %482 : vector<2x128xf32>
    %485 = vector.extract_strided_slice %458 {offsets = [0, 256], sizes = [2, 128], strides = [1, 1]} : vector<2x384xf32> to vector<2x128xf32>
    %486 = vector.extract_strided_slice %464 {offsets = [0, 256], sizes = [2, 128], strides = [1, 1]} : vector<2x384xf32> to vector<2x128xf32>
    %487 = arith.mulf %474, %486 : vector<2x128xf32>
    %488 = arith.addf %485, %487 : vector<2x128xf32>
    %489 = math.tanh %488 : vector<2x128xf32>
    %490 = arith.subf %456, %489 : vector<2x128xf32>
    %491 = arith.mulf %484, %490 : vector<2x128xf32>
    %492 = arith.addf %489, %491 : vector<2x128xf32>
    %c0_223 = arith.constant 0 : index
    %c0_224 = arith.constant 0 : index
    %c0_225 = arith.constant 0 : index
    %493 = vector.load %arg8[%c0_223, %c0_224, %c0_225] : memref<2x2x128xf32, #tpu.memory_space<vmem>>, vector<1x2x128xf32>
    %494 = vector.shape_cast %493 : vector<1x2x128xf32> to vector<2x128xf32>
    %495 = vector.shape_cast %492 : vector<2x128xf32> to vector<1x2x128xf32>
    tpu.vector_store %arg8[%c0_223, %c0_224, %c0_225], %495 {strides = array<i32>} : memref<2x2x128xf32, #tpu.memory_space<vmem>>, vector<1x2x128xf32>,
    %c1_226 = arith.constant 1 : index
    %c0_227 = arith.constant 0 : index
    %c0_228 = arith.constant 0 : index
    %496 = vector.load %arg8[%c1_226, %c0_227, %c0_228] : memref<2x2x128xf32, #tpu.memory_space<vmem>>, vector<1x2x128xf32>
    %497 = vector.shape_cast %496 : vector<1x2x128xf32> to vector<2x128xf32>
    %498 = arith.truncf %492 : vector<2x128xf32> to vector<2x128xbf16>
    %c0_229 = arith.constant 0 : index
    %c0_230 = arith.constant 0 : index
    %c0_231 = arith.constant 0 : index
    %499 = vector.load %arg5[%c0_229, %c0_230, %c0_231] : memref<1x128x384xbf16, #tpu.memory_space<vmem>>, vector<1x128x384xbf16>
    %500 = vector.shape_cast %499 : vector<1x128x384xbf16> to vector<128x384xbf16>
    %cst_232 = arith.constant dense<0.000000e+00> : vector<2x384xf32>
    %501 = tpu.matmul %498, %500, %cst_232 {dimension_numbers = #tpu.dot_dimension_numbers<[1], [0], [0], [1], [0, 0, 1, 1], [], []>} : vector<2x128xbf16>, vector<128x384xbf16>, vector<2x384xf32> -> vector<2x384xf32>
    %502 = vector.broadcast %5 : vector<1x384xf32> to vector<2x384xf32>
    %503 = arith.addf %501, %502 : vector<2x384xf32>
    %504 = arith.truncf %497 : vector<2x128xf32> to vector<2x128xbf16>
    %c1_233 = arith.constant 1 : index
    %c0_234 = arith.constant 0 : index
    %c0_235 = arith.constant 0 : index
    %505 = vector.load %arg4[%c1_233, %c0_234, %c0_235] : memref<2x128x384xbf16, #tpu.memory_space<vmem>>, vector<1x128x384xbf16>
    %506 = vector.shape_cast %505 : vector<1x128x384xbf16> to vector<128x384xbf16>
    %cst_236 = arith.constant dense<0.000000e+00> : vector<2x384xf32>
    %507 = tpu.matmul %504, %506, %cst_236 {dimension_numbers = #tpu.dot_dimension_numbers<[1], [0], [0], [1], [0, 0, 1, 1], [], []>} : vector<2x128xbf16>, vector<128x384xbf16>, vector<2x384xf32> -> vector<2x384xf32>
    %508 = vector.broadcast %9 : vector<1x384xf32> to vector<2x384xf32>
    %509 = arith.addf %507, %508 : vector<2x384xf32>
    %510 = vector.extract_strided_slice %503 {offsets = [0, 0], sizes = [2, 128], strides = [1, 1]} : vector<2x384xf32> to vector<2x128xf32>
    %511 = vector.extract_strided_slice %509 {offsets = [0, 0], sizes = [2, 128], strides = [1, 1]} : vector<2x384xf32> to vector<2x128xf32>
    %512 = arith.addf %510, %511 : vector<2x128xf32>
    %cst_237 = arith.constant 5.000000e-01 : f32
    %513 = vector.broadcast %cst_237 : f32 to vector<2x128xf32>
    %514 = arith.mulf %513, %512 : vector<2x128xf32>
    %515 = math.tanh %514 : vector<2x128xf32>
    %cst_238 = arith.constant 1.000000e+00 : f32
    %516 = vector.broadcast %cst_238 : f32 to vector<2x128xf32>
    %517 = arith.addf %515, %516 : vector<2x128xf32>
    %cst_239 = arith.constant 5.000000e-01 : f32
    %518 = vector.broadcast %cst_239 : f32 to vector<2x128xf32>
    %519 = arith.mulf %518, %517 : vector<2x128xf32>
    %520 = vector.extract_strided_slice %503 {offsets = [0, 128], sizes = [2, 128], strides = [1, 1]} : vector<2x384xf32> to vector<2x128xf32>
    %521 = vector.extract_strided_slice %509 {offsets = [0, 128], sizes = [2, 128], strides = [1, 1]} : vector<2x384xf32> to vector<2x128xf32>
    %522 = arith.addf %520, %521 : vector<2x128xf32>
    %cst_240 = arith.constant 5.000000e-01 : f32
    %523 = vector.broadcast %cst_240 : f32 to vector<2x128xf32>
    %524 = arith.mulf %523, %522 : vector<2x128xf32>
    %525 = math.tanh %524 : vector<2x128xf32>
    %cst_241 = arith.constant 1.000000e+00 : f32
    %526 = vector.broadcast %cst_241 : f32 to vector<2x128xf32>
    %527 = arith.addf %525, %526 : vector<2x128xf32>
    %cst_242 = arith.constant 5.000000e-01 : f32
    %528 = vector.broadcast %cst_242 : f32 to vector<2x128xf32>
    %529 = arith.mulf %528, %527 : vector<2x128xf32>
    %530 = vector.extract_strided_slice %503 {offsets = [0, 256], sizes = [2, 128], strides = [1, 1]} : vector<2x384xf32> to vector<2x128xf32>
    %531 = vector.extract_strided_slice %509 {offsets = [0, 256], sizes = [2, 128], strides = [1, 1]} : vector<2x384xf32> to vector<2x128xf32>
    %532 = arith.mulf %519, %531 : vector<2x128xf32>
    %533 = arith.addf %530, %532 : vector<2x128xf32>
    %534 = math.tanh %533 : vector<2x128xf32>
    %535 = arith.subf %497, %534 : vector<2x128xf32>
    %536 = arith.mulf %529, %535 : vector<2x128xf32>
    %537 = arith.addf %534, %536 : vector<2x128xf32>
    %c1_243 = arith.constant 1 : index
    %c0_244 = arith.constant 0 : index
    %c0_245 = arith.constant 0 : index
    %538 = vector.load %arg8[%c1_243, %c0_244, %c0_245] : memref<2x2x128xf32, #tpu.memory_space<vmem>>, vector<1x2x128xf32>
    %539 = vector.shape_cast %538 : vector<1x2x128xf32> to vector<2x128xf32>
    %540 = vector.shape_cast %537 : vector<2x128xf32> to vector<1x2x128xf32>
    tpu.vector_store %arg8[%c1_243, %c0_244, %c0_245], %540 {strides = array<i32>} : memref<2x2x128xf32, #tpu.memory_space<vmem>>, vector<1x2x128xf32>,
    %c0_246 = arith.constant 0 : index
    %c5_247 = arith.constant 5 : index
    %c0_248 = arith.constant 0 : index
    %541 = vector.load %arg7[%c0_246, %c5_247, %c0_248] : memref<2x8x128xf32, #tpu.memory_space<vmem>>, vector<2x1x128xf32>
    %542 = vector.shape_cast %541 : vector<2x1x128xf32> to vector<2x128xf32>
    %543 = vector.shape_cast %537 : vector<2x128xf32> to vector<2x1x128xf32>
    tpu.vector_store %arg7[%c0_246, %c5_247, %c0_248], %543 {strides = array<i32>} : memref<2x8x128xf32, #tpu.memory_space<vmem>>, vector<2x1x128xf32>,
    %c0_249 = arith.constant 0 : index
    %c0_250 = arith.constant 0 : index
    %c0_251 = arith.constant 0 : index
    %544 = vector.load %arg8[%c0_249, %c0_250, %c0_251] : memref<2x2x128xf32, #tpu.memory_space<vmem>>, vector<1x2x128xf32>
    %545 = vector.shape_cast %544 : vector<1x2x128xf32> to vector<2x128xf32>
    %c0_252 = arith.constant 0 : index
    %c6 = arith.constant 6 : index
    %c0_253 = arith.constant 0 : index
    %546 = vector.load %arg2[%c0_252, %c6, %c0_253] : memref<2x8x384xf32, #tpu.memory_space<vmem>>, vector<2x1x384xf32>
    %547 = vector.shape_cast %546 : vector<2x1x384xf32> to vector<2x384xf32>
    %548 = arith.truncf %545 : vector<2x128xf32> to vector<2x128xbf16>
    %c0_254 = arith.constant 0 : index
    %c0_255 = arith.constant 0 : index
    %c0_256 = arith.constant 0 : index
    %549 = vector.load %arg4[%c0_254, %c0_255, %c0_256] : memref<2x128x384xbf16, #tpu.memory_space<vmem>>, vector<1x128x384xbf16>
    %550 = vector.shape_cast %549 : vector<1x128x384xbf16> to vector<128x384xbf16>
    %cst_257 = arith.constant dense<0.000000e+00> : vector<2x384xf32>
    %551 = tpu.matmul %548, %550, %cst_257 {dimension_numbers = #tpu.dot_dimension_numbers<[1], [0], [0], [1], [0, 0, 1, 1], [], []>} : vector<2x128xbf16>, vector<128x384xbf16>, vector<2x384xf32> -> vector<2x384xf32>
    %552 = vector.broadcast %7 : vector<1x384xf32> to vector<2x384xf32>
    %553 = arith.addf %551, %552 : vector<2x384xf32>
    %554 = vector.extract_strided_slice %547 {offsets = [0, 0], sizes = [2, 128], strides = [1, 1]} : vector<2x384xf32> to vector<2x128xf32>
    %555 = vector.extract_strided_slice %553 {offsets = [0, 0], sizes = [2, 128], strides = [1, 1]} : vector<2x384xf32> to vector<2x128xf32>
    %556 = arith.addf %554, %555 : vector<2x128xf32>
    %cst_258 = arith.constant 5.000000e-01 : f32
    %557 = vector.broadcast %cst_258 : f32 to vector<2x128xf32>
    %558 = arith.mulf %557, %556 : vector<2x128xf32>
    %559 = math.tanh %558 : vector<2x128xf32>
    %cst_259 = arith.constant 1.000000e+00 : f32
    %560 = vector.broadcast %cst_259 : f32 to vector<2x128xf32>
    %561 = arith.addf %559, %560 : vector<2x128xf32>
    %cst_260 = arith.constant 5.000000e-01 : f32
    %562 = vector.broadcast %cst_260 : f32 to vector<2x128xf32>
    %563 = arith.mulf %562, %561 : vector<2x128xf32>
    %564 = vector.extract_strided_slice %547 {offsets = [0, 128], sizes = [2, 128], strides = [1, 1]} : vector<2x384xf32> to vector<2x128xf32>
    %565 = vector.extract_strided_slice %553 {offsets = [0, 128], sizes = [2, 128], strides = [1, 1]} : vector<2x384xf32> to vector<2x128xf32>
    %566 = arith.addf %564, %565 : vector<2x128xf32>
    %cst_261 = arith.constant 5.000000e-01 : f32
    %567 = vector.broadcast %cst_261 : f32 to vector<2x128xf32>
    %568 = arith.mulf %567, %566 : vector<2x128xf32>
    %569 = math.tanh %568 : vector<2x128xf32>
    %cst_262 = arith.constant 1.000000e+00 : f32
    %570 = vector.broadcast %cst_262 : f32 to vector<2x128xf32>
    %571 = arith.addf %569, %570 : vector<2x128xf32>
    %cst_263 = arith.constant 5.000000e-01 : f32
    %572 = vector.broadcast %cst_263 : f32 to vector<2x128xf32>
    %573 = arith.mulf %572, %571 : vector<2x128xf32>
    %574 = vector.extract_strided_slice %547 {offsets = [0, 256], sizes = [2, 128], strides = [1, 1]} : vector<2x384xf32> to vector<2x128xf32>
    %575 = vector.extract_strided_slice %553 {offsets = [0, 256], sizes = [2, 128], strides = [1, 1]} : vector<2x384xf32> to vector<2x128xf32>
    %576 = arith.mulf %563, %575 : vector<2x128xf32>
    %577 = arith.addf %574, %576 : vector<2x128xf32>
    %578 = math.tanh %577 : vector<2x128xf32>
    %579 = arith.subf %545, %578 : vector<2x128xf32>
    %580 = arith.mulf %573, %579 : vector<2x128xf32>
    %581 = arith.addf %578, %580 : vector<2x128xf32>
    %c0_264 = arith.constant 0 : index
    %c0_265 = arith.constant 0 : index
    %c0_266 = arith.constant 0 : index
    %582 = vector.load %arg8[%c0_264, %c0_265, %c0_266] : memref<2x2x128xf32, #tpu.memory_space<vmem>>, vector<1x2x128xf32>
    %583 = vector.shape_cast %582 : vector<1x2x128xf32> to vector<2x128xf32>
    %584 = vector.shape_cast %581 : vector<2x128xf32> to vector<1x2x128xf32>
    tpu.vector_store %arg8[%c0_264, %c0_265, %c0_266], %584 {strides = array<i32>} : memref<2x2x128xf32, #tpu.memory_space<vmem>>, vector<1x2x128xf32>,
    %c1_267 = arith.constant 1 : index
    %c0_268 = arith.constant 0 : index
    %c0_269 = arith.constant 0 : index
    %585 = vector.load %arg8[%c1_267, %c0_268, %c0_269] : memref<2x2x128xf32, #tpu.memory_space<vmem>>, vector<1x2x128xf32>
    %586 = vector.shape_cast %585 : vector<1x2x128xf32> to vector<2x128xf32>
    %587 = arith.truncf %581 : vector<2x128xf32> to vector<2x128xbf16>
    %c0_270 = arith.constant 0 : index
    %c0_271 = arith.constant 0 : index
    %c0_272 = arith.constant 0 : index
    %588 = vector.load %arg5[%c0_270, %c0_271, %c0_272] : memref<1x128x384xbf16, #tpu.memory_space<vmem>>, vector<1x128x384xbf16>
    %589 = vector.shape_cast %588 : vector<1x128x384xbf16> to vector<128x384xbf16>
    %cst_273 = arith.constant dense<0.000000e+00> : vector<2x384xf32>
    %590 = tpu.matmul %587, %589, %cst_273 {dimension_numbers = #tpu.dot_dimension_numbers<[1], [0], [0], [1], [0, 0, 1, 1], [], []>} : vector<2x128xbf16>, vector<128x384xbf16>, vector<2x384xf32> -> vector<2x384xf32>
    %591 = vector.broadcast %5 : vector<1x384xf32> to vector<2x384xf32>
    %592 = arith.addf %590, %591 : vector<2x384xf32>
    %593 = arith.truncf %586 : vector<2x128xf32> to vector<2x128xbf16>
    %c1_274 = arith.constant 1 : index
    %c0_275 = arith.constant 0 : index
    %c0_276 = arith.constant 0 : index
    %594 = vector.load %arg4[%c1_274, %c0_275, %c0_276] : memref<2x128x384xbf16, #tpu.memory_space<vmem>>, vector<1x128x384xbf16>
    %595 = vector.shape_cast %594 : vector<1x128x384xbf16> to vector<128x384xbf16>
    %cst_277 = arith.constant dense<0.000000e+00> : vector<2x384xf32>
    %596 = tpu.matmul %593, %595, %cst_277 {dimension_numbers = #tpu.dot_dimension_numbers<[1], [0], [0], [1], [0, 0, 1, 1], [], []>} : vector<2x128xbf16>, vector<128x384xbf16>, vector<2x384xf32> -> vector<2x384xf32>
    %597 = vector.broadcast %9 : vector<1x384xf32> to vector<2x384xf32>
    %598 = arith.addf %596, %597 : vector<2x384xf32>
    %599 = vector.extract_strided_slice %592 {offsets = [0, 0], sizes = [2, 128], strides = [1, 1]} : vector<2x384xf32> to vector<2x128xf32>
    %600 = vector.extract_strided_slice %598 {offsets = [0, 0], sizes = [2, 128], strides = [1, 1]} : vector<2x384xf32> to vector<2x128xf32>
    %601 = arith.addf %599, %600 : vector<2x128xf32>
    %cst_278 = arith.constant 5.000000e-01 : f32
    %602 = vector.broadcast %cst_278 : f32 to vector<2x128xf32>
    %603 = arith.mulf %602, %601 : vector<2x128xf32>
    %604 = math.tanh %603 : vector<2x128xf32>
    %cst_279 = arith.constant 1.000000e+00 : f32
    %605 = vector.broadcast %cst_279 : f32 to vector<2x128xf32>
    %606 = arith.addf %604, %605 : vector<2x128xf32>
    %cst_280 = arith.constant 5.000000e-01 : f32
    %607 = vector.broadcast %cst_280 : f32 to vector<2x128xf32>
    %608 = arith.mulf %607, %606 : vector<2x128xf32>
    %609 = vector.extract_strided_slice %592 {offsets = [0, 128], sizes = [2, 128], strides = [1, 1]} : vector<2x384xf32> to vector<2x128xf32>
    %610 = vector.extract_strided_slice %598 {offsets = [0, 128], sizes = [2, 128], strides = [1, 1]} : vector<2x384xf32> to vector<2x128xf32>
    %611 = arith.addf %609, %610 : vector<2x128xf32>
    %cst_281 = arith.constant 5.000000e-01 : f32
    %612 = vector.broadcast %cst_281 : f32 to vector<2x128xf32>
    %613 = arith.mulf %612, %611 : vector<2x128xf32>
    %614 = math.tanh %613 : vector<2x128xf32>
    %cst_282 = arith.constant 1.000000e+00 : f32
    %615 = vector.broadcast %cst_282 : f32 to vector<2x128xf32>
    %616 = arith.addf %614, %615 : vector<2x128xf32>
    %cst_283 = arith.constant 5.000000e-01 : f32
    %617 = vector.broadcast %cst_283 : f32 to vector<2x128xf32>
    %618 = arith.mulf %617, %616 : vector<2x128xf32>
    %619 = vector.extract_strided_slice %592 {offsets = [0, 256], sizes = [2, 128], strides = [1, 1]} : vector<2x384xf32> to vector<2x128xf32>
    %620 = vector.extract_strided_slice %598 {offsets = [0, 256], sizes = [2, 128], strides = [1, 1]} : vector<2x384xf32> to vector<2x128xf32>
    %621 = arith.mulf %608, %620 : vector<2x128xf32>
    %622 = arith.addf %619, %621 : vector<2x128xf32>
    %623 = math.tanh %622 : vector<2x128xf32>
    %624 = arith.subf %586, %623 : vector<2x128xf32>
    %625 = arith.mulf %618, %624 : vector<2x128xf32>
    %626 = arith.addf %623, %625 : vector<2x128xf32>
    %c1_284 = arith.constant 1 : index
    %c0_285 = arith.constant 0 : index
    %c0_286 = arith.constant 0 : index
    %627 = vector.load %arg8[%c1_284, %c0_285, %c0_286] : memref<2x2x128xf32, #tpu.memory_space<vmem>>, vector<1x2x128xf32>
    %628 = vector.shape_cast %627 : vector<1x2x128xf32> to vector<2x128xf32>
    %629 = vector.shape_cast %626 : vector<2x128xf32> to vector<1x2x128xf32>
    tpu.vector_store %arg8[%c1_284, %c0_285, %c0_286], %629 {strides = array<i32>} : memref<2x2x128xf32, #tpu.memory_space<vmem>>, vector<1x2x128xf32>,
    %c0_287 = arith.constant 0 : index
    %c6_288 = arith.constant 6 : index
    %c0_289 = arith.constant 0 : index
    %630 = vector.load %arg7[%c0_287, %c6_288, %c0_289] : memref<2x8x128xf32, #tpu.memory_space<vmem>>, vector<2x1x128xf32>
    %631 = vector.shape_cast %630 : vector<2x1x128xf32> to vector<2x128xf32>
    %632 = vector.shape_cast %626 : vector<2x128xf32> to vector<2x1x128xf32>
    tpu.vector_store %arg7[%c0_287, %c6_288, %c0_289], %632 {strides = array<i32>} : memref<2x8x128xf32, #tpu.memory_space<vmem>>, vector<2x1x128xf32>,
    %c0_290 = arith.constant 0 : index
    %c0_291 = arith.constant 0 : index
    %c0_292 = arith.constant 0 : index
    %633 = vector.load %arg8[%c0_290, %c0_291, %c0_292] : memref<2x2x128xf32, #tpu.memory_space<vmem>>, vector<1x2x128xf32>
    %634 = vector.shape_cast %633 : vector<1x2x128xf32> to vector<2x128xf32>
    %c0_293 = arith.constant 0 : index
    %c7 = arith.constant 7 : index
    %c0_294 = arith.constant 0 : index
    %635 = vector.load %arg2[%c0_293, %c7, %c0_294] : memref<2x8x384xf32, #tpu.memory_space<vmem>>, vector<2x1x384xf32>
    %636 = vector.shape_cast %635 : vector<2x1x384xf32> to vector<2x384xf32>
    %637 = arith.truncf %634 : vector<2x128xf32> to vector<2x128xbf16>
    %c0_295 = arith.constant 0 : index
    %c0_296 = arith.constant 0 : index
    %c0_297 = arith.constant 0 : index
    %638 = vector.load %arg4[%c0_295, %c0_296, %c0_297] : memref<2x128x384xbf16, #tpu.memory_space<vmem>>, vector<1x128x384xbf16>
    %639 = vector.shape_cast %638 : vector<1x128x384xbf16> to vector<128x384xbf16>
    %cst_298 = arith.constant dense<0.000000e+00> : vector<2x384xf32>
    %640 = tpu.matmul %637, %639, %cst_298 {dimension_numbers = #tpu.dot_dimension_numbers<[1], [0], [0], [1], [0, 0, 1, 1], [], []>} : vector<2x128xbf16>, vector<128x384xbf16>, vector<2x384xf32> -> vector<2x384xf32>
    %641 = vector.broadcast %7 : vector<1x384xf32> to vector<2x384xf32>
    %642 = arith.addf %640, %641 : vector<2x384xf32>
    %643 = vector.extract_strided_slice %636 {offsets = [0, 0], sizes = [2, 128], strides = [1, 1]} : vector<2x384xf32> to vector<2x128xf32>
    %644 = vector.extract_strided_slice %642 {offsets = [0, 0], sizes = [2, 128], strides = [1, 1]} : vector<2x384xf32> to vector<2x128xf32>
    %645 = arith.addf %643, %644 : vector<2x128xf32>
    %cst_299 = arith.constant 5.000000e-01 : f32
    %646 = vector.broadcast %cst_299 : f32 to vector<2x128xf32>
    %647 = arith.mulf %646, %645 : vector<2x128xf32>
    %648 = math.tanh %647 : vector<2x128xf32>
    %cst_300 = arith.constant 1.000000e+00 : f32
    %649 = vector.broadcast %cst_300 : f32 to vector<2x128xf32>
    %650 = arith.addf %648, %649 : vector<2x128xf32>
    %cst_301 = arith.constant 5.000000e-01 : f32
    %651 = vector.broadcast %cst_301 : f32 to vector<2x128xf32>
    %652 = arith.mulf %651, %650 : vector<2x128xf32>
    %653 = vector.extract_strided_slice %636 {offsets = [0, 128], sizes = [2, 128], strides = [1, 1]} : vector<2x384xf32> to vector<2x128xf32>
    %654 = vector.extract_strided_slice %642 {offsets = [0, 128], sizes = [2, 128], strides = [1, 1]} : vector<2x384xf32> to vector<2x128xf32>
    %655 = arith.addf %653, %654 : vector<2x128xf32>
    %cst_302 = arith.constant 5.000000e-01 : f32
    %656 = vector.broadcast %cst_302 : f32 to vector<2x128xf32>
    %657 = arith.mulf %656, %655 : vector<2x128xf32>
    %658 = math.tanh %657 : vector<2x128xf32>
    %cst_303 = arith.constant 1.000000e+00 : f32
    %659 = vector.broadcast %cst_303 : f32 to vector<2x128xf32>
    %660 = arith.addf %658, %659 : vector<2x128xf32>
    %cst_304 = arith.constant 5.000000e-01 : f32
    %661 = vector.broadcast %cst_304 : f32 to vector<2x128xf32>
    %662 = arith.mulf %661, %660 : vector<2x128xf32>
    %663 = vector.extract_strided_slice %636 {offsets = [0, 256], sizes = [2, 128], strides = [1, 1]} : vector<2x384xf32> to vector<2x128xf32>
    %664 = vector.extract_strided_slice %642 {offsets = [0, 256], sizes = [2, 128], strides = [1, 1]} : vector<2x384xf32> to vector<2x128xf32>
    %665 = arith.mulf %652, %664 : vector<2x128xf32>
    %666 = arith.addf %663, %665 : vector<2x128xf32>
    %667 = math.tanh %666 : vector<2x128xf32>
    %668 = arith.subf %634, %667 : vector<2x128xf32>
    %669 = arith.mulf %662, %668 : vector<2x128xf32>
    %670 = arith.addf %667, %669 : vector<2x128xf32>
    %c0_305 = arith.constant 0 : index
    %c0_306 = arith.constant 0 : index
    %c0_307 = arith.constant 0 : index
    %671 = vector.load %arg8[%c0_305, %c0_306, %c0_307] : memref<2x2x128xf32, #tpu.memory_space<vmem>>, vector<1x2x128xf32>
    %672 = vector.shape_cast %671 : vector<1x2x128xf32> to vector<2x128xf32>
    %673 = vector.shape_cast %670 : vector<2x128xf32> to vector<1x2x128xf32>
    tpu.vector_store %arg8[%c0_305, %c0_306, %c0_307], %673 {strides = array<i32>} : memref<2x2x128xf32, #tpu.memory_space<vmem>>, vector<1x2x128xf32>,
    %c1_308 = arith.constant 1 : index
    %c0_309 = arith.constant 0 : index
    %c0_310 = arith.constant 0 : index
    %674 = vector.load %arg8[%c1_308, %c0_309, %c0_310] : memref<2x2x128xf32, #tpu.memory_space<vmem>>, vector<1x2x128xf32>
    %675 = vector.shape_cast %674 : vector<1x2x128xf32> to vector<2x128xf32>
    %676 = arith.truncf %670 : vector<2x128xf32> to vector<2x128xbf16>
    %c0_311 = arith.constant 0 : index
    %c0_312 = arith.constant 0 : index
    %c0_313 = arith.constant 0 : index
    %677 = vector.load %arg5[%c0_311, %c0_312, %c0_313] : memref<1x128x384xbf16, #tpu.memory_space<vmem>>, vector<1x128x384xbf16>
    %678 = vector.shape_cast %677 : vector<1x128x384xbf16> to vector<128x384xbf16>
    %cst_314 = arith.constant dense<0.000000e+00> : vector<2x384xf32>
    %679 = tpu.matmul %676, %678, %cst_314 {dimension_numbers = #tpu.dot_dimension_numbers<[1], [0], [0], [1], [0, 0, 1, 1], [], []>} : vector<2x128xbf16>, vector<128x384xbf16>, vector<2x384xf32> -> vector<2x384xf32>
    %680 = vector.broadcast %5 : vector<1x384xf32> to vector<2x384xf32>
    %681 = arith.addf %679, %680 : vector<2x384xf32>
    %682 = arith.truncf %675 : vector<2x128xf32> to vector<2x128xbf16>
    %c1_315 = arith.constant 1 : index
    %c0_316 = arith.constant 0 : index
    %c0_317 = arith.constant 0 : index
    %683 = vector.load %arg4[%c1_315, %c0_316, %c0_317] : memref<2x128x384xbf16, #tpu.memory_space<vmem>>, vector<1x128x384xbf16>
    %684 = vector.shape_cast %683 : vector<1x128x384xbf16> to vector<128x384xbf16>
    %cst_318 = arith.constant dense<0.000000e+00> : vector<2x384xf32>
    %685 = tpu.matmul %682, %684, %cst_318 {dimension_numbers = #tpu.dot_dimension_numbers<[1], [0], [0], [1], [0, 0, 1, 1], [], []>} : vector<2x128xbf16>, vector<128x384xbf16>, vector<2x384xf32> -> vector<2x384xf32>
    %686 = vector.broadcast %9 : vector<1x384xf32> to vector<2x384xf32>
    %687 = arith.addf %685, %686 : vector<2x384xf32>
    %688 = vector.extract_strided_slice %681 {offsets = [0, 0], sizes = [2, 128], strides = [1, 1]} : vector<2x384xf32> to vector<2x128xf32>
    %689 = vector.extract_strided_slice %687 {offsets = [0, 0], sizes = [2, 128], strides = [1, 1]} : vector<2x384xf32> to vector<2x128xf32>
    %690 = arith.addf %688, %689 : vector<2x128xf32>
    %cst_319 = arith.constant 5.000000e-01 : f32
    %691 = vector.broadcast %cst_319 : f32 to vector<2x128xf32>
    %692 = arith.mulf %691, %690 : vector<2x128xf32>
    %693 = math.tanh %692 : vector<2x128xf32>
    %cst_320 = arith.constant 1.000000e+00 : f32
    %694 = vector.broadcast %cst_320 : f32 to vector<2x128xf32>
    %695 = arith.addf %693, %694 : vector<2x128xf32>
    %cst_321 = arith.constant 5.000000e-01 : f32
    %696 = vector.broadcast %cst_321 : f32 to vector<2x128xf32>
    %697 = arith.mulf %696, %695 : vector<2x128xf32>
    %698 = vector.extract_strided_slice %681 {offsets = [0, 128], sizes = [2, 128], strides = [1, 1]} : vector<2x384xf32> to vector<2x128xf32>
    %699 = vector.extract_strided_slice %687 {offsets = [0, 128], sizes = [2, 128], strides = [1, 1]} : vector<2x384xf32> to vector<2x128xf32>
    %700 = arith.addf %698, %699 : vector<2x128xf32>
    %cst_322 = arith.constant 5.000000e-01 : f32
    %701 = vector.broadcast %cst_322 : f32 to vector<2x128xf32>
    %702 = arith.mulf %701, %700 : vector<2x128xf32>
    %703 = math.tanh %702 : vector<2x128xf32>
    %cst_323 = arith.constant 1.000000e+00 : f32
    %704 = vector.broadcast %cst_323 : f32 to vector<2x128xf32>
    %705 = arith.addf %703, %704 : vector<2x128xf32>
    %cst_324 = arith.constant 5.000000e-01 : f32
    %706 = vector.broadcast %cst_324 : f32 to vector<2x128xf32>
    %707 = arith.mulf %706, %705 : vector<2x128xf32>
    %708 = vector.extract_strided_slice %681 {offsets = [0, 256], sizes = [2, 128], strides = [1, 1]} : vector<2x384xf32> to vector<2x128xf32>
    %709 = vector.extract_strided_slice %687 {offsets = [0, 256], sizes = [2, 128], strides = [1, 1]} : vector<2x384xf32> to vector<2x128xf32>
    %710 = arith.mulf %697, %709 : vector<2x128xf32>
    %711 = arith.addf %708, %710 : vector<2x128xf32>
    %712 = math.tanh %711 : vector<2x128xf32>
    %713 = arith.subf %675, %712 : vector<2x128xf32>
    %714 = arith.mulf %707, %713 : vector<2x128xf32>
    %715 = arith.addf %712, %714 : vector<2x128xf32>
    %c1_325 = arith.constant 1 : index
    %c0_326 = arith.constant 0 : index
    %c0_327 = arith.constant 0 : index
    %716 = vector.load %arg8[%c1_325, %c0_326, %c0_327] : memref<2x2x128xf32, #tpu.memory_space<vmem>>, vector<1x2x128xf32>
    %717 = vector.shape_cast %716 : vector<1x2x128xf32> to vector<2x128xf32>
    %718 = vector.shape_cast %715 : vector<2x128xf32> to vector<1x2x128xf32>
    tpu.vector_store %arg8[%c1_325, %c0_326, %c0_327], %718 {strides = array<i32>} : memref<2x2x128xf32, #tpu.memory_space<vmem>>, vector<1x2x128xf32>,
    %c0_328 = arith.constant 0 : index
    %c7_329 = arith.constant 7 : index
    %c0_330 = arith.constant 0 : index
    %719 = vector.load %arg7[%c0_328, %c7_329, %c0_330] : memref<2x8x128xf32, #tpu.memory_space<vmem>>, vector<2x1x128xf32>
    %720 = vector.shape_cast %719 : vector<2x1x128xf32> to vector<2x128xf32>
    %721 = vector.shape_cast %715 : vector<2x128xf32> to vector<2x1x128xf32>
    tpu.vector_store %arg7[%c0_328, %c7_329, %c0_330], %721 {strides = array<i32>} : memref<2x8x128xf32, #tpu.memory_space<vmem>>, vector<2x1x128xf32>,
    return
  }
  func.func @transform_0(%arg0: i32, %arg1: i32) -> (i32, i32, i32) {
    %c0_i32 = arith.constant 0 : i32
    %c0_i32_0 = arith.constant 0 : i32
    return %arg0, %arg1, %c0_i32 : i32, i32, i32
  }
  func.func @transform_1(%arg0: i32, %arg1: i32) -> (i32, i32, i32) {
    %c0_i32 = arith.constant 0 : i32
    %c0_i32_0 = arith.constant 0 : i32
    %c0_i32_1 = arith.constant 0 : i32
    return %c0_i32, %arg0, %c0_i32_0 : i32, i32, i32
  }
  func.func @transform_2(%arg0: i32, %arg1: i32) -> (i32, i32, i32) {
    %c0_i32 = arith.constant 0 : i32
    %c0_i32_0 = arith.constant 0 : i32
    %c0_i32_1 = arith.constant 0 : i32
    %c0_i32_2 = arith.constant 0 : i32
    return %c0_i32, %c0_i32_0, %c0_i32_1 : i32, i32, i32
  }
  func.func @transform_3(%arg0: i32, %arg1: i32) -> (i32, i32, i32) {
    %c0_i32 = arith.constant 0 : i32
    %c0_i32_0 = arith.constant 0 : i32
    %c0_i32_1 = arith.constant 0 : i32
    %c0_i32_2 = arith.constant 0 : i32
    return %c0_i32, %c0_i32_0, %c0_i32_1 : i32, i32, i32
  }
  func.func @transform_4(%arg0: i32, %arg1: i32) -> (i32, i32, i32) {
    %c0_i32 = arith.constant 0 : i32
    %c0_i32_0 = arith.constant 0 : i32
    %c0_i32_1 = arith.constant 0 : i32
    %c0_i32_2 = arith.constant 0 : i32
    return %c0_i32, %c0_i32_0, %c0_i32_1 : i32, i32, i32
  }
  func.func @transform_5(%arg0: i32, %arg1: i32) -> (i32, i32, i32) {
    %c0_i32 = arith.constant 0 : i32
    %c0_i32_0 = arith.constant 0 : i32
    return %arg0, %arg1, %c0_i32 : i32, i32, i32
  }
  func.func @transform_6(%arg0: i32, %arg1: i32) -> (i32, i32, i32) {
    %c0_i32 = arith.constant 0 : i32
    %c0_i32_0 = arith.constant 0 : i32
    %c0_i32_1 = arith.constant 0 : i32
    return %c0_i32, %arg0, %c0_i32_0 : i32, i32, i32
  }
}

</mosaic_0001>

<bundles_post_ra>
// kernel: event_gru_forward.1
= control target key start
LH: loop header
LB: loop body
LE: loop exit
PB: predicated region body
PF: predicated region fallthrough
CT: control target
= control target key end

     0   :  { %v12808_v2 = vmov 0.0   ;;  %v12806_v3 = vmov 0   ;;  %vm10098_vm0 = vmmov 0   ;;  %v72_v55 = vlaneseq  ;;  %s12799_s0 = inlined_call_operand.vmem [shape: f32[2,8,384], index: 0, kind: input, shape index: {}]   ;;  %s12800_s1 = inlined_call_operand.vmem [shape: f32[2,2,128], index: 1, kind: input, shape index: {}, may-alias: {1,6}]   ;;  %s12801_s2 = inlined_call_operand.vmem [shape: bf16[2,128,384], index: 2, kind: input, shape index: {}]   ;;  %s12802_s3 = inlined_call_operand.vmem [shape: bf16[1,128,384], index: 3, kind: input, shape index: {}]   ;;  %s12803_s4 = inlined_call_operand.vmem [shape: f32[2,2,384], index: 4, kind: input, shape index: {}]   ;;  %s12804_s5 = inlined_call_operand.hbm [shape: f32[2,8,128], index: 5, kind: output, shape index: {0}]   ;;  %s12805_s6 = inlined_call_operand.vmem [shape: f32[2,2,128], index: 6, kind: output, shape index: {1}, may-alias: {1,6}]  }
   0x1   :  { %v9433_v0 = vld [vmem:[%s12801_s2 + $0xac] ss:$12 sps:$4 sm:$0xff]   ;;  %v9435_v1 = vld [vmem:[%s12801_s2 + $0xa8] ss:$12 sps:$4 sm:$0xff]   ;;  %8946 = vmatprep.subr.bf16.mxu1 %v12808_v2  ;;  %259 = vmatprep.mubr.bf16.mxu0 %v12806_v3  ;;  %v9438_v5 = vld [vmem:[%s12801_s2 + $0x90] ss:$12 sps:$4 sm:$0xff]  }
   0x2   :  { %227 = vmatprep.subr.bf16.mxu0 %v9433_v0  ;;  %v9436_v4 = vld [vmem:[%s12801_s2 + $0x94] ss:$12 sps:$4 sm:$0xff]   ;;  %8962 = vmatprep.mubr.msk.bf16.mxu1 %vm10098_vm0, %v12808_v2  ;;  %v9439_v6 = vld [vmem:[%s12801_s2 + $0x7c] ss:$12 sps:$4 sm:$0xff]   ;;  %v9441_v7 = vld [vmem:[%s12801_s2 + $0x78] ss:$12 sps:$4 sm:$0xff]  }
   0x3   :  { %228 = vmatpush1.bf16.msra.mxu0 %v9435_v1  ;;  %v9448_v8 = vld [vmem:[%s12801_s2 + $0xb0] ss:$12 sps:$4 sm:$0xff]   ;;  %v9452_v10 = vld [vmem:[%s12801_s2 + $0x98] ss:$12 sps:$4 sm:$0xff]   ;;  %v9444_v11 = vld [vmem:[%s12801_s2 + $0x60] ss:$12 sps:$4 sm:$0xff]  }
   0x4   :  { %229 = vmatprep.subr.bf16.mxu0 %v9436_v4  ;;  %v9442_v9 = vld [vmem:[%s12801_s2 + $0x64] ss:$12 sps:$4 sm:$0xff]   ;;  %8947 = vmatpush3.bf16.msra.mxu1 %v9448_v8  ;;  %v9445_v12 = vld [vmem:[%s12801_s2 + $0x4c] ss:$12 sps:$4 sm:$0xff]   ;;  %v28_v14 = vld [vmem:[%s12800_s1] sm:$0x3] }
   0x5   :  { %8948 = vmatprep.subr.bf16.mxu1 %v12808_v2  ;;  %v9456_v13 = vld [vmem:[%s12801_s2 + $0x80] ss:$12 sps:$4 sm:$0xff]   ;;  %v9447_v15 = vld [vmem:[%s12801_s2 + $0x48] ss:$12 sps:$4 sm:$0xff]   ;;  %30 = vst [vmem:[%s12805_s6] sm:$0x3] %v28_v14  ;;  %v10374_v56 = vshrl.u32 %v72_v55, 7 }
   0x6   :  { %v9449_v16 = vld [vmem:[%s12801_s2 + $0x34] ss:$12 sps:$4 sm:$0xff]   ;;  %v9451_v18 = vld [vmem:[%s12801_s2 + $0x30] ss:$12 sps:$4 sm:$0xff]   ;;  %v9455_v21 = vld [vmem:[%s12801_s2 + $0x18] ss:$12 sps:$4 sm:$0xff]  }
   0x7   :  { %230 = vmatpush1.bf16.msra.mxu0 %v9438_v5  ;;  %v9460_v17 = vld [vmem:[%s12801_s2 + $0x68] ss:$12 sps:$4 sm:$0xff]   ;;  %v9461_v20 = vld [vmem:[%s12801_s2 + $0x50] ss:$12 sps:$4 sm:$0xff]   ;;  %v9462_v23 = vld [vmem:[%s12801_s2 + $0x38] ss:$12 sps:$4 sm:$0xff]  }
   0x8   :  { %231 = vmatprep.subr.bf16.mxu0 %v9439_v6  ;;  %8949 = vmatpush3.bf16.msra.mxu1 %v9452_v10  ;;  %v9453_v19 = vld [vmem:[%s12801_s2 + $0x1c] ss:$12 sps:$4 sm:$0xff]   ;;  %v9457_v22 = vld [vmem:[%s12801_s2 + $0x4] ss:$12 sps:$4 sm:$0xff]   ;;  %v9459_v24 = vld [vmem:[%s12801_s2] ss:$12 sps:$4 sm:$0xff]  }
   0x9   :  { %8950 = vmatprep.subr.bf16.mxu1 %v12808_v2  ;;  %v9463_v26 = vld [vmem:[%s12801_s2 + $0x20] ss:$12 sps:$4 sm:$0xff]   ;;  %v9464_v28 = vld [vmem:[%s12801_s2 + $0x8] ss:$12 sps:$4 sm:$0xff]   ;;  %v9468_v31 = vld [vmem:[%s12802_s3 + $0xb0] ss:$12 sps:$4 sm:$0xff]  }
   0xa   :  { %v10237_v29 = vld [vmem:[%s12802_s3 + $0xac] ss:$12 sps:$4 sm:$0xff]   ;;  %v10242_v30 = vld [vmem:[%s12802_s3 + $0xa8] ss:$12 sps:$4 sm:$0xff]   ;;  %v10258_v33 = vld [vmem:[%s12802_s3 + $0x90] ss:$12 sps:$4 sm:$0xff]  }
   0xb   :  { %232 = vmatpush1.bf16.msra.mxu0 %v9441_v7  ;;  %v10252_v32 = vld [vmem:[%s12802_s3 + $0x94] ss:$12 sps:$4 sm:$0xff]   ;;  %v9472_v34 = vld [vmem:[%s12802_s3 + $0x98] ss:$12 sps:$4 sm:$0xff]   ;;  %v10268_v35 = vld [vmem:[%s12802_s3 + $0x7c] ss:$12 sps:$4 sm:$0xff]  }
   0xc   :  { %233 = vmatprep.subr.bf16.mxu0 %v9442_v9  ;;  %8951 = vmatpush3.bf16.msra.mxu1 %v9456_v13  ;;  %v34_v25 = vld [vmem:[%s12805_s6] sm:$0x3]  ;;  %v10274_v36 = vld [vmem:[%s12802_s3 + $0x78] ss:$12 sps:$4 sm:$0xff]   ;;  %v9480_v40 = vld [vmem:[%s12802_s3 + $0x68] ss:$12 sps:$4 sm:$0xff]  }
   0xd   :  { %8952 = vmatprep.subr.bf16.mxu1 %v12808_v2  ;;  %v38_v27 = vpack.c.bf16 %v34_v25, %v34_v25  ;;  %v9476_v37 = vld [vmem:[%s12802_s3 + $0x80] ss:$12 sps:$4 sm:$0xff]   ;;  %v10283_v38 = vld [vmem:[%s12802_s3 + $0x64] ss:$12 sps:$4 sm:$0xff]   ;;  %v10304_v42 = vld [vmem:[%s12802_s3 + $0x48] ss:$12 sps:$4 sm:$0xff]  }
   0xe   :  { %v10289_v39 = vld [vmem:[%s12802_s3 + $0x60] ss:$12 sps:$4 sm:$0xff]   ;;  %v9484_v43 = vld [vmem:[%s12802_s3 + $0x50] ss:$12 sps:$4 sm:$0xff]   ;;  %v9488_v46 = vld [vmem:[%s12802_s3 + $0x38] ss:$12 sps:$4 sm:$0xff]  }
   0xf   :  { %234 = vmatpush1.bf16.msra.mxu0 %v9444_v11  ;;  %v10299_v41 = vld [vmem:[%s12802_s3 + $0x4c] ss:$12 sps:$4 sm:$0xff]   ;;  %v10313_v44 = vld [vmem:[%s12802_s3 + $0x34] ss:$12 sps:$4 sm:$0xff]   ;;  %v10320_v45 = vld [vmem:[%s12802_s3 + $0x30] ss:$12 sps:$4 sm:$0xff]  }
  0x10   :  { %235 = vmatprep.subr.bf16.mxu0 %v9445_v12  ;;  %8953 = vmatpush3.bf16.msra.mxu1 %v9460_v17  ;;  %v10328_v47 = vld [vmem:[%s12802_s3 + $0x1c] ss:$12 sps:$4 sm:$0xff]   ;;  %v10336_v48 = vld [vmem:[%s12802_s3 + $0x18] ss:$12 sps:$4 sm:$0xff]   ;;  %v9492_v49 = vld [vmem:[%s12802_s3 + $0x20] ss:$12 sps:$4 sm:$0xff]  }
  0x11   :  { %8954 = vmatprep.subr.bf16.mxu1 %v12808_v2  ;;  %v10344_v50 = vld [vmem:[%s12802_s3 + $0x4] ss:$12 sps:$4 sm:$0xff]   ;;  %v10352_v51 = vld [vmem:[%s12802_s3] ss:$12 sps:$4 sm:$0xff]   ;;  %v9496_v52 = vld [vmem:[%s12802_s3 + $0x8] ss:$12 sps:$4 sm:$0xff]  }
  0x12   :  { %v10360_v53 = vld [vmem:[%s12801_s2 + $0x16c] ss:$12 sps:$4 sm:$0xff]   ;;  %v29_v54 = vld [vmem:[%s12800_s1 + $0x2] sm:$0x3]  ;;  %v10377_v57 = vsub.s32 1, %v10374_v56 }
  0x13   :  { %236 = vmatpush1.bf16.msra.mxu0 %v9447_v15  ;;  %31 = vst [vmem:[%s12805_s6 + $0x2] sm:$0x3] %v29_v54  ;;  %v32_v58 = vld [vmem:[%s12803_s4] sm:$0x3f]  ;;  %v10099_v59 = vmov 1966171168  }
  0x14   :  { %237 = vmatprep.subr.bf16.mxu0 %v9449_v16  ;;  %8955 = vmatpush3.bf16.msra.mxu1 %v9461_v20  ;;  %v310_v60 = vunpack.c.l.s4 %v10099_v59  ;;  %v75_v61 = vrot.slane %v32_v58, %v10377_v57 }
  0x15   :  { %8956 = vmatprep.subr.bf16.mxu1 %v12808_v2 }
  0x17   :  { %238 = vmatpush1.bf16.msra.mxu0 %v9451_v18 }
  0x18   :  { %239 = vmatprep.subr.bf16.mxu0 %v9453_v19  ;;  %8957 = vmatpush3.bf16.msra.mxu1 %v9462_v23 }
  0x19   :  { %8958 = vmatprep.subr.bf16.mxu1 %v12808_v2 }
  0x1b   :  { %240 = vmatpush1.bf16.msra.mxu0 %v9455_v21 }
  0x1c   :  { %241 = vmatprep.subr.bf16.mxu0 %v9457_v22  ;;  %8959 = vmatpush3.bf16.msra.mxu1 %v9463_v26 }
  0x1d   :  { %8960 = vmatprep.subr.bf16.mxu1 %v12808_v2 }
  0x1f   :  { %242 = vmatpush1.bf16.msra.mxu0 %v9459_v24 }
  0x20   :  { %8961 = vmatpush3.bf16.msra.mxu1 %v9464_v28  ;;  %687 = vmatprep.subr.bf16.mxu0 %v10237_v29 }
  0x21   :  { %8966 = vmatprep.subr.bf16.mxu1 %v12808_v2 }
  0x22   :  { %260 = vmatmul.mubr.bf16.vlgmr.msra.gmra.mxu0 %v38_v27 }
  0x23   :  { %719 = vmatprep.mubr.bf16.mxu0 %v12806_v3  ;;  %8963 = vmatmul.mubr.bf16.vlgmr.msra.gmra.mxu1 %v38_v27 }
  0x24   :  { %8982 = vmatprep.mubr.msk.bf16.mxu1 %vm10098_vm0, %v12808_v2  ;;  %688 = vmatpush1.bf16.msra.mxu0 %v10242_v30 }
  0x25   :  { %8967 = vmatpush3.bf16.msra.mxu1 %v9468_v31  ;;  %689 = vmatprep.subr.bf16.mxu0 %v10252_v32 }
  0x26   :  { %8968 = vmatprep.subr.bf16.mxu1 %v12808_v2 }
  0x28   :  { %690 = vmatpush1.bf16.msra.mxu0 %v10258_v33 }
  0x29   :  { %8969 = vmatpush3.bf16.msra.mxu1 %v9472_v34  ;;  %691 = vmatprep.subr.bf16.mxu0 %v10268_v35 }
  0x2a   :  { %8970 = vmatprep.subr.bf16.mxu1 %v12808_v2 }
  0x2c   :  { %692 = vmatpush1.bf16.msra.mxu0 %v10274_v36 }
  0x2d   :  { %8971 = vmatpush3.bf16.msra.mxu1 %v9476_v37  ;;  %693 = vmatprep.subr.bf16.mxu0 %v10283_v38 }
  0x2e   :  { %8972 = vmatprep.subr.bf16.mxu1 %v12808_v2 }
  0x30   :  { %694 = vmatpush1.bf16.msra.mxu0 %v10289_v39 }
  0x31   :  { %8973 = vmatpush3.bf16.msra.mxu1 %v9480_v40  ;;  %695 = vmatprep.subr.bf16.mxu0 %v10299_v41 }
  0x32   :  { %8974 = vmatprep.subr.bf16.mxu1 %v12808_v2 }
  0x34   :  { %696 = vmatpush1.bf16.msra.mxu0 %v10304_v42 }
  0x35   :  { %8975 = vmatpush3.bf16.msra.mxu1 %v9484_v43  ;;  %697 = vmatprep.subr.bf16.mxu0 %v10313_v44 }
  0x36   :  { %8976 = vmatprep.subr.bf16.mxu1 %v12808_v2 }
  0x38   :  { %698 = vmatpush1.bf16.msra.mxu0 %v10320_v45 }
  0x39   :  { %8977 = vmatpush3.bf16.msra.mxu1 %v9488_v46  ;;  %699 = vmatprep.subr.bf16.mxu0 %v10328_v47 }
  0x3a   :  { %8978 = vmatprep.subr.bf16.mxu1 %v12808_v2 }
  0x3c   :  { %700 = vmatpush1.bf16.msra.mxu0 %v10336_v48 }
  0x3d   :  { %8979 = vmatpush3.bf16.msra.mxu1 %v9492_v49  ;;  %701 = vmatprep.subr.bf16.mxu0 %v10344_v50 }
  0x3e   :  { %8980 = vmatprep.subr.bf16.mxu1 %v12808_v2 }
  0x40   :  { %702 = vmatpush1.bf16.msra.mxu0 %v10352_v51 }
  0x41   :  { %8981 = vmatpush3.bf16.msra.mxu1 %v9496_v52  ;;  %957 = vmatprep.subr.bf16.mxu0 %v10360_v53 }
  0x42   :  { %8986 = vmatprep.subr.bf16.mxu1 %v12808_v2 }
  0x43   :  { %12 = vsyncpa [#allocation3], 0  ;;  %v311_v62 = vunpack.c.0.s8 %v310_v60  ;;  %v10384_v63 = vrot.slane %v75_v61, %v10377_v57  ;;  %v82_v7 = vsub.s32 5, %v10374_v56  ;;  %v35_v8 = vld [vmem:[%s12799_s0] ss:$8 sm:$0x7] }
  0x44   :  { %v78_v12 = vsub.s32 3, %v10374_v56  ;;  %v7843_v13 = vld [vmem:[%s12799_s0 + $0x18] ss:$8 sm:$0x7]  ;;  %v345_v55 = vrot.slane %v35_v8, 1  ;;  %vm555_vm1 = vcmask 1041409  }
  0x45   :  { %12832 = vst [vmem:[#allocation5_spill] sm:$0xff] %v10384_v63  ;;  %v10387_v0 = vsub.s32 %v311_v62, %v10374_v56  ;;  %v83_v18 = vrot.slane %v32_v58, %v82_v7 }
  0x46   :  { %v79_v22 = vrot.slane %v32_v58, %v78_v12  ;;  %v411_v58 = vrot.slane %v35_v8, 2 }
  0x47   :  { %v10406_v25 = vrot.slane %v83_v18, %v10377_v57 }
  0x48   :  { %v10409_v27 = vrot.slane %v79_v22, %v10377_v57 }
  0x49   :  { %12833 = vst [vmem:[#allocation6_spill] sm:$0xff] %v10406_v25 }
  0x4a   :  { %12834 = vst [vmem:[#allocation7_spill] sm:$0xff] %v10409_v27 }
  0xe2   :  { %v261_v1 = vpop.f32.mrf.mxu0 }
  0xe3   :  { %v262_v4 = vadd.f32 %v261_v1, %v10384_v63  ;;  %v302_v15 = vpop.f32.mrf.mxu1  ;;  %v346_v1 = vrot.slane %v7843_v13, 1 }
  0xe4   :  { %v263_v5 = vpop.f32.mrf.mxu0  ;;  %v303_v28 = vadd.f32 %v302_v15, %v10406_v25 }
  0xe5   :  { %v315_v6 = vrot.slane %v262_v4, %v10387_v0  ;;  %v8964_v19 = vpop.f32.mrf.mxu1  ;;  %v264_v31 = vadd.f32 %v263_v5, %v10409_v27 }
  0xe6   :  { %v265_v9 = vpop.f32.mrf.mxu0  ;;  %v391_v34 = vrot.slane %v303_v28, %v10387_v0 }
  0xe7   :  { %v316_v10 = vcombine.high %v315_v6, %v315_v6  ;;  %v323_v11 = vrot.slane %v315_v6, %v10387_v0  ;;  %v305_v23 = vpop.f32.mrf.mxu1  ;;  %v356_v37 = vrot.slane %v264_v31, %v10387_v0  ;;  %v412_v9 = vrot.slane %v7843_v13, 2 }
  0xe8   :  { %v266_v14 = vpop.f32.mrf.mxu0  ;;  %v392_v40 = vcombine.high %v391_v34, %v391_v34  ;;  %v399_v52 = vrot.slane %v391_v34, %v10387_v0 }
  0xe9   :  { %v330_v16 = vrot.slane %v316_v10, %v10387_v0  ;;  %v333_v17 = vadd.f32 %v323_v11, %v35_v8  ;;  %v8965_v26 = vpop.f32.mrf.mxu1  ;;  %v357_v46 = vcombine.high %v356_v37, %v356_v37  ;;  %v364_v59 = vrot.slane %v356_v37, %v10387_v0 }
  0xea   :  { %v406_v62 = vrot.slane %v392_v40, %v10387_v0  ;;  %v10057_v26 = vld [vmem:[%s12805_s6] sm:$0x3] }
  0xeb   :  { %v334_v20 = vadd.f32 %v7843_v13, %v330_v16  ;;  %v335_v21 = vmul.f32 0.5, %v333_v17  ;;  %v371_v4 = vrot.slane %v357_v46, %v10387_v0  ;;  %v374_v10 = vadd.f32 %v364_v59, %v345_v55 }
  0xed   :  { %v336_v24 = vmul.f32 0.5, %v334_v20  ;;  %9913 = vtanh.f32 %v335_v21  ;;  %v375_v15 = vadd.f32 %v371_v4, %v346_v1  ;;  %v376_v17 = vmul.f32 0.5, %v374_v10  ;;  %v9500_v10 = vld [vmem:[%s12801_s2 + $0x170] ss:$12 sps:$4 sm:$0xff]  }
  0xef   :  { %9915 = vtanh.f32 %v336_v24  ;;  %v377_v8 = vmul.f32 0.5, %v375_v15  ;;  %v10449_v15 = vld [vmem:[%s12801_s2 + $0x150] ss:$12 sps:$4 sm:$0xff]  }
  0xfa   :  { %v9914_v43 = vpop.eup %9913 }
  0xfb   :  { %v339_v49 = vadd.f32 1.0, %v9914_v43 }
  0xfc   :  { %v9916_v54 = vpop.eup %9915 }
  0xfd   :  { %v340_v60 = vadd.f32 1.0, %v9916_v54  ;;  %v341_v61 = vmul.f32 0.5, %v339_v49 }
  0xff   :  { %v342_v5 = vmul.f32 0.5, %v340_v60  ;;  %v409_v6 = vmul.f32 %v399_v52, %v341_v61 }
 0x101   :  { %v410_v11 = vmul.f32 %v406_v62, %v342_v5  ;;  %v415_v14 = vadd.f32 %v411_v58, %v409_v6  ;;  %v10434_v6 = vld [vmem:[%s12801_s2 + $0x168] ss:$12 sps:$4 sm:$0xff]  }
 0x103   :  { %v416_v16 = vadd.f32 %v412_v9, %v410_v11  ;;  %9917 = vtanh.f32 %v415_v14  ;;  %v10443_v14 = vld [vmem:[%s12801_s2 + $0x154] ss:$12 sps:$4 sm:$0xff]  }
 0x105   :  { %9919 = vtanh.f32 %v416_v16  ;;  %v9504_v16 = vld [vmem:[%s12801_s2 + $0x158] ss:$12 sps:$4 sm:$0xff]  }
 0x106   :  { %9921 = vtanh.f32 %v376_v17  ;;  %v10459_v17 = vld [vmem:[%s12801_s2 + $0x13c] ss:$12 sps:$4 sm:$0xff]  }
 0x107   :  { %9923 = vtanh.f32 %v377_v8  ;;  %v10468_v8 = vld [vmem:[%s12801_s2 + $0x138] ss:$12 sps:$4 sm:$0xff]  }
 0x110   :  { %v9918_v18 = vpop.eup %9917 }
 0x112   :  { %v9920_v19 = vpop.eup %9919 }
 0x113   :  { %v421_v20 = vcombine.low %v9918_v18, %v9920_v19  ;;  %v9922_v22 = vpop.eup %9921 }
 0x114   :  { %v9924_v13 = vpop.eup %9923  ;;  %v380_v24 = vadd.f32 1.0, %v9922_v22  ;;  %v10494_v22 = vld [vmem:[%s12801_s2 + $0x10c] ss:$12 sps:$4 sm:$0xff]  }
 0x115   :  { %v428_v21 = vrot.slane %v421_v20, %v10387_v0  ;;  %v381_v31 = vadd.f32 1.0, %v9924_v13  ;;  %v10484_v20 = vld [vmem:[%s12801_s2 + $0x120] ss:$12 sps:$4 sm:$0xff]   ;;  %v9516_v13 = vld [vmem:[%s12801_s2 + $0x110] ss:$12 sps:$4 sm:$0xff]  }
 0x116   :  { %v382_v37 = vmul.f32 0.5, %v380_v24  ;;  %v10510_v24 = vld [vmem:[%s12801_s2 + $0xf4] ss:$12 sps:$4 sm:$0xff]  }
 0x117   :  { %v435_v23 = vrot.slane %v428_v21, %v10387_v0  ;;  %v383_v46 = vmul.f32 0.5, %v381_v31  ;;  %v9512_v21 = vld [vmem:[%s12801_s2 + $0x128] ss:$12 sps:$4 sm:$0xff]  }
 0x118   :  { %v10526_v31 = vld [vmem:[%s12801_s2 + $0xdc] ss:$12 sps:$4 sm:$0xff]  }
 0x119   :  { %v437_v28 = vsub.f32 %v10057_v26, %v435_v23  ;;  %v10500_v23 = vld [vmem:[%s12801_s2 + $0x108] ss:$12 sps:$4 sm:$0xff]   ;;  %v10516_v26 = vld [vmem:[%s12801_s2 + $0xf0] ss:$12 sps:$4 sm:$0xff]  }
 0x11b   :  { %v445_v34 = vrot.slane %v437_v28, %v10387_v0  ;;  %v9520_v28 = vld [vmem:[%s12801_s2 + $0xf8] ss:$12 sps:$4 sm:$0xff]  }
 0x11d   :  { %v446_v40 = vcombine.high %v445_v34, %v445_v34  ;;  %v453_v43 = vrot.slane %v445_v34, %v10387_v0  ;;  %v10532_v34 = vld [vmem:[%s12801_s2 + $0xd8] ss:$12 sps:$4 sm:$0xff]  }
 0x11f   :  { %v460_v49 = vrot.slane %v446_v40, %v10387_v0  ;;  %v463_v52 = vmul.f32 %v453_v43, %v382_v37  ;;  %v9524_v37 = vld [vmem:[%s12801_s2 + $0xe0] ss:$12 sps:$4 sm:$0xff]   ;;  %v10542_v40 = vld [vmem:[%s12801_s2 + $0xc4] ss:$12 sps:$4 sm:$0xff]  }
 0x120   :  { %v10548_v43 = vld [vmem:[%s12801_s2 + $0xc0] ss:$12 sps:$4 sm:$0xff]  }
 0x121   :  { %v464_v54 = vmul.f32 %v460_v49, %v383_v46  ;;  %v465_v55 = vadd.f32 %v9918_v18, %v463_v52  ;;  %v9508_v18 = vld [vmem:[%s12801_s2 + $0x140] ss:$12 sps:$4 sm:$0xff]   ;;  %v9528_v46 = vld [vmem:[%s12801_s2 + $0xc8] ss:$12 sps:$4 sm:$0xff]  }
 0x122   :  { %v10556_v49 = vld [vmem:[%s12805_s6 + $0x2] sm:$0x3] }
 0x123   :  { %v466_v58 = vadd.f32 %v9920_v19, %v464_v54  ;;  %v488_v60 = vpack.c.bf16 %v465_v55, %v465_v55  ;;  %v10478_v19 = vld [vmem:[%s12801_s2 + $0x124] ss:$12 sps:$4 sm:$0xff]   ;;  %v768_v52 = vpack.c.bf16 %v10556_v49, %v10556_v49 }
 0x124   :  { %v9529_v54 = vld [vmem:[%s12801_s2 + $0xb0] ss:$12 sps:$4 sm:$0xff]  }
 0x125   :  { %v469_v59 = vcombine.low %v465_v55, %v466_v58  ;;  %v489_v61 = vpack.c.bf16 %v466_v58, %v466_v58  ;;  %v552_v4 = vunpack.c.l.b16 %v488_v60  ;;  %v10058_v55 = vld [vmem:[%s12801_s2 + $0xac] ss:$12 sps:$4 sm:$0xff]   ;;  %v10059_v58 = vld [vmem:[%s12801_s2 + $0xa8] ss:$12 sps:$4 sm:$0xff]  }
 0x126   :  { %v10060_v60 = vld [vmem:[%s12801_s2 + $0x94] ss:$12 sps:$4 sm:$0xff]  }
 0x127   :  { %v476_v62 = vrot.slane %v469_v59, %v10387_v0  ;;  %v553_v1 = vunpack.c.l.b16 %v489_v61  ;;  %v9530_v59 = vld [vmem:[%s12801_s2 + $0x98] ss:$12 sps:$4 sm:$0xff]   ;;  %v10061_v61 = vld [vmem:[%s12801_s2 + $0x90] ss:$12 sps:$4 sm:$0xff]  }
 0x129   :  { %7868 = vst.sshfl [vmem:[%s12805_s6] sm:$0x5 pattern:$0x73625140] %v476_v62  ;;  %v554_v5 = vrot.slane %v553_v1, 7  ;;  %v9531_v62 = vld [vmem:[%s12801_s2 + $0x80] ss:$12 sps:$4 sm:$0xff]  }
 0x12a   :  { %v10062_v1 = vld [vmem:[%s12801_s2 + $0x7c] ss:$12 sps:$4 sm:$0xff]  }
 0x12b   :  { %v556_v9 = vsel %vm555_vm1, %v554_v5, %v552_v4  ;;  %v10063_v4 = vld [vmem:[%s12801_s2 + $0x78] ss:$12 sps:$4 sm:$0xff]   ;;  %v9532_v5 = vld [vmem:[%s12801_s2 + $0x68] ss:$12 sps:$4 sm:$0xff]  }
 0x12c   :  { %v557_v11 = vpack.c.b16 %v556_v9, %v556_v9  ;;  %v10064_v9 = vld [vmem:[%s12801_s2 + $0x64] ss:$12 sps:$4 sm:$0xff]  }
 0x12e   :  { %720 = vmatmul.mubr.bf16.vlgmr.msra.gmra.mxu0 %v557_v11  ;;  %8983 = vmatmul.mubr.bf16.vlgmr.msra.gmra.mxu1 %v557_v11  ;;  %v9533_v11 = vld [vmem:[%s12801_s2 + $0x50] ss:$12 sps:$4 sm:$0xff]  }
 0x12f   :  { %958 = vmatpush1.bf16.msra.mxu0 %v10434_v6  ;;  %8987 = vmatpush3.bf16.msra.mxu1 %v9500_v10  ;;  %v10065_v10 = vld [vmem:[%s12801_s2 + $0x60] ss:$12 sps:$4 sm:$0xff]  }
 0x130   :  { %959 = vmatprep.subr.bf16.mxu0 %v10443_v14  ;;  %8988 = vmatprep.subr.bf16.mxu1 %v12808_v2 }
 0x131   :  { %989 = vmatprep.mubr.bf16.mxu0 %v12806_v3  ;;  %9002 = vmatprep.mubr.msk.bf16.mxu1 %vm10098_vm0, %v12808_v2 }
 0x133   :  { %960 = vmatpush1.bf16.msra.mxu0 %v10449_v15  ;;  %8989 = vmatpush3.bf16.msra.mxu1 %v9504_v16  ;;  %v10066_v16 = vld [vmem:[%s12801_s2 + $0x4c] ss:$12 sps:$4 sm:$0xff]  }
 0x134   :  { %961 = vmatprep.subr.bf16.mxu0 %v10459_v17  ;;  %8990 = vmatprep.subr.bf16.mxu1 %v12808_v2 }
 0x137   :  { %962 = vmatpush1.bf16.msra.mxu0 %v10468_v8  ;;  %8991 = vmatpush3.bf16.msra.mxu1 %v9508_v18  ;;  %v10067_v18 = vld [vmem:[%s12801_s2 + $0x48] ss:$12 sps:$4 sm:$0xff]  }
 0x138   :  { %963 = vmatprep.subr.bf16.mxu0 %v10478_v19  ;;  %8992 = vmatprep.subr.bf16.mxu1 %v12808_v2 }
 0x13b   :  { %964 = vmatpush1.bf16.msra.mxu0 %v10484_v20  ;;  %8993 = vmatpush3.bf16.msra.mxu1 %v9512_v21  ;;  %v9534_v21 = vld [vmem:[%s12801_s2 + $0x38] ss:$12 sps:$4 sm:$0xff]  }
 0x13c   :  { %965 = vmatprep.subr.bf16.mxu0 %v10494_v22  ;;  %8994 = vmatprep.subr.bf16.mxu1 %v12808_v2 }
 0x13f   :  { %966 = vmatpush1.bf16.msra.mxu0 %v10500_v23  ;;  %8995 = vmatpush3.bf16.msra.mxu1 %v9516_v13  ;;  %v10068_v13 = vld [vmem:[%s12801_s2 + $0x34] ss:$12 sps:$4 sm:$0xff]  }
 0x140   :  { %967 = vmatprep.subr.bf16.mxu0 %v10510_v24  ;;  %8996 = vmatprep.subr.bf16.mxu1 %v12808_v2 }
 0x143   :  { %968 = vmatpush1.bf16.msra.mxu0 %v10516_v26  ;;  %8997 = vmatpush3.bf16.msra.mxu1 %v9520_v28  ;;  %v10069_v28 = vld [vmem:[%s12801_s2 + $0x30] ss:$12 sps:$4 sm:$0xff]  }
 0x144   :  { %969 = vmatprep.subr.bf16.mxu0 %v10526_v31  ;;  %8998 = vmatprep.subr.bf16.mxu1 %v12808_v2 }
 0x147   :  { %970 = vmatpush1.bf16.msra.mxu0 %v10532_v34  ;;  %8999 = vmatpush3.bf16.msra.mxu1 %v9524_v37  ;;  %v9535_v37 = vld [vmem:[%s12801_s2 + $0x20] ss:$12 sps:$4 sm:$0xff]  }
 0x148   :  { %971 = vmatprep.subr.bf16.mxu0 %v10542_v40  ;;  %9000 = vmatprep.subr.bf16.mxu1 %v12808_v2 }
 0x14b   :  { %972 = vmatpush1.bf16.msra.mxu0 %v10548_v43  ;;  %9001 = vmatpush3.bf16.msra.mxu1 %v9528_v46  ;;  %v10070_v46 = vld [vmem:[%s12801_s2 + $0x1c] ss:$12 sps:$4 sm:$0xff]  }
 0x14c   :  { %1248 = vmatprep.subr.bf16.mxu0 %v10058_v55  ;;  %9006 = vmatprep.subr.bf16.mxu1 %v12808_v2  ;;  %v10072_v55 = vld [vmem:[%s12801_s2 + $0x4] ss:$12 sps:$4 sm:$0xff]  }
 0x14e   :  { %990 = vmatmul.mubr.bf16.vlgmr.msra.gmra.mxu0 %v768_v52  ;;  %9003 = vmatmul.mubr.bf16.vlgmr.msra.gmra.mxu1 %v768_v52  ;;  %v10071_v52 = vld [vmem:[%s12801_s2 + $0x18] ss:$12 sps:$4 sm:$0xff]  }
 0x14f   :  { %1249 = vmatpush1.bf16.msra.mxu0 %v10059_v58  ;;  %9007 = vmatpush3.bf16.msra.mxu1 %v9529_v54  ;;  %v9536_v54 = vld [vmem:[%s12801_s2 + $0x8] ss:$12 sps:$4 sm:$0xff]   ;;  %v10646_v58 = vld [vmem:[%s12805_s6] sm:$0x3] }
 0x150   :  { %1250 = vmatprep.subr.bf16.mxu0 %v10060_v60  ;;  %9008 = vmatprep.subr.bf16.mxu1 %v12808_v2  ;;  %v1087_v60 = vpack.c.bf16 %v10646_v58, %v10646_v58 }
 0x151   :  { %1280 = vmatprep.mubr.bf16.mxu0 %v12806_v3  ;;  %9022 = vmatprep.mubr.msk.bf16.mxu1 %vm10098_vm0, %v12808_v2 }
 0x153   :  { %1251 = vmatpush1.bf16.msra.mxu0 %v10061_v61  ;;  %9009 = vmatpush3.bf16.msra.mxu1 %v9530_v59  ;;  %v10073_v59 = vld [vmem:[%s12801_s2] ss:$12 sps:$4 sm:$0xff]   ;;  %v33_v61 = vld [vmem:[%s12803_s4 + $0x6] sm:$0x3f] }
 0x154   :  { %1252 = vmatprep.subr.bf16.mxu0 %v10062_v1  ;;  %9010 = vmatprep.subr.bf16.mxu1 %v12808_v2  ;;  %v805_v1 = vrot.slane %v33_v61, %v10377_v57 }
 0x157   :  { %1253 = vmatpush1.bf16.msra.mxu0 %v10063_v4  ;;  %9011 = vmatpush3.bf16.msra.mxu1 %v9531_v62 }
 0x158   :  { %1254 = vmatprep.subr.bf16.mxu0 %v10064_v9  ;;  %9012 = vmatprep.subr.bf16.mxu1 %v12808_v2 }
 0x15b   :  { %1255 = vmatpush1.bf16.msra.mxu0 %v10065_v10  ;;  %9013 = vmatpush3.bf16.msra.mxu1 %v9532_v5  ;;  %v10714_v5 = vrot.slane %v805_v1, %v10377_v57 }
 0x15c   :  { %1256 = vmatprep.subr.bf16.mxu0 %v10066_v16  ;;  %9014 = vmatprep.subr.bf16.mxu1 %v12808_v2  ;;  %v529_v16 = vsub.s32 2, %v10374_v56 }
 0x15f   :  { %1257 = vmatpush1.bf16.msra.mxu0 %v10067_v18  ;;  %9015 = vmatpush3.bf16.msra.mxu1 %v9533_v11 }
 0x160   :  { %1258 = vmatprep.subr.bf16.mxu0 %v10068_v13  ;;  %9016 = vmatprep.subr.bf16.mxu1 %v12808_v2 }
 0x163   :  { %1259 = vmatpush1.bf16.msra.mxu0 %v10069_v28  ;;  %9017 = vmatpush3.bf16.msra.mxu1 %v9534_v21 }
 0x164   :  { %1260 = vmatprep.subr.bf16.mxu0 %v10070_v46  ;;  %9018 = vmatprep.subr.bf16.mxu1 %v12808_v2 }
 0x167   :  { %1261 = vmatpush1.bf16.msra.mxu0 %v10071_v52  ;;  %9019 = vmatpush3.bf16.msra.mxu1 %v9535_v37  ;;  %v809_v37 = vrot.slane %v33_v61, %v78_v12  ;;  %v813_v12 = vrot.slane %v33_v61, %v82_v7 }
 0x168   :  { %1262 = vmatprep.subr.bf16.mxu0 %v10072_v55  ;;  %9020 = vmatprep.subr.bf16.mxu1 %v12808_v2 }
 0x16b   :  { %1263 = vmatpush1.bf16.msra.mxu0 %v10073_v59  ;;  %9021 = vmatpush3.bf16.msra.mxu1 %v9536_v54  ;;  %v530_v54 = vrot.slane %v33_v61, %v529_v16 }
 0x16c   :  { %1678 = vmatprep.subr.bf16.mxu0 %v10237_v29  ;;  %9026 = vmatprep.subr.bf16.mxu1 %v12808_v2  ;;  %v9537_v29 = vld [vmem:[%s12802_s3 + $0xb0] ss:$12 sps:$4 sm:$0xff]  }
 0x16e   :  { %1281 = vmatmul.mubr.bf16.vlgmr.msra.gmra.mxu0 %v1087_v60  ;;  %9023 = vmatmul.mubr.bf16.vlgmr.msra.gmra.mxu1 %v1087_v60 }
 0x16f   :  { %1679 = vmatpush1.bf16.msra.mxu0 %v10242_v30  ;;  %1710 = vmatprep.mubr.bf16.mxu0 %v12806_v3  ;;  %v9538_v30 = vld [vmem:[%s12802_s3 + $0x98] ss:$12 sps:$4 sm:$0xff]  }
 0x170   :  { %1680 = vmatprep.subr.bf16.mxu0 %v10252_v32  ;;  %9042 = vmatprep.mubr.msk.bf16.mxu1 %vm10098_vm0, %v12808_v2  ;;  %v9539_v32 = vld [vmem:[%s12802_s3 + $0x80] ss:$12 sps:$4 sm:$0xff]  }
 0x171   :  { %9027 = vmatpush3.bf16.msra.mxu1 %v9537_v29  ;;  %v10722_v29 = vrot.slane %v809_v37, %v10377_v57 }
 0x172   :  { %9028 = vmatprep.subr.bf16.mxu1 %v12808_v2 }
 0x173   :  { %1681 = vmatpush1.bf16.msra.mxu0 %v10258_v33  ;;  %v9540_v33 = vld [vmem:[%s12802_s3 + $0x68] ss:$12 sps:$4 sm:$0xff]  }
 0x174   :  { %1682 = vmatprep.subr.bf16.mxu0 %v10268_v35  ;;  %v9541_v35 = vld [vmem:[%s12802_s3 + $0x50] ss:$12 sps:$4 sm:$0xff]  }
 0x175   :  { %9029 = vmatpush3.bf16.msra.mxu1 %v9538_v30 }
 0x176   :  { %9030 = vmatprep.subr.bf16.mxu1 %v12808_v2 }
 0x177   :  { %1683 = vmatpush1.bf16.msra.mxu0 %v10274_v36  ;;  %v9542_v36 = vld [vmem:[%s12802_s3 + $0x38] ss:$12 sps:$4 sm:$0xff]  }
 0x178   :  { %1684 = vmatprep.subr.bf16.mxu0 %v10283_v38 }
 0x179   :  { %9031 = vmatpush3.bf16.msra.mxu1 %v9539_v32 }
 0x17a   :  { %9032 = vmatprep.subr.bf16.mxu1 %v12808_v2 }
 0x17b   :  { %1685 = vmatpush1.bf16.msra.mxu0 %v10289_v39 }
 0x17c   :  { %1686 = vmatprep.subr.bf16.mxu0 %v10299_v41  ;;  %v9543_v41 = vld [vmem:[%s12802_s3 + $0x20] ss:$12 sps:$4 sm:$0xff]  }
 0x17d   :  { %9033 = vmatpush3.bf16.msra.mxu1 %v9540_v33  ;;  %v533_v33 = vsub.s32 4, %v10374_v56 }
 0x17e   :  { %9034 = vmatprep.subr.bf16.mxu1 %v12808_v2 }
 0x17f   :  { %1687 = vmatpush1.bf16.msra.mxu0 %v10304_v42 }
 0x180   :  { %1688 = vmatprep.subr.bf16.mxu0 %v10313_v44 }
 0x181   :  { %9035 = vmatpush3.bf16.msra.mxu1 %v9541_v35 }
 0x182   :  { %9036 = vmatprep.subr.bf16.mxu1 %v12808_v2 }
 0x183   :  { %1689 = vmatpush1.bf16.msra.mxu0 %v10320_v45 }
 0x184   :  { %1690 = vmatprep.subr.bf16.mxu0 %v10328_v47 }
 0x185   :  { %9037 = vmatpush3.bf16.msra.mxu1 %v9542_v36 }
 0x186   :  { %9038 = vmatprep.subr.bf16.mxu1 %v12808_v2 }
 0x187   :  { %1691 = vmatpush1.bf16.msra.mxu0 %v10336_v48  ;;  %v9544_v48 = vld [vmem:[%s12802_s3 + $0x8] ss:$12 sps:$4 sm:$0xff]  }
 0x188   :  { %1692 = vmatprep.subr.bf16.mxu0 %v10344_v50 }
 0x189   :  { %9039 = vmatpush3.bf16.msra.mxu1 %v9543_v41  ;;  %v10732_v41 = vrot.slane %v813_v12, %v10377_v57 }
 0x18a   :  { %9040 = vmatprep.subr.bf16.mxu1 %v12808_v2 }
 0x18b   :  { %1693 = vmatpush1.bf16.msra.mxu0 %v10352_v51 }
 0x18c   :  { %1920 = vmatprep.subr.bf16.mxu0 %v10360_v53  ;;  %v525_v53 = vsub.s32 0, %v10374_v56 }
 0x18d   :  { %9041 = vmatpush3.bf16.msra.mxu1 %v9544_v48 }
 0x18e   :  { %9046 = vmatprep.subr.bf16.mxu1 %v12808_v2  ;;  %v526_v62 = vrot.slane %v33_v61, %v525_v53  ;;  %v10724_v30 = vrot.slane %v530_v54, %v525_v53 }
 0x190   :  { %v10711_v4 = vrot.slane %v526_v62, %v525_v53 }
 0x1ee   :  { %v721_v38 = vpop.f32.mrf.mxu0  ;;  %v762_v39 = vpop.f32.mrf.mxu1 }
 0x1ef   :  { %v722_v11 = vadd.f32 %v721_v38, %v10711_v4  ;;  %v534_v38 = vrot.slane %v33_v61, %v533_v33 }
 0x1f0   :  { %v723_v42 = vpop.f32.mrf.mxu0  ;;  %v8984_v44 = vpop.f32.mrf.mxu1 }
 0x1f1   :  { %v724_v35 = vadd.f32 %v723_v42, %v10724_v30 }
 0x1f2   :  { %v725_v45 = vpop.f32.mrf.mxu0  ;;  %v765_v47 = vpop.f32.mrf.mxu1 }
 0x1f3   :  { %v10734_v47 = vrot.slane %v534_v38, %v525_v53 }
 0x1f4   :  { %v726_v50 = vpop.f32.mrf.mxu0  ;;  %v8985_v51 = vpop.f32.mrf.mxu1 }
 0x1f5   :  { %v763_v62 = vadd.f32 %v762_v39, %v10734_v47 }
 0x20e   :  { %v991_v9 = vpop.f32.mrf.mxu0  ;;  %v1032_v10 = vpop.f32.mrf.mxu1 }
 0x20f   :  { %v992_v18 = vadd.f32 %v991_v9, %v10714_v5  ;;  %v1033_v48 = vadd.f32 %v1032_v10, %v10732_v41  ;;  %v7953_v10 = vld [vmem:[%s12799_s0 + $0x1] ss:$8 sm:$0x7] }
 0x210   :  { %v993_v21 = vpop.f32.mrf.mxu0  ;;  %v9004_v13 = vpop.f32.mrf.mxu1 }
 0x211   :  { %v1038_v28 = vadd.f32 %v992_v18, %v722_v11  ;;  %v994_v32 = vadd.f32 %v993_v21, %v10722_v29  ;;  %v7954_v13 = vld [vmem:[%s12799_s0 + $0x19] ss:$8 sm:$0x7] }
 0x212   :  { %v995_v46 = vpop.f32.mrf.mxu0  ;;  %v1035_v52 = vpop.f32.mrf.mxu1 }
 0x213   :  { %v1039_v55 = vmul.f32 0.5, %v1038_v28  ;;  %v1043_v36 = vadd.f32 %v994_v32, %v724_v35 }
 0x214   :  { %v996_v59 = vpop.f32.mrf.mxu0  ;;  %v9005_v60 = vpop.f32.mrf.mxu1 }
 0x215   :  { %9925 = vtanh.f32 %v1039_v55  ;;  %v1044_v44 = vmul.f32 0.5, %v1043_v36 }
 0x217   :  { %9927 = vtanh.f32 %v1044_v44 }
 0x222   :  { %v9926_v45 = vpop.eup %9925 }
 0x223   :  { %v1041_v50 = vadd.f32 1.0, %v9926_v45 }
 0x224   :  { %v9928_v53 = vpop.eup %9927 }
 0x225   :  { %v1042_v51 = vmul.f32 0.5, %v1041_v50  ;;  %v1046_v46 = vadd.f32 1.0, %v9928_v53 }
 0x227   :  { %v1048_v42 = vmul.f32 %v1042_v51, %v1033_v48  ;;  %v1047_v32 = vmul.f32 0.5, %v1046_v46 }
 0x229   :  { %v1049_v1 = vadd.f32 %v1048_v42, %v763_v62 }
 0x22b   :  { %9929 = vtanh.f32 %v1049_v1 }
 0x22e   :  { %v1282_v56 = vpop.f32.mrf.mxu0  ;;  %v1323_v7 = vpop.f32.mrf.mxu1 }
 0x22f   :  { %v1283_v61 = vadd.f32 %v1282_v56, %v10384_v63  ;;  %v1324_v44 = vadd.f32 %v1323_v7, %v10406_v25 }
 0x230   :  { %v1284_v57 = vpop.f32.mrf.mxu0  ;;  %v9024_v9 = vpop.f32.mrf.mxu1 }
 0x231   :  { %v1336_v11 = vrot.slane %v1283_v61, %v10387_v0  ;;  %v1285_v45 = vadd.f32 %v1284_v57, %v10409_v27  ;;  %v1432_v61 = vrot.slane %v7953_v10, 2  ;;  %v1366_v9 = vrot.slane %v7953_v10, 1 }
 0x232   :  { %v1286_v16 = vpop.f32.mrf.mxu0  ;;  %v1326_v18 = vpop.f32.mrf.mxu1 }
 0x233   :  { %v1337_v21 = vcombine.high %v1336_v11, %v1336_v11  ;;  %v1344_v39 = vrot.slane %v1336_v11, %v10387_v0  ;;  %v1377_v50 = vrot.slane %v1285_v45, %v10387_v0  ;;  %v1433_v16 = vrot.slane %v7954_v13, 2 }
 0x234   :  { %v1287_v28 = vpop.f32.mrf.mxu0  ;;  %v9025_v37 = vpop.f32.mrf.mxu1  ;;  %v1367_v18 = vrot.slane %v7954_v13, 1 }
 0x235   :  { %v1351_v52 = vrot.slane %v1337_v21, %v10387_v0  ;;  %v1354_v54 = vadd.f32 %v7953_v10, %v1344_v39  ;;  %v1378_v1 = vcombine.high %v1377_v50, %v1377_v50  ;;  %v1385_v57 = vrot.slane %v1377_v50, %v10387_v0 }
 0x237   :  { %v1355_v55 = vadd.f32 %v7954_v13, %v1351_v52  ;;  %v1356_v59 = vmul.f32 0.5, %v1354_v54  ;;  %v1392_v37 = vrot.slane %v1378_v1, %v10387_v0  ;;  %v1395_v54 = vadd.f32 %v1385_v57, %v1366_v9 }
 0x238   :  { %v9930_v60 = vpop.eup %9929 }
 0x239   :  { %v1051_v33 = vsub.f32 %v10556_v49, %v9930_v60  ;;  %v1357_v35 = vmul.f32 0.5, %v1355_v55  ;;  %9931 = vtanh.f32 %v1356_v59  ;;  %v1412_v49 = vrot.slane %v1324_v44, %v10387_v0 }
 0x23a   :  { %v1396_v59 = vadd.f32 %v1392_v37, %v1367_v18  ;;  %v1397_v10 = vmul.f32 0.5, %v1395_v54  ;;  %v9564_v54 = vld [vmem:[%s12801_s2 + $0x80] ss:$12 sps:$4 sm:$0xff]  }
 0x23b   :  { %v1052_v12 = vmul.f32 %v1051_v33, %v1047_v32  ;;  %9933 = vtanh.f32 %v1357_v35  ;;  %v1413_v42 = vcombine.high %v1412_v49, %v1412_v49  ;;  %v1420_v7 = vrot.slane %v1412_v49, %v10387_v0 }
 0x23d   :  { %v1053_v36 = vadd.f32 %v9930_v60, %v1052_v12  ;;  %v1427_v39 = vrot.slane %v1413_v42, %v10387_v0  ;;  %v1398_v60 = vmul.f32 0.5, %v1396_v59  ;;  %v10887_v59 = vld [vmem:[%s12801_s2 + $0x60] ss:$12 sps:$4 sm:$0xff]  }
 0x23f   :  { %7950 = vst [vmem:[%s12805_s6 + $0x2] sm:$0x3] %v1053_v36  ;;  %v1062_v38 = vrot.slane %v1053_v36, %v10387_v0 }
 0x241   :  { %v1063_v48 = vcombine.high %v1062_v38, %v1062_v38  ;;  %7951 = vst.sshfl [vmem:[#allocation2] sm:$0x1 pattern:$0x73625140] %v1062_v38 }
 0x243   :  { %7952 = vst.sshfl [vmem:[#allocation2 + $0x8] sm:$0x1 pattern:$0x73625140] %v1063_v48 }
 0x246   :  { %v9932_v51 = vpop.eup %9931 }
 0x247   :  { %v1360_v62 = vadd.f32 1.0, %v9932_v51 }
 0x248   :  { %v9934_v56 = vpop.eup %9933 }
 0x249   :  { %v1361_v11 = vadd.f32 1.0, %v9934_v56  ;;  %v1362_v53 = vmul.f32 0.5, %v1360_v62 }
 0x24b   :  { %v1363_v21 = vmul.f32 0.5, %v1361_v11  ;;  %v1430_v28 = vmul.f32 %v1420_v7, %v1362_v53 }
 0x24d   :  { %v1431_v46 = vmul.f32 %v1427_v39, %v1363_v21  ;;  %v1436_v52 = vadd.f32 %v1432_v61, %v1430_v28  ;;  %v9545_v28 = vld [vmem:[%s12801_s2 + $0x170] ss:$12 sps:$4 sm:$0xff]  }
 0x24f   :  { %v1437_v55 = vadd.f32 %v1433_v16, %v1431_v46  ;;  %9935 = vtanh.f32 %v1436_v52  ;;  %v9546_v46 = vld [vmem:[%s12801_s2 + $0x158] ss:$12 sps:$4 sm:$0xff]  }
 0x250   :  { %v10871_v52 = vld [vmem:[%s12801_s2 + $0x78] ss:$12 sps:$4 sm:$0xff]  }
 0x251   :  { %9937 = vtanh.f32 %v1437_v55  ;;  %v10881_v55 = vld [vmem:[%s12801_s2 + $0x64] ss:$12 sps:$4 sm:$0xff]  }
 0x252   :  { %9939 = vtanh.f32 %v1397_v10  ;;  %v9568_v10 = vld [vmem:[%s12801_s2 + $0x68] ss:$12 sps:$4 sm:$0xff]  }
 0x253   :  { %9941 = vtanh.f32 %v1398_v60  ;;  %v10897_v60 = vld [vmem:[%s12801_s2 + $0x4c] ss:$12 sps:$4 sm:$0xff]  }
 0x25c   :  { %v9936_v32 = vpop.eup %9935 }
 0x25e   :  { %v9938_v33 = vpop.eup %9937 }
 0x25f   :  { %v1442_v13 = vcombine.low %v9936_v32, %v9938_v33  ;;  %v9940_v12 = vpop.eup %9939 }
 0x260   :  { %v9942_v38 = vpop.eup %9941  ;;  %v1401_v44 = vadd.f32 1.0, %v9940_v12  ;;  %v9576_v12 = vld [vmem:[%s12801_s2 + $0x38] ss:$12 sps:$4 sm:$0xff]  }
 0x261   :  { %v1449_v35 = vrot.slane %v1442_v13, %v10387_v0  ;;  %v1402_v48 = vadd.f32 1.0, %v9942_v38  ;;  %v10913_v13 = vld [vmem:[%s12801_s2 + $0x34] ss:$12 sps:$4 sm:$0xff]   ;;  %v10935_v38 = vld [vmem:[%s12801_s2 + $0x18] ss:$12 sps:$4 sm:$0xff]  }
 0x262   :  { %v1403_v50 = vmul.f32 0.5, %v1401_v44  ;;  %v9580_v44 = vld [vmem:[%s12801_s2 + $0x20] ss:$12 sps:$4 sm:$0xff]  }
 0x263   :  { %v1456_v36 = vrot.slane %v1449_v35, %v10387_v0  ;;  %v1404_v42 = vmul.f32 0.5, %v1402_v48  ;;  %v10919_v35 = vld [vmem:[%s12801_s2 + $0x30] ss:$12 sps:$4 sm:$0xff]   ;;  %v10951_v48 = vld [vmem:[%s12801_s2] ss:$12 sps:$4 sm:$0xff]  }
 0x265   :  { %v1458_v45 = vsub.f32 %v10646_v58, %v1456_v36  ;;  %v10929_v36 = vld [vmem:[%s12801_s2 + $0x1c] ss:$12 sps:$4 sm:$0xff]  }
 0x267   :  { %v1466_v49 = vrot.slane %v1458_v45, %v10387_v0  ;;  %v10945_v45 = vld [vmem:[%s12801_s2 + $0x4] ss:$12 sps:$4 sm:$0xff]  }
 0x269   :  { %v1467_v51 = vcombine.high %v1466_v49, %v1466_v49  ;;  %v1474_v62 = vrot.slane %v1466_v49, %v10387_v0  ;;  %v9584_v49 = vld [vmem:[%s12801_s2 + $0x8] ss:$12 sps:$4 sm:$0xff]  }
 0x26b   :  { %v1481_v1 = vrot.slane %v1467_v51, %v10387_v0  ;;  %v1484_v56 = vmul.f32 %v1474_v62, %v1403_v50  ;;  %v10973_v62 = vld [vmem:[%s12802_s3 + $0xac] ss:$12 sps:$4 sm:$0xff]  }
 0x26d   :  { %v1485_v61 = vmul.f32 %v1481_v1, %v1404_v42  ;;  %v1486_v9 = vadd.f32 %v9936_v32, %v1484_v56  ;;  %v10903_v32 = vld [vmem:[%s12801_s2 + $0x48] ss:$12 sps:$4 sm:$0xff]   ;;  %v9588_v1 = vld [vmem:[%s12802_s3 + $0xb0] ss:$12 sps:$4 sm:$0xff]  }
 0x26e   :  { %v10978_v42 = vld [vmem:[%s12802_s3 + $0xa8] ss:$12 sps:$4 sm:$0xff]  }
 0x26f   :  { %v1487_v11 = vadd.f32 %v9938_v33, %v1485_v61  ;;  %v1508_v7 = vpack.c.bf16 %v1486_v9, %v1486_v9  ;;  %v9572_v33 = vld [vmem:[%s12801_s2 + $0x50] ss:$12 sps:$4 sm:$0xff]   ;;  %v10988_v56 = vld [vmem:[%s12802_s3 + $0x94] ss:$12 sps:$4 sm:$0xff]  }
 0x270   :  { %v10994_v61 = vld [vmem:[%s12802_s3 + $0x90] ss:$12 sps:$4 sm:$0xff]  }
 0x271   :  { %v1490_v53 = vcombine.low %v1486_v9, %v1487_v11  ;;  %v1509_v57 = vpack.c.bf16 %v1487_v11, %v1487_v11  ;;  %v1544_v18 = vunpack.c.l.b16 %v1508_v7  ;;  %v9592_v9 = vld [vmem:[%s12802_s3 + $0x98] ss:$12 sps:$4 sm:$0xff]   ;;  %v11004_v11 = vld [vmem:[%s12802_s3 + $0x7c] ss:$12 sps:$4 sm:$0xff]   ;;  %v9596_v7 = vld [vmem:[%s12802_s3 + $0x80] ss:$12 sps:$4 sm:$0xff]  }
 0x273   :  { %v1497_v16 = vrot.slane %v1490_v53, %v10387_v0  ;;  %v1545_v58 = vunpack.c.l.b16 %v1509_v57  ;;  %v11010_v53 = vld [vmem:[%s12802_s3 + $0x78] ss:$12 sps:$4 sm:$0xff]  }
 0x274   :  { %v11020_v57 = vld [vmem:[%s12802_s3 + $0x64] ss:$12 sps:$4 sm:$0xff]  }
 0x275   :  { %7979 = vst.sshfl [vmem:[%s12805_s6] sm:$0x5 pattern:$0x73625140] %v1497_v16  ;;  %v1546_v21 = vrot.slane %v1545_v58, 7  ;;  %v11026_v16 = vld [vmem:[%s12802_s3 + $0x60] ss:$12 sps:$4 sm:$0xff]  }
 0x276   :  { %v9600_v58 = vld [vmem:[%s12802_s3 + $0x68] ss:$12 sps:$4 sm:$0xff]  }
 0x277   :  { %v1547_v39 = vsel %vm555_vm1, %v1546_v21, %v1544_v18  ;;  %v11036_v18 = vld [vmem:[%s12802_s3 + $0x4c] ss:$12 sps:$4 sm:$0xff]   ;;  %v11042_v21 = vld [vmem:[%s12802_s3 + $0x48] ss:$12 sps:$4 sm:$0xff]  }
 0x278   :  { %v1548_v37 = vpack.c.b16 %v1547_v39, %v1547_v39  ;;  %v9604_v39 = vld [vmem:[%s12802_s3 + $0x50] ss:$12 sps:$4 sm:$0xff]  }
 0x27a   :  { %1711 = vmatmul.mubr.bf16.vlgmr.msra.gmra.mxu0 %v1548_v37  ;;  %9043 = vmatmul.mubr.bf16.vlgmr.msra.gmra.mxu1 %v1548_v37  ;;  %v11058_v37 = vld [vmem:[%s12802_s3 + $0x30] ss:$12 sps:$4 sm:$0xff]  }
 0x27b   :  { %1921 = vmatpush1.bf16.msra.mxu0 %v10434_v6  ;;  %9047 = vmatpush3.bf16.msra.mxu1 %v9545_v28  ;;  %v9547_v6 = vld [vmem:[%s12801_s2 + $0x140] ss:$12 sps:$4 sm:$0xff]  }
 0x27c   :  { %1922 = vmatprep.subr.bf16.mxu0 %v10443_v14  ;;  %9048 = vmatprep.subr.bf16.mxu1 %v12808_v2  ;;  %v9548_v14 = vld [vmem:[%s12801_s2 + $0x128] ss:$12 sps:$4 sm:$0xff]   ;;  %v10961_v50 = vld [vmem:[%s12805_s6] sm:$0x3] }
 0x27d   :  { %1952 = vmatprep.mubr.bf16.mxu0 %v12806_v3  ;;  %9062 = vmatprep.mubr.msk.bf16.mxu1 %vm10098_vm0, %v12808_v2  ;;  %v2050_v51 = vpack.c.bf16 %v10961_v50, %v10961_v50  ;;  %v11052_v28 = vld [vmem:[%s12802_s3 + $0x34] ss:$12 sps:$4 sm:$0xff]  }
 0x27f   :  { %1923 = vmatpush1.bf16.msra.mxu0 %v10449_v15  ;;  %9049 = vmatpush3.bf16.msra.mxu1 %v9546_v46  ;;  %v9549_v15 = vld [vmem:[%s12801_s2 + $0x110] ss:$12 sps:$4 sm:$0xff]   ;;  %v9608_v46 = vld [vmem:[%s12802_s3 + $0x38] ss:$12 sps:$4 sm:$0xff]  }
 0x280   :  { %1924 = vmatprep.subr.bf16.mxu0 %v10459_v17  ;;  %9050 = vmatprep.subr.bf16.mxu1 %v12808_v2  ;;  %v9550_v17 = vld [vmem:[%s12801_s2 + $0xf8] ss:$12 sps:$4 sm:$0xff]  }
 0x283   :  { %1925 = vmatpush1.bf16.msra.mxu0 %v10468_v8  ;;  %9051 = vmatpush3.bf16.msra.mxu1 %v9547_v6  ;;  %v9551_v8 = vld [vmem:[%s12801_s2 + $0xe0] ss:$12 sps:$4 sm:$0xff]  }
 0x284   :  { %1926 = vmatprep.subr.bf16.mxu0 %v10478_v19  ;;  %9052 = vmatprep.subr.bf16.mxu1 %v12808_v2  ;;  %v9552_v19 = vld [vmem:[%s12801_s2 + $0xc8] ss:$12 sps:$4 sm:$0xff]  }
 0x287   :  { %1927 = vmatpush1.bf16.msra.mxu0 %v10484_v20  ;;  %9053 = vmatpush3.bf16.msra.mxu1 %v9548_v14  ;;  %v10823_v20 = vld [vmem:[%s12801_s2 + $0xac] ss:$12 sps:$4 sm:$0xff]  }
 0x288   :  { %1928 = vmatprep.subr.bf16.mxu0 %v10494_v22  ;;  %9054 = vmatprep.subr.bf16.mxu1 %v12808_v2  ;;  %v10828_v22 = vld [vmem:[%s12805_s6 + $0x2] sm:$0x3] }
 0x28b   :  { %1929 = vmatpush1.bf16.msra.mxu0 %v10500_v23  ;;  %9055 = vmatpush3.bf16.msra.mxu1 %v9549_v15  ;;  %v10834_v23 = vld [vmem:[%s12801_s2 + $0xa8] ss:$12 sps:$4 sm:$0xff]  }
 0x28c   :  { %1930 = vmatprep.subr.bf16.mxu0 %v10510_v24  ;;  %9056 = vmatprep.subr.bf16.mxu1 %v12808_v2  ;;  %v9556_v24 = vld [vmem:[%s12801_s2 + $0xb0] ss:$12 sps:$4 sm:$0xff]  }
 0x28d   :  { %v11067_v15 = vld [vmem:[%s12802_s3 + $0x1c] ss:$12 sps:$4 sm:$0xff]  }
 0x28f   :  { %1931 = vmatpush1.bf16.msra.mxu0 %v10516_v26  ;;  %9057 = vmatpush3.bf16.msra.mxu1 %v9550_v17  ;;  %v1759_v26 = vpack.c.bf16 %v10828_v22, %v10828_v22  ;;  %v11073_v17 = vld [vmem:[%s12802_s3 + $0x18] ss:$12 sps:$4 sm:$0xff]  }
 0x290   :  { %1932 = vmatprep.subr.bf16.mxu0 %v10526_v31  ;;  %9058 = vmatprep.subr.bf16.mxu1 %v12808_v2  ;;  %v10846_v31 = vld [vmem:[%s12801_s2 + $0x94] ss:$12 sps:$4 sm:$0xff]  }
 0x293   :  { %1933 = vmatpush1.bf16.msra.mxu0 %v10532_v34  ;;  %9059 = vmatpush3.bf16.msra.mxu1 %v9551_v8  ;;  %v10852_v34 = vld [vmem:[%s12801_s2 + $0x90] ss:$12 sps:$4 sm:$0xff]   ;;  %v9612_v8 = vld [vmem:[%s12802_s3 + $0x20] ss:$12 sps:$4 sm:$0xff]  }
 0x294   :  { %1934 = vmatprep.subr.bf16.mxu0 %v10542_v40  ;;  %9060 = vmatprep.subr.bf16.mxu1 %v12808_v2  ;;  %v9560_v40 = vld [vmem:[%s12801_s2 + $0x98] ss:$12 sps:$4 sm:$0xff]  }
 0x297   :  { %1935 = vmatpush1.bf16.msra.mxu0 %v10548_v43  ;;  %9061 = vmatpush3.bf16.msra.mxu1 %v9552_v19  ;;  %v10862_v43 = vld [vmem:[%s12801_s2 + $0x7c] ss:$12 sps:$4 sm:$0xff]  }
 0x298   :  { %2211 = vmatprep.subr.bf16.mxu0 %v10823_v20  ;;  %9066 = vmatprep.subr.bf16.mxu1 %v12808_v2 }
 0x29a   :  { %1953 = vmatmul.mubr.bf16.vlgmr.msra.gmra.mxu0 %v1759_v26  ;;  %9063 = vmatmul.mubr.bf16.vlgmr.msra.gmra.mxu1 %v1759_v26  ;;  %v11083_v26 = vld [vmem:[%s12802_s3 + $0x4] ss:$12 sps:$4 sm:$0xff]  }
 0x29b   :  { %2212 = vmatpush1.bf16.msra.mxu0 %v10834_v23  ;;  %9067 = vmatpush3.bf16.msra.mxu1 %v9556_v24 }
 0x29c   :  { %2213 = vmatprep.subr.bf16.mxu0 %v10846_v31  ;;  %9068 = vmatprep.subr.bf16.mxu1 %v12808_v2 }
 0x29d   :  { %2243 = vmatprep.mubr.bf16.mxu0 %v12806_v3  ;;  %9082 = vmatprep.mubr.msk.bf16.mxu1 %vm10098_vm0, %v12808_v2 }
 0x29f   :  { %2214 = vmatpush1.bf16.msra.mxu0 %v10852_v34  ;;  %9069 = vmatpush3.bf16.msra.mxu1 %v9560_v40 }
 0x2a0   :  { %2215 = vmatprep.subr.bf16.mxu0 %v10862_v43  ;;  %9070 = vmatprep.subr.bf16.mxu1 %v12808_v2 }
 0x2a3   :  { %2216 = vmatpush1.bf16.msra.mxu0 %v10871_v52  ;;  %9071 = vmatpush3.bf16.msra.mxu1 %v9564_v54 }
 0x2a4   :  { %2217 = vmatprep.subr.bf16.mxu0 %v10881_v55  ;;  %9072 = vmatprep.subr.bf16.mxu1 %v12808_v2 }
 0x2a7   :  { %2218 = vmatpush1.bf16.msra.mxu0 %v10887_v59  ;;  %9073 = vmatpush3.bf16.msra.mxu1 %v9568_v10  ;;  %v11089_v10 = vld [vmem:[%s12802_s3] ss:$12 sps:$4 sm:$0xff]  }
 0x2a8   :  { %2219 = vmatprep.subr.bf16.mxu0 %v10897_v60  ;;  %9074 = vmatprep.subr.bf16.mxu1 %v12808_v2  ;;  %12835 = vst [vmem:[#allocation8_spill] sm:$0xff] %v11089_v10 }
 0x2ab   :  { %2220 = vmatpush1.bf16.msra.mxu0 %v10903_v32  ;;  %9075 = vmatpush3.bf16.msra.mxu1 %v9572_v33  ;;  %v9616_v33 = vld [vmem:[%s12802_s3 + $0x8] ss:$12 sps:$4 sm:$0xff]  }
 0x2ac   :  { %2221 = vmatprep.subr.bf16.mxu0 %v10913_v13  ;;  %9076 = vmatprep.subr.bf16.mxu1 %v12808_v2 }
 0x2af   :  { %2222 = vmatpush1.bf16.msra.mxu0 %v10919_v35  ;;  %9077 = vmatpush3.bf16.msra.mxu1 %v9576_v12 }
 0x2b0   :  { %2223 = vmatprep.subr.bf16.mxu0 %v10929_v36  ;;  %9078 = vmatprep.subr.bf16.mxu1 %v12808_v2 }
 0x2b3   :  { %2224 = vmatpush1.bf16.msra.mxu0 %v10935_v38  ;;  %9079 = vmatpush3.bf16.msra.mxu1 %v9580_v44 }
 0x2b4   :  { %2225 = vmatprep.subr.bf16.mxu0 %v10945_v45  ;;  %9080 = vmatprep.subr.bf16.mxu1 %v12808_v2 }
 0x2b7   :  { %2226 = vmatpush1.bf16.msra.mxu0 %v10951_v48  ;;  %9081 = vmatpush3.bf16.msra.mxu1 %v9584_v49  ;;  %v11099_v49 = vld [vmem:[%s12801_s2 + $0x16c] ss:$12 sps:$4 sm:$0xff]  }
 0x2b8   :  { %9086 = vmatprep.subr.bf16.mxu1 %v12808_v2  ;;  %2641 = vmatprep.subr.bf16.mxu0 %v10973_v62  ;;  %12836 = vst [vmem:[#allocation9_spill] sm:$0xff] %v11099_v49 }
 0x2ba   :  { %2244 = vmatmul.mubr.bf16.vlgmr.msra.gmra.mxu0 %v2050_v51  ;;  %9083 = vmatmul.mubr.bf16.vlgmr.msra.gmra.mxu1 %v2050_v51 }
 0x2bb   :  { %2673 = vmatprep.mubr.bf16.mxu0 %v12806_v3  ;;  %9102 = vmatprep.mubr.msk.bf16.mxu1 %vm10098_vm0, %v12808_v2 }
 0x2bc   :  { %2642 = vmatpush1.bf16.msra.mxu0 %v10978_v42  ;;  %9087 = vmatpush3.bf16.msra.mxu1 %v9588_v1 }
 0x2bd   :  { %9088 = vmatprep.subr.bf16.mxu1 %v12808_v2  ;;  %2643 = vmatprep.subr.bf16.mxu0 %v10988_v56 }
 0x2c0   :  { %2644 = vmatpush1.bf16.msra.mxu0 %v10994_v61  ;;  %9089 = vmatpush3.bf16.msra.mxu1 %v9592_v9 }
 0x2c1   :  { %9090 = vmatprep.subr.bf16.mxu1 %v12808_v2  ;;  %2645 = vmatprep.subr.bf16.mxu0 %v11004_v11 }
 0x2c4   :  { %2646 = vmatpush1.bf16.msra.mxu0 %v11010_v53  ;;  %9091 = vmatpush3.bf16.msra.mxu1 %v9596_v7 }
 0x2c5   :  { %9092 = vmatprep.subr.bf16.mxu1 %v12808_v2  ;;  %2647 = vmatprep.subr.bf16.mxu0 %v11020_v57 }
 0x2c8   :  { %2648 = vmatpush1.bf16.msra.mxu0 %v11026_v16  ;;  %9093 = vmatpush3.bf16.msra.mxu1 %v9600_v58 }
 0x2c9   :  { %9094 = vmatprep.subr.bf16.mxu1 %v12808_v2  ;;  %2649 = vmatprep.subr.bf16.mxu0 %v11036_v18 }
 0x2cc   :  { %2650 = vmatpush1.bf16.msra.mxu0 %v11042_v21  ;;  %9095 = vmatpush3.bf16.msra.mxu1 %v9604_v39 }
 0x2cd   :  { %9096 = vmatprep.subr.bf16.mxu1 %v12808_v2  ;;  %2651 = vmatprep.subr.bf16.mxu0 %v11052_v28 }
 0x2d0   :  { %2652 = vmatpush1.bf16.msra.mxu0 %v11058_v37  ;;  %9097 = vmatpush3.bf16.msra.mxu1 %v9608_v46 }
 0x2d1   :  { %2653 = vmatprep.subr.bf16.mxu0 %v11067_v15  ;;  %9098 = vmatprep.subr.bf16.mxu1 %v12808_v2 }
 0x2d4   :  { %2654 = vmatpush1.bf16.msra.mxu0 %v11073_v17  ;;  %9099 = vmatpush3.bf16.msra.mxu1 %v9612_v8 }
 0x2d5   :  { %2655 = vmatprep.subr.bf16.mxu0 %v11083_v26  ;;  %9100 = vmatprep.subr.bf16.mxu1 %v12808_v2 }
 0x2d8   :  { %2656 = vmatpush1.bf16.msra.mxu0 %v11089_v10  ;;  %9101 = vmatpush3.bf16.msra.mxu1 %v9616_v33 }
 0x2d9   :  { %2883 = vmatprep.subr.bf16.mxu0 %v11099_v49  ;;  %9106 = vmatprep.subr.bf16.mxu1 %v12808_v2 }
 0x33a   :  { %v1712_v6 = vpop.f32.mrf.mxu0  ;;  %v1753_v14 = vpop.f32.mrf.mxu1 }
 0x33b   :  { %v1713_v9 = vadd.f32 %v1712_v6, %v10711_v4 }
 0x33c   :  { %v1714_v19 = vpop.f32.mrf.mxu0  ;;  %v9044_v24 = vpop.f32.mrf.mxu1 }
 0x33e   :  { %v1716_v40 = vpop.f32.mrf.mxu0  ;;  %v1756_v54 = vpop.f32.mrf.mxu1 }
 0x340   :  { %v1717_v12 = vpop.f32.mrf.mxu0  ;;  %v9045_v44 = vpop.f32.mrf.mxu1 }
 0x341   :  { %v1715_v44 = vadd.f32 %v1714_v19, %v10724_v30 }
 0x35a   :  { %v1954_v51 = vpop.f32.mrf.mxu0  ;;  %v1995_v1 = vpop.f32.mrf.mxu1 }
 0x35b   :  { %v1955_v7 = vadd.f32 %v1954_v51, %v10714_v5  ;;  %v1996_v6 = vadd.f32 %v1995_v1, %v10732_v41 }
 0x35c   :  { %v1956_v58 = vpop.f32.mrf.mxu0  ;;  %v9064_v39 = vpop.f32.mrf.mxu1 }
 0x35d   :  { %v2001_v46 = vadd.f32 %v1955_v7, %v1713_v9  ;;  %v1957_v33 = vadd.f32 %v1956_v58, %v10722_v29  ;;  %v1754_v9 = vadd.f32 %v1753_v14, %v10734_v47 }
 0x35e   :  { %v1958_v8 = vpop.f32.mrf.mxu0  ;;  %v1998_v24 = vpop.f32.mrf.mxu1 }
 0x35f   :  { %v2002_v40 = vmul.f32 0.5, %v2001_v46  ;;  %v2006_v3 = vadd.f32 %v1957_v33, %v1715_v44 }
 0x360   :  { %v1959_v54 = vpop.f32.mrf.mxu0  ;;  %v9065_v12 = vpop.f32.mrf.mxu1 }
 0x361   :  { %9943 = vtanh.f32 %v2002_v40  ;;  %v2007_v2 = vmul.f32 0.5, %v2006_v3  ;;  %v8065_v54 = vld [vmem:[%s12799_s0 + $0x1a] ss:$8 sm:$0x7] }
 0x363   :  { %9945 = vtanh.f32 %v2007_v2 }
 0x36e   :  { %v9944_v49 = vpop.eup %9943 }
 0x36f   :  { %v2004_v10 = vadd.f32 1.0, %v9944_v49  ;;  %v8064_v49 = vld [vmem:[%s12799_s0 + $0x2] ss:$8 sm:$0x7] }
 0x370   :  { %v9946_v3 = vpop.eup %9945 }
 0x371   :  { %v2005_v51 = vmul.f32 0.5, %v2004_v10  ;;  %v2009_v44 = vadd.f32 1.0, %v9946_v3 }
 0x373   :  { %v2011_v7 = vmul.f32 %v2005_v51, %v1996_v6 }
 0x375   :  { %v2012_v39 = vadd.f32 %v2011_v7, %v1754_v9 }
 0x377   :  { %9947 = vtanh.f32 %v2012_v39 }
 0x37a   :  { %v2245_v46 = vpop.f32.mrf.mxu0  ;;  %v2286_v8 = vpop.f32.mrf.mxu1 }
 0x37b   :  { %v2246_v24 = vadd.f32 %v2245_v46, %v10384_v63  ;;  %v2010_v46 = vmul.f32 0.5, %v2009_v44 }
 0x37c   :  { %v2247_v58 = vpop.f32.mrf.mxu0  ;;  %v9084_v40 = vpop.f32.mrf.mxu1 }
 0x37d   :  { %v2299_v19 = vrot.slane %v2246_v24, %v10387_v0 }
 0x37e   :  { %v2249_v10 = vpop.f32.mrf.mxu0  ;;  %v2289_v2 = vpop.f32.mrf.mxu1 }
 0x37f   :  { %v2300_v1 = vcombine.high %v2299_v19, %v2299_v19  ;;  %v2307_v14 = vrot.slane %v2299_v19, %v10387_v0  ;;  %v2287_v2 = vadd.f32 %v2286_v8, %v10406_v25 }
 0x380   :  { %v2250_v12 = vpop.f32.mrf.mxu0  ;;  %v9085_v33 = vpop.f32.mrf.mxu1 }
 0x381   :  { %v2314_v6 = vrot.slane %v2300_v1, %v10387_v0  ;;  %v2317_v51 = vadd.f32 %v8064_v49, %v2307_v14  ;;  %v2248_v1 = vadd.f32 %v2247_v58, %v10409_v27 }
 0x383   :  { %v2318_v9 = vadd.f32 %v8065_v54, %v2314_v6  ;;  %v2319_v7 = vmul.f32 0.5, %v2317_v51  ;;  %v2340_v12 = vrot.slane %v2248_v1, %v10387_v0 }
 0x384   :  { %v9948_v39 = vpop.eup %9947 }
 0x385   :  { %v2014_v24 = vsub.f32 %v10828_v22, %v9948_v39  ;;  %v2320_v40 = vmul.f32 0.5, %v2318_v9  ;;  %9949 = vtanh.f32 %v2319_v7  ;;  %v2375_v22 = vrot.slane %v2287_v2, %v10387_v0 }
 0x386   :  { %v2341_v51 = vcombine.high %v2340_v12, %v2340_v12  ;;  %v2395_v7 = vrot.slane %v8064_v49, 2  ;;  %v2348_v58 = vrot.slane %v2340_v12, %v10387_v0 }
 0x387   :  { %v2015_v10 = vmul.f32 %v2014_v24, %v2010_v46  ;;  %9951 = vtanh.f32 %v2320_v40  ;;  %v2376_v6 = vcombine.high %v2375_v22, %v2375_v22  ;;  %v2383_v8 = vrot.slane %v2375_v22, %v10387_v0 }
 0x388   :  { %v2396_v40 = vrot.slane %v8065_v54, 2  ;;  %v2355_v1 = vrot.slane %v2341_v51, %v10387_v0 }
 0x389   :  { %v2016_v19 = vadd.f32 %v9948_v39, %v2015_v10  ;;  %v2329_v39 = vrot.slane %v8064_v49, 1  ;;  %v2330_v10 = vrot.slane %v8065_v54, 1 }
 0x38b   :  { %8061 = vst [vmem:[%s12805_s6 + $0x2] sm:$0x3] %v2016_v19  ;;  %v2025_v3 = vrot.slane %v2016_v19, %v10387_v0  ;;  %v2358_v27 = vadd.f32 %v2348_v58, %v2329_v39  ;;  %v2359_v63 = vadd.f32 %v2355_v1, %v2330_v10 }
 0x38d   :  { %v2026_v14 = vcombine.high %v2025_v3, %v2025_v3  ;;  %8062 = vst.sshfl [vmem:[#allocation2 + $0x1] sm:$0x1 pattern:$0x73625140] %v2025_v3  ;;  %v2390_v3 = vrot.slane %v2376_v6, %v10387_v0  ;;  %v2360_v49 = vmul.f32 0.5, %v2358_v27 }
 0x38f   :  { %8063 = vst.sshfl [vmem:[#allocation2 + $0x9] sm:$0x1 pattern:$0x73625140] %v2026_v14 }
 0x392   :  { %v9950_v33 = vpop.eup %9949 }
 0x393   :  { %v2323_v44 = vadd.f32 1.0, %v9950_v33 }
 0x394   :  { %v9952_v9 = vpop.eup %9951 }
 0x395   :  { %v2324_v46 = vadd.f32 1.0, %v9952_v9  ;;  %v2325_v24 = vmul.f32 0.5, %v2323_v44  ;;  %v2361_v44 = vmul.f32 0.5, %v2359_v63 }
 0x397   :  { %v2326_v19 = vmul.f32 0.5, %v2324_v46  ;;  %v2393_v2 = vmul.f32 %v2383_v8, %v2325_v24 }
 0x399   :  { %v2394_v14 = vmul.f32 %v2390_v3, %v2326_v19  ;;  %v2399_v33 = vadd.f32 %v2395_v7, %v2393_v2 }
 0x39b   :  { %v2400_v25 = vadd.f32 %v2396_v40, %v2394_v14  ;;  %9953 = vtanh.f32 %v2399_v33 }
 0x39d   :  { %9955 = vtanh.f32 %v2400_v25 }
 0x39e   :  { %9957 = vtanh.f32 %v2360_v49 }
 0x39f   :  { %9959 = vtanh.f32 %v2361_v44 }
 0x3a8   :  { %v9954_v22 = vpop.eup %9953 }
 0x3aa   :  { %v9956_v12 = vpop.eup %9955 }
 0x3ab   :  { %v2405_v54 = vcombine.low %v9954_v22, %v9956_v12  ;;  %v9958_v6 = vpop.eup %9957 }
 0x3ac   :  { %v9960_v51 = vpop.eup %9959  ;;  %v2364_v24 = vadd.f32 1.0, %v9958_v6 }
 0x3ad   :  { %v2412_v9 = vrot.slane %v2405_v54, %v10387_v0  ;;  %v2365_v39 = vadd.f32 1.0, %v9960_v51  ;;  %v11161_v51 = vld [vmem:[%s12801_s2 + $0x150] ss:$12 sps:$4 sm:$0xff]  }
 0x3ae   :  { %v2366_v25 = vmul.f32 0.5, %v2364_v24  ;;  %v9624_v24 = vld [vmem:[%s12801_s2 + $0x158] ss:$12 sps:$4 sm:$0xff]  }
 0x3af   :  { %v2419_v46 = vrot.slane %v2412_v9, %v10387_v0  ;;  %v2367_v58 = vmul.f32 0.5, %v2365_v39  ;;  %v11146_v9 = vld [vmem:[%s12801_s2 + $0x168] ss:$12 sps:$4 sm:$0xff]  }
 0x3b0   :  { %v11171_v39 = vld [vmem:[%s12801_s2 + $0x13c] ss:$12 sps:$4 sm:$0xff]  }
 0x3b1   :  { %v2421_v7 = vsub.f32 %v10961_v50, %v2419_v46  ;;  %v11155_v46 = vld [vmem:[%s12801_s2 + $0x154] ss:$12 sps:$4 sm:$0xff]  }
 0x3b3   :  { %v2429_v8 = vrot.slane %v2421_v7, %v10387_v0  ;;  %v12837_v7 = vmov 0.0  }
 0x3b5   :  { %v2430_v27 = vcombine.high %v2429_v8, %v2429_v8  ;;  %v2437_v63 = vrot.slane %v2429_v8, %v10387_v0  ;;  %v12838_v8 = vmov 0  }
 0x3b7   :  { %v2444_v40 = vrot.slane %v2430_v27, %v10387_v0  ;;  %v2447_v10 = vmul.f32 %v2437_v63, %v2366_v25  ;;  %v11180_v25 = vld [vmem:[%s12801_s2 + $0x138] ss:$12 sps:$4 sm:$0xff]   ;;  %v9628_v27 = vld [vmem:[%s12801_s2 + $0x140] ss:$12 sps:$4 sm:$0xff]  }
 0x3b8   :  { %v11190_v63 = vld [vmem:[%s12801_s2 + $0x124] ss:$12 sps:$4 sm:$0xff]  }
 0x3b9   :  { %v2448_v19 = vmul.f32 %v2444_v40, %v2367_v58  ;;  %v2449_v3 = vadd.f32 %v9954_v22, %v2447_v10  ;;  %v11196_v58 = vld [vmem:[%s12801_s2 + $0x120] ss:$12 sps:$4 sm:$0xff]   ;;  %v9632_v40 = vld [vmem:[%s12801_s2 + $0x128] ss:$12 sps:$4 sm:$0xff]  }
 0x3ba   :  { %v11206_v10 = vld [vmem:[%s12801_s2 + $0x10c] ss:$12 sps:$4 sm:$0xff]  }
 0x3bb   :  { %v2450_v2 = vadd.f32 %v9956_v12, %v2448_v19  ;;  %v2471_v14 = vpack.c.bf16 %v2449_v3, %v2449_v3  ;;  %v9620_v12 = vld [vmem:[%s12801_s2 + $0x170] ss:$12 sps:$4 sm:$0xff]   ;;  %v11212_v19 = vld [vmem:[%s12801_s2 + $0x108] ss:$12 sps:$4 sm:$0xff]  }
 0x3bd   :  { %v2453_v1 = vcombine.low %v2449_v3, %v2450_v2  ;;  %v2472_v33 = vpack.c.bf16 %v2450_v2, %v2450_v2  ;;  %v2507_v44 = vunpack.c.l.b16 %v2471_v14  ;;  %v9636_v3 = vld [vmem:[%s12801_s2 + $0x110] ss:$12 sps:$4 sm:$0xff]   ;;  %v11222_v2 = vld [vmem:[%s12801_s2 + $0xf4] ss:$12 sps:$4 sm:$0xff]   ;;  %v9640_v14 = vld [vmem:[%s12801_s2 + $0xf8] ss:$12 sps:$4 sm:$0xff]  }
 0x3bf   :  { %v2460_v49 = vrot.slane %v2453_v1, %v10387_v0  ;;  %v2508_v50 = vunpack.c.l.b16 %v2472_v33  ;;  %v11228_v1 = vld [vmem:[%s12801_s2 + $0xf0] ss:$12 sps:$4 sm:$0xff]  }
 0x3c0   :  { %v11238_v33 = vld [vmem:[%s12801_s2 + $0xdc] ss:$12 sps:$4 sm:$0xff]  }
 0x3c1   :  { %8090 = vst.sshfl [vmem:[%s12805_s6] sm:$0x5 pattern:$0x73625140] %v2460_v49  ;;  %v2509_v54 = vrot.slane %v2508_v50, 7  ;;  %v11244_v49 = vld [vmem:[%s12801_s2 + $0xd8] ss:$12 sps:$4 sm:$0xff]  }
 0x3c2   :  { %v9644_v50 = vld [vmem:[%s12801_s2 + $0xe0] ss:$12 sps:$4 sm:$0xff]  }
 0x3c3   :  { %v2510_v22 = vsel %vm555_vm1, %v2509_v54, %v2507_v44  ;;  %v11254_v44 = vld [vmem:[%s12801_s2 + $0xc4] ss:$12 sps:$4 sm:$0xff]   ;;  %v11260_v54 = vld [vmem:[%s12801_s2 + $0xc0] ss:$12 sps:$4 sm:$0xff]  }
 0x3c4   :  { %v2511_v6 = vpack.c.b16 %v2510_v22, %v2510_v22  ;;  %v9648_v22 = vld [vmem:[%s12801_s2 + $0xc8] ss:$12 sps:$4 sm:$0xff]  }
 0x3c6   :  { %2674 = vmatmul.mubr.bf16.vlgmr.msra.gmra.mxu0 %v2511_v6  ;;  %9103 = vmatmul.mubr.bf16.vlgmr.msra.gmra.mxu1 %v2511_v6  ;;  %v9649_v6 = vld [vmem:[%s12801_s2 + $0xb0] ss:$12 sps:$4 sm:$0xff]  }
 0x3c7   :  { %2884 = vmatpush1.bf16.msra.mxu0 %v11146_v9  ;;  %9107 = vmatpush3.bf16.msra.mxu1 %v9620_v12  ;;  %v11270_v12 = vld [vmem:[%s12805_s6 + $0x2] sm:$0x3] }
 0x3c8   :  { %2885 = vmatprep.subr.bf16.mxu0 %v11155_v46  ;;  %9108 = vmatprep.subr.bf16.mxu1 %v12837_v7 }
 0x3c9   :  { %2915 = vmatprep.mubr.bf16.mxu0 %v12838_v8  ;;  %9122 = vmatprep.mubr.msk.bf16.mxu1 %vm10098_vm0, %v12837_v7 }
 0x3cb   :  { %2886 = vmatpush1.bf16.msra.mxu0 %v11161_v51  ;;  %9109 = vmatpush3.bf16.msra.mxu1 %v9624_v24  ;;  %v2722_v24 = vpack.c.bf16 %v11270_v12, %v11270_v12 }
 0x3cc   :  { %2887 = vmatprep.subr.bf16.mxu0 %v11171_v39  ;;  %9110 = vmatprep.subr.bf16.mxu1 %v12837_v7 }
 0x3cf   :  { %2888 = vmatpush1.bf16.msra.mxu0 %v11180_v25  ;;  %9111 = vmatpush3.bf16.msra.mxu1 %v9628_v27  ;;  %v9650_v27 = vld [vmem:[%s12801_s2 + $0x98] ss:$12 sps:$4 sm:$0xff]  }
 0x3d0   :  { %2889 = vmatprep.subr.bf16.mxu0 %v11190_v63  ;;  %9112 = vmatprep.subr.bf16.mxu1 %v12837_v7 }
 0x3d3   :  { %2890 = vmatpush1.bf16.msra.mxu0 %v11196_v58  ;;  %9113 = vmatpush3.bf16.msra.mxu1 %v9632_v40 }
 0x3d4   :  { %2891 = vmatprep.subr.bf16.mxu0 %v11206_v10  ;;  %9114 = vmatprep.subr.bf16.mxu1 %v12837_v7 }
 0x3d7   :  { %2892 = vmatpush1.bf16.msra.mxu0 %v11212_v19  ;;  %9115 = vmatpush3.bf16.msra.mxu1 %v9636_v3 }
 0x3d8   :  { %2893 = vmatprep.subr.bf16.mxu0 %v11222_v2  ;;  %9116 = vmatprep.subr.bf16.mxu1 %v12837_v7 }
 0x3db   :  { %2894 = vmatpush1.bf16.msra.mxu0 %v11228_v1  ;;  %9117 = vmatpush3.bf16.msra.mxu1 %v9640_v14 }
 0x3dc   :  { %2895 = vmatprep.subr.bf16.mxu0 %v11238_v33  ;;  %9118 = vmatprep.subr.bf16.mxu1 %v12837_v7 }
 0x3df   :  { %2896 = vmatpush1.bf16.msra.mxu0 %v11244_v49  ;;  %9119 = vmatpush3.bf16.msra.mxu1 %v9644_v50 }
 0x3e0   :  { %2897 = vmatprep.subr.bf16.mxu0 %v11254_v44  ;;  %9120 = vmatprep.subr.bf16.mxu1 %v12837_v7 }
 0x3e3   :  { %2898 = vmatpush1.bf16.msra.mxu0 %v11260_v54  ;;  %9121 = vmatpush3.bf16.msra.mxu1 %v9648_v22 }
 0x3e4   :  { %3174 = vmatprep.subr.bf16.mxu0 %v10823_v20  ;;  %9126 = vmatprep.subr.bf16.mxu1 %v12837_v7  ;;  %v9651_v20 = vld [vmem:[%s12801_s2 + $0x80] ss:$12 sps:$4 sm:$0xff]  }
 0x3e6   :  { %2916 = vmatmul.mubr.bf16.vlgmr.msra.gmra.mxu0 %v2722_v24  ;;  %9123 = vmatmul.mubr.bf16.vlgmr.msra.gmra.mxu1 %v2722_v24 }
 0x3e7   :  { %3175 = vmatpush1.bf16.msra.mxu0 %v10834_v23  ;;  %9127 = vmatpush3.bf16.msra.mxu1 %v9649_v6  ;;  %v9652_v23 = vld [vmem:[%s12801_s2 + $0x68] ss:$12 sps:$4 sm:$0xff]  }
 0x3e8   :  { %3176 = vmatprep.subr.bf16.mxu0 %v10846_v31  ;;  %9128 = vmatprep.subr.bf16.mxu1 %v12837_v7  ;;  %v9653_v31 = vld [vmem:[%s12801_s2 + $0x50] ss:$12 sps:$4 sm:$0xff]  }
 0x3e9   :  { %3206 = vmatprep.mubr.bf16.mxu0 %v12838_v8  ;;  %9142 = vmatprep.mubr.msk.bf16.mxu1 %vm10098_vm0, %v12837_v7 }
 0x3eb   :  { %3177 = vmatpush1.bf16.msra.mxu0 %v10852_v34  ;;  %9129 = vmatpush3.bf16.msra.mxu1 %v9650_v27  ;;  %v9654_v34 = vld [vmem:[%s12801_s2 + $0x38] ss:$12 sps:$4 sm:$0xff]  }
 0x3ec   :  { %3178 = vmatprep.subr.bf16.mxu0 %v10862_v43  ;;  %9130 = vmatprep.subr.bf16.mxu1 %v12837_v7  ;;  %v9655_v43 = vld [vmem:[%s12801_s2 + $0x20] ss:$12 sps:$4 sm:$0xff]  }
 0x3ef   :  { %3179 = vmatpush1.bf16.msra.mxu0 %v10871_v52  ;;  %9131 = vmatpush3.bf16.msra.mxu1 %v9651_v20  ;;  %v9656_v52 = vld [vmem:[%s12801_s2 + $0x8] ss:$12 sps:$4 sm:$0xff]  }
 0x3f0   :  { %3180 = vmatprep.subr.bf16.mxu0 %v10881_v55  ;;  %9132 = vmatprep.subr.bf16.mxu1 %v12837_v7  ;;  %v11328_v55 = vld [vmem:[%s12805_s6] sm:$0x3] }
 0x3f3   :  { %3181 = vmatpush1.bf16.msra.mxu0 %v10887_v59  ;;  %9133 = vmatpush3.bf16.msra.mxu1 %v9652_v23  ;;  %v3013_v59 = vpack.c.bf16 %v11328_v55, %v11328_v55 }
 0x3f4   :  { %3182 = vmatprep.subr.bf16.mxu0 %v10897_v60  ;;  %9134 = vmatprep.subr.bf16.mxu1 %v12837_v7  ;;  %v12839_v60 = vld [vmem:[#allocation8_spill] sm:$0xff] }
 0x3f7   :  { %3183 = vmatpush1.bf16.msra.mxu0 %v10903_v32  ;;  %9135 = vmatpush3.bf16.msra.mxu1 %v9653_v31  ;;  %v12840_v32 = vld [vmem:[#allocation9_spill] sm:$0xff] }
 0x3f8   :  { %3184 = vmatprep.subr.bf16.mxu0 %v10913_v13  ;;  %9136 = vmatprep.subr.bf16.mxu1 %v12837_v7  ;;  %v9657_v13 = vld [vmem:[%s12802_s3 + $0xb0] ss:$12 sps:$4 sm:$0xff]  }
 0x3fb   :  { %3185 = vmatpush1.bf16.msra.mxu0 %v10919_v35  ;;  %9137 = vmatpush3.bf16.msra.mxu1 %v9654_v34  ;;  %v9658_v35 = vld [vmem:[%s12802_s3 + $0x98] ss:$12 sps:$4 sm:$0xff]  }
 0x3fc   :  { %3186 = vmatprep.subr.bf16.mxu0 %v10929_v36  ;;  %9138 = vmatprep.subr.bf16.mxu1 %v12837_v7  ;;  %v9659_v36 = vld [vmem:[%s12802_s3 + $0x80] ss:$12 sps:$4 sm:$0xff]  }
 0x3ff   :  { %3187 = vmatpush1.bf16.msra.mxu0 %v10935_v38  ;;  %9139 = vmatpush3.bf16.msra.mxu1 %v9655_v43  ;;  %v9660_v38 = vld [vmem:[%s12802_s3 + $0x68] ss:$12 sps:$4 sm:$0xff]  }
 0x400   :  { %3188 = vmatprep.subr.bf16.mxu0 %v10945_v45  ;;  %9140 = vmatprep.subr.bf16.mxu1 %v12837_v7  ;;  %v9661_v45 = vld [vmem:[%s12802_s3 + $0x50] ss:$12 sps:$4 sm:$0xff]  }
 0x403   :  { %3189 = vmatpush1.bf16.msra.mxu0 %v10951_v48  ;;  %9141 = vmatpush3.bf16.msra.mxu1 %v9656_v52  ;;  %v9662_v48 = vld [vmem:[%s12802_s3 + $0x38] ss:$12 sps:$4 sm:$0xff]  }
 0x404   :  { %3604 = vmatprep.subr.bf16.mxu0 %v10973_v62  ;;  %9146 = vmatprep.subr.bf16.mxu1 %v12837_v7 }
 0x406   :  { %3207 = vmatmul.mubr.bf16.vlgmr.msra.gmra.mxu0 %v3013_v59  ;;  %9143 = vmatmul.mubr.bf16.vlgmr.msra.gmra.mxu1 %v3013_v59 }
 0x407   :  { %3605 = vmatpush1.bf16.msra.mxu0 %v10978_v42  ;;  %3636 = vmatprep.mubr.bf16.mxu0 %v12838_v8 }
 0x408   :  { %3606 = vmatprep.subr.bf16.mxu0 %v10988_v56  ;;  %9162 = vmatprep.mubr.msk.bf16.mxu1 %vm10098_vm0, %v12837_v7  ;;  %v9663_v56 = vld [vmem:[%s12802_s3 + $0x20] ss:$12 sps:$4 sm:$0xff]  }
 0x409   :  { %9147 = vmatpush3.bf16.msra.mxu1 %v9657_v13 }
 0x40a   :  { %9148 = vmatprep.subr.bf16.mxu1 %v12837_v7 }
 0x40b   :  { %3607 = vmatpush1.bf16.msra.mxu0 %v10994_v61 }
 0x40c   :  { %3608 = vmatprep.subr.bf16.mxu0 %v11004_v11 }
 0x40d   :  { %9149 = vmatpush3.bf16.msra.mxu1 %v9658_v35 }
 0x40e   :  { %9150 = vmatprep.subr.bf16.mxu1 %v12837_v7 }
 0x40f   :  { %3609 = vmatpush1.bf16.msra.mxu0 %v11010_v53 }
 0x410   :  { %3610 = vmatprep.subr.bf16.mxu0 %v11020_v57 }
 0x411   :  { %9151 = vmatpush3.bf16.msra.mxu1 %v9659_v36 }
 0x412   :  { %9152 = vmatprep.subr.bf16.mxu1 %v12837_v7 }
 0x413   :  { %3611 = vmatpush1.bf16.msra.mxu0 %v11026_v16  ;;  %v9664_v16 = vld [vmem:[%s12802_s3 + $0x8] ss:$12 sps:$4 sm:$0xff]  }
 0x414   :  { %3612 = vmatprep.subr.bf16.mxu0 %v11036_v18 }
 0x415   :  { %9153 = vmatpush3.bf16.msra.mxu1 %v9660_v38  ;;  %v12841_v38 = vld [vmem:[#allocation5_spill] sm:$0xff] }
 0x416   :  { %9154 = vmatprep.subr.bf16.mxu1 %v12837_v7 }
 0x417   :  { %3613 = vmatpush1.bf16.msra.mxu0 %v11042_v21 }
 0x418   :  { %3614 = vmatprep.subr.bf16.mxu0 %v11052_v28 }
 0x419   :  { %9155 = vmatpush3.bf16.msra.mxu1 %v9661_v45 }
 0x41a   :  { %9156 = vmatprep.subr.bf16.mxu1 %v12837_v7 }
 0x41b   :  { %3615 = vmatpush1.bf16.msra.mxu0 %v11058_v37 }
 0x41c   :  { %3616 = vmatprep.subr.bf16.mxu0 %v11067_v15 }
 0x41d   :  { %9157 = vmatpush3.bf16.msra.mxu1 %v9662_v48 }
 0x41e   :  { %9158 = vmatprep.subr.bf16.mxu1 %v12837_v7 }
 0x41f   :  { %3617 = vmatpush1.bf16.msra.mxu0 %v11073_v17 }
 0x420   :  { %3618 = vmatprep.subr.bf16.mxu0 %v11083_v26 }
 0x421   :  { %9159 = vmatpush3.bf16.msra.mxu1 %v9663_v56 }
 0x422   :  { %9160 = vmatprep.subr.bf16.mxu1 %v12837_v7 }
 0x423   :  { %3619 = vmatpush1.bf16.msra.mxu0 %v12839_v60 }
 0x424   :  { %3846 = vmatprep.subr.bf16.mxu0 %v12840_v32 }
 0x425   :  { %9161 = vmatpush3.bf16.msra.mxu1 %v9664_v16 }
 0x426   :  { %9166 = vmatprep.subr.bf16.mxu1 %v12837_v7 }
 0x486   :  { %v2675_v62 = vpop.f32.mrf.mxu0  ;;  %v2716_v42 = vpop.f32.mrf.mxu1 }
 0x487   :  { %v2676_v15 = vadd.f32 %v2675_v62, %v10711_v4  ;;  %v2717_v60 = vadd.f32 %v2716_v42, %v10734_v47 }
 0x488   :  { %v2677_v61 = vpop.f32.mrf.mxu0  ;;  %v9104_v11 = vpop.f32.mrf.mxu1 }
 0x489   :  { %v2678_v20 = vadd.f32 %v2677_v61, %v10724_v30  ;;  %v8175_v11 = vld [vmem:[%s12799_s0 + $0x3] ss:$8 sm:$0x7] }
 0x48a   :  { %v2679_v53 = vpop.f32.mrf.mxu0  ;;  %v2719_v57 = vpop.f32.mrf.mxu1 }
 0x48c   :  { %v2680_v18 = vpop.f32.mrf.mxu0  ;;  %v9105_v21 = vpop.f32.mrf.mxu1 }
 0x48d   :  { %v8176_v18 = vld [vmem:[%s12799_s0 + $0x1b] ss:$8 sm:$0x7] }
 0x4a6   :  { %v2917_v28 = vpop.f32.mrf.mxu0  ;;  %v2958_v37 = vpop.f32.mrf.mxu1 }
 0x4a7   :  { %v2918_v17 = vadd.f32 %v2917_v28, %v10714_v5  ;;  %v2959_v52 = vadd.f32 %v2958_v37, %v10732_v41 }
 0x4a8   :  { %v2919_v26 = vpop.f32.mrf.mxu0  ;;  %v9124_v40 = vpop.f32.mrf.mxu1 }
 0x4a9   :  { %v2964_v3 = vadd.f32 %v2918_v17, %v2676_v15  ;;  %v2920_v27 = vadd.f32 %v2919_v26, %v10722_v29 }
 0x4aa   :  { %v2921_v14 = vpop.f32.mrf.mxu0  ;;  %v2961_v50 = vpop.f32.mrf.mxu1 }
 0x4ab   :  { %v2965_v22 = vmul.f32 0.5, %v2964_v3  ;;  %v2969_v23 = vadd.f32 %v2920_v27, %v2678_v20  ;;  %v12842_v20 = vld [vmem:[#allocation6_spill] sm:$0xff] }
 0x4ac   :  { %v2922_v6 = vpop.f32.mrf.mxu0  ;;  %v9125_v24 = vpop.f32.mrf.mxu1 }
 0x4ad   :  { %9961 = vtanh.f32 %v2965_v22  ;;  %v2970_v31 = vmul.f32 0.5, %v2969_v23 }
 0x4af   :  { %9963 = vtanh.f32 %v2970_v31  ;;  %v12843_v31 = vld [vmem:[#allocation7_spill] sm:$0xff] }
 0x4ba   :  { %v9962_v34 = vpop.eup %9961 }
 0x4bb   :  { %v2967_v43 = vadd.f32 1.0, %v9962_v34 }
 0x4bc   :  { %v9964_v61 = vpop.eup %9963 }
 0x4bd   :  { %v2968_v59 = vmul.f32 0.5, %v2967_v43  ;;  %v2972_v37 = vadd.f32 1.0, %v9964_v61 }
 0x4bf   :  { %v2974_v32 = vmul.f32 %v2968_v59, %v2959_v52  ;;  %v2973_v14 = vmul.f32 0.5, %v2972_v37 }
 0x4c1   :  { %v2975_v13 = vadd.f32 %v2974_v32, %v2717_v60 }
 0x4c3   :  { %9965 = vtanh.f32 %v2975_v13 }
 0x4c6   :  { %v3208_v35 = vpop.f32.mrf.mxu0  ;;  %v3249_v36 = vpop.f32.mrf.mxu1 }
 0x4c7   :  { %v3209_v45 = vadd.f32 %v3208_v35, %v12841_v38  ;;  %v3250_v23 = vadd.f32 %v3249_v36, %v12842_v20 }
 0x4c8   :  { %v3210_v48 = vpop.f32.mrf.mxu0  ;;  %v9144_v62 = vpop.f32.mrf.mxu1 }
 0x4c9   :  { %v3262_v56 = vrot.slane %v3209_v45, %v10387_v0  ;;  %v3211_v34 = vadd.f32 %v3210_v48, %v12843_v31  ;;  %v3358_v45 = vrot.slane %v8175_v11, 2  ;;  %v3292_v62 = vrot.slane %v8175_v11, 1 }
 0x4ca   :  { %v3212_v53 = vpop.f32.mrf.mxu0  ;;  %v3252_v57 = vpop.f32.mrf.mxu1 }
 0x4cb   :  { %v3263_v16 = vcombine.high %v3262_v56, %v3262_v56  ;;  %v3270_v42 = vrot.slane %v3262_v56, %v10387_v0  ;;  %v3303_v52 = vrot.slane %v3211_v34, %v10387_v0  ;;  %v3359_v53 = vrot.slane %v8176_v18, 2 }
 0x4cc   :  { %v3213_v21 = vpop.f32.mrf.mxu0  ;;  %v9145_v28 = vpop.f32.mrf.mxu1  ;;  %v3293_v57 = vrot.slane %v8176_v18, 1 }
 0x4cd   :  { %v3277_v15 = vrot.slane %v3263_v16, %v10387_v0  ;;  %v3280_v17 = vadd.f32 %v8175_v11, %v3270_v42  ;;  %v3304_v13 = vcombine.high %v3303_v52, %v3303_v52  ;;  %v3311_v48 = vrot.slane %v3303_v52, %v10387_v0 }
 0x4cf   :  { %v3281_v26 = vadd.f32 %v8176_v18, %v3277_v15  ;;  %v3282_v40 = vmul.f32 0.5, %v3280_v17  ;;  %v3318_v28 = vrot.slane %v3304_v13, %v10387_v0  ;;  %v3321_v17 = vadd.f32 %v3311_v48, %v3292_v62 }
 0x4d0   :  { %v9966_v3 = vpop.eup %9965 }
 0x4d1   :  { %v2977_v50 = vsub.f32 %v11270_v12, %v9966_v3  ;;  %v3283_v22 = vmul.f32 0.5, %v3281_v26  ;;  %9967 = vtanh.f32 %v3282_v40  ;;  %v3338_v12 = vrot.slane %v3250_v23, %v10387_v0 }
 0x4d2   :  { %v3322_v40 = vadd.f32 %v3318_v28, %v3293_v57  ;;  %v3323_v11 = vmul.f32 0.5, %v3321_v17  ;;  %v9684_v17 = vld [vmem:[%s12801_s2 + $0x80] ss:$12 sps:$4 sm:$0xff]  }
 0x4d3   :  { %v2978_v6 = vmul.f32 %v2977_v50, %v2973_v14  ;;  %9969 = vtanh.f32 %v3283_v22  ;;  %v3339_v32 = vcombine.high %v3338_v12, %v3338_v12  ;;  %v3346_v36 = vrot.slane %v3338_v12, %v10387_v0 }
 0x4d5   :  { %v2979_v24 = vadd.f32 %v9966_v3, %v2978_v6  ;;  %v3353_v42 = vrot.slane %v3339_v32, %v10387_v0  ;;  %v3324_v3 = vmul.f32 0.5, %v3322_v40  ;;  %v11541_v40 = vld [vmem:[%s12801_s2 + $0x60] ss:$12 sps:$4 sm:$0xff]  }
 0x4d7   :  { %8172 = vst [vmem:[%s12805_s6 + $0x2] sm:$0x3] %v2979_v24  ;;  %v2988_v27 = vrot.slane %v2979_v24, %v10387_v0 }
 0x4d9   :  { %v2989_v43 = vcombine.high %v2988_v27, %v2988_v27  ;;  %8173 = vst.sshfl [vmem:[#allocation2 + $0x2] sm:$0x1 pattern:$0x73625140] %v2988_v27 }
 0x4db   :  { %8174 = vst.sshfl [vmem:[#allocation2 + $0xa] sm:$0x1 pattern:$0x73625140] %v2989_v43 }
 0x4de   :  { %v9968_v59 = vpop.eup %9967 }
 0x4df   :  { %v3286_v60 = vadd.f32 1.0, %v9968_v59 }
 0x4e0   :  { %v9970_v35 = vpop.eup %9969 }
 0x4e1   :  { %v3287_v56 = vadd.f32 1.0, %v9970_v35  ;;  %v3288_v61 = vmul.f32 0.5, %v3286_v60 }
 0x4e3   :  { %v3289_v16 = vmul.f32 0.5, %v3287_v56  ;;  %v3356_v21 = vmul.f32 %v3346_v36, %v3288_v61 }
 0x4e5   :  { %v3357_v37 = vmul.f32 %v3353_v42, %v3289_v16  ;;  %v3362_v15 = vadd.f32 %v3358_v45, %v3356_v21  ;;  %v9665_v21 = vld [vmem:[%s12801_s2 + $0x170] ss:$12 sps:$4 sm:$0xff]  }
 0x4e7   :  { %v3363_v26 = vadd.f32 %v3359_v53, %v3357_v37  ;;  %9971 = vtanh.f32 %v3362_v15  ;;  %v9666_v37 = vld [vmem:[%s12801_s2 + $0x158] ss:$12 sps:$4 sm:$0xff]  }
 0x4e8   :  { %v11525_v15 = vld [vmem:[%s12801_s2 + $0x78] ss:$12 sps:$4 sm:$0xff]  }
 0x4e9   :  { %9973 = vtanh.f32 %v3363_v26  ;;  %v11535_v26 = vld [vmem:[%s12801_s2 + $0x64] ss:$12 sps:$4 sm:$0xff]  }
 0x4ea   :  { %9975 = vtanh.f32 %v3323_v11  ;;  %v9688_v11 = vld [vmem:[%s12801_s2 + $0x68] ss:$12 sps:$4 sm:$0xff]  }
 0x4eb   :  { %9977 = vtanh.f32 %v3324_v3  ;;  %v11551_v3 = vld [vmem:[%s12801_s2 + $0x4c] ss:$12 sps:$4 sm:$0xff]  }
 0x4f4   :  { %v9972_v14 = vpop.eup %9971 }
 0x4f6   :  { %v9974_v50 = vpop.eup %9973 }
 0x4f7   :  { %v3368_v18 = vcombine.low %v9972_v14, %v9974_v50  ;;  %v9976_v6 = vpop.eup %9975 }
 0x4f8   :  { %v9978_v27 = vpop.eup %9977  ;;  %v3327_v23 = vadd.f32 1.0, %v9976_v6  ;;  %v9696_v6 = vld [vmem:[%s12801_s2 + $0x38] ss:$12 sps:$4 sm:$0xff]  }
 0x4f9   :  { %v3375_v22 = vrot.slane %v3368_v18, %v10387_v0  ;;  %v3328_v43 = vadd.f32 1.0, %v9978_v27  ;;  %v11567_v18 = vld [vmem:[%s12801_s2 + $0x34] ss:$12 sps:$4 sm:$0xff]   ;;  %v11589_v27 = vld [vmem:[%s12801_s2 + $0x18] ss:$12 sps:$4 sm:$0xff]  }
 0x4fa   :  { %v3329_v52 = vmul.f32 0.5, %v3327_v23  ;;  %v9700_v23 = vld [vmem:[%s12801_s2 + $0x20] ss:$12 sps:$4 sm:$0xff]  }
 0x4fb   :  { %v3382_v24 = vrot.slane %v3375_v22, %v10387_v0  ;;  %v3330_v32 = vmul.f32 0.5, %v3328_v43  ;;  %v11573_v22 = vld [vmem:[%s12801_s2 + $0x30] ss:$12 sps:$4 sm:$0xff]   ;;  %v11605_v43 = vld [vmem:[%s12801_s2] ss:$12 sps:$4 sm:$0xff]  }
 0x4fd   :  { %v3384_v34 = vsub.f32 %v11328_v55, %v3382_v24  ;;  %v11583_v24 = vld [vmem:[%s12801_s2 + $0x1c] ss:$12 sps:$4 sm:$0xff]  }
 0x4ff   :  { %v3392_v12 = vrot.slane %v3384_v34, %v10387_v0  ;;  %v11599_v34 = vld [vmem:[%s12801_s2 + $0x4] ss:$12 sps:$4 sm:$0xff]  }
 0x501   :  { %v3393_v59 = vcombine.high %v3392_v12, %v3392_v12  ;;  %v3400_v60 = vrot.slane %v3392_v12, %v10387_v0  ;;  %v9704_v12 = vld [vmem:[%s12801_s2 + $0x8] ss:$12 sps:$4 sm:$0xff]  }
 0x503   :  { %v3407_v13 = vrot.slane %v3393_v59, %v10387_v0  ;;  %v3410_v35 = vmul.f32 %v3400_v60, %v3329_v52  ;;  %v11627_v60 = vld [vmem:[%s12802_s3 + $0xac] ss:$12 sps:$4 sm:$0xff]  }
 0x505   :  { %v3411_v45 = vmul.f32 %v3407_v13, %v3330_v32  ;;  %v3412_v62 = vadd.f32 %v9972_v14, %v3410_v35  ;;  %v11557_v14 = vld [vmem:[%s12801_s2 + $0x48] ss:$12 sps:$4 sm:$0xff]   ;;  %v9708_v13 = vld [vmem:[%s12802_s3 + $0xb0] ss:$12 sps:$4 sm:$0xff]  }
 0x506   :  { %v11632_v32 = vld [vmem:[%s12802_s3 + $0xa8] ss:$12 sps:$4 sm:$0xff]  }
 0x507   :  { %v3413_v56 = vadd.f32 %v9974_v50, %v3411_v45  ;;  %v3434_v36 = vpack.c.bf16 %v3412_v62, %v3412_v62  ;;  %v9692_v50 = vld [vmem:[%s12801_s2 + $0x50] ss:$12 sps:$4 sm:$0xff]   ;;  %v11642_v35 = vld [vmem:[%s12802_s3 + $0x94] ss:$12 sps:$4 sm:$0xff]  }
 0x508   :  { %v11648_v45 = vld [vmem:[%s12802_s3 + $0x90] ss:$12 sps:$4 sm:$0xff]  }
 0x509   :  { %v3416_v61 = vcombine.low %v3412_v62, %v3413_v56  ;;  %v3435_v48 = vpack.c.bf16 %v3413_v56, %v3413_v56  ;;  %v3470_v57 = vunpack.c.l.b16 %v3434_v36  ;;  %v9712_v62 = vld [vmem:[%s12802_s3 + $0x98] ss:$12 sps:$4 sm:$0xff]   ;;  %v11658_v56 = vld [vmem:[%s12802_s3 + $0x7c] ss:$12 sps:$4 sm:$0xff]   ;;  %v9716_v36 = vld [vmem:[%s12802_s3 + $0x80] ss:$12 sps:$4 sm:$0xff]  }
 0x50b   :  { %v3423_v53 = vrot.slane %v3416_v61, %v10387_v0  ;;  %v3471_v55 = vunpack.c.l.b16 %v3435_v48  ;;  %v11664_v61 = vld [vmem:[%s12802_s3 + $0x78] ss:$12 sps:$4 sm:$0xff]  }
 0x50c   :  { %v11674_v48 = vld [vmem:[%s12802_s3 + $0x64] ss:$12 sps:$4 sm:$0xff]  }
 0x50d   :  { %8201 = vst.sshfl [vmem:[%s12805_s6] sm:$0x5 pattern:$0x73625140] %v3423_v53  ;;  %v3472_v16 = vrot.slane %v3471_v55, 7  ;;  %v11680_v53 = vld [vmem:[%s12802_s3 + $0x60] ss:$12 sps:$4 sm:$0xff]  }
 0x50e   :  { %v9720_v55 = vld [vmem:[%s12802_s3 + $0x68] ss:$12 sps:$4 sm:$0xff]  }
 0x50f   :  { %v3473_v42 = vsel %vm555_vm1, %v3472_v16, %v3470_v57  ;;  %v11690_v57 = vld [vmem:[%s12802_s3 + $0x4c] ss:$12 sps:$4 sm:$0xff]   ;;  %v11696_v16 = vld [vmem:[%s12802_s3 + $0x48] ss:$12 sps:$4 sm:$0xff]  }
 0x510   :  { %v3474_v28 = vpack.c.b16 %v3473_v42, %v3473_v42  ;;  %v9724_v42 = vld [vmem:[%s12802_s3 + $0x50] ss:$12 sps:$4 sm:$0xff]  }
 0x512   :  { %3637 = vmatmul.mubr.bf16.vlgmr.msra.gmra.mxu0 %v3474_v28  ;;  %9163 = vmatmul.mubr.bf16.vlgmr.msra.gmra.mxu1 %v3474_v28  ;;  %v11712_v28 = vld [vmem:[%s12802_s3 + $0x30] ss:$12 sps:$4 sm:$0xff]  }
 0x513   :  { %3847 = vmatpush1.bf16.msra.mxu0 %v11146_v9  ;;  %9167 = vmatpush3.bf16.msra.mxu1 %v9665_v21  ;;  %v9667_v9 = vld [vmem:[%s12801_s2 + $0x140] ss:$12 sps:$4 sm:$0xff]  }
 0x514   :  { %3848 = vmatprep.subr.bf16.mxu0 %v11155_v46  ;;  %9168 = vmatprep.subr.bf16.mxu1 %v12837_v7  ;;  %v9668_v46 = vld [vmem:[%s12801_s2 + $0x128] ss:$12 sps:$4 sm:$0xff]   ;;  %v11615_v52 = vld [vmem:[%s12805_s6] sm:$0x3] }
 0x515   :  { %3878 = vmatprep.mubr.bf16.mxu0 %v12838_v8  ;;  %9182 = vmatprep.mubr.msk.bf16.mxu1 %vm10098_vm0, %v12837_v7  ;;  %v3976_v59 = vpack.c.bf16 %v11615_v52, %v11615_v52  ;;  %v11706_v21 = vld [vmem:[%s12802_s3 + $0x34] ss:$12 sps:$4 sm:$0xff]  }
 0x517   :  { %3849 = vmatpush1.bf16.msra.mxu0 %v11161_v51  ;;  %9169 = vmatpush3.bf16.msra.mxu1 %v9666_v37  ;;  %v9669_v51 = vld [vmem:[%s12801_s2 + $0x110] ss:$12 sps:$4 sm:$0xff]   ;;  %v9728_v37 = vld [vmem:[%s12802_s3 + $0x38] ss:$12 sps:$4 sm:$0xff]  }
 0x518   :  { %3850 = vmatprep.subr.bf16.mxu0 %v11171_v39  ;;  %9170 = vmatprep.subr.bf16.mxu1 %v12837_v7  ;;  %v9670_v39 = vld [vmem:[%s12801_s2 + $0xf8] ss:$12 sps:$4 sm:$0xff]  }
 0x51b   :  { %3851 = vmatpush1.bf16.msra.mxu0 %v11180_v25  ;;  %9171 = vmatpush3.bf16.msra.mxu1 %v9667_v9  ;;  %v9671_v25 = vld [vmem:[%s12801_s2 + $0xe0] ss:$12 sps:$4 sm:$0xff]  }
 0x51c   :  { %3852 = vmatprep.subr.bf16.mxu0 %v11190_v63  ;;  %9172 = vmatprep.subr.bf16.mxu1 %v12837_v7  ;;  %v9672_v63 = vld [vmem:[%s12801_s2 + $0xc8] ss:$12 sps:$4 sm:$0xff]  }
 0x51f   :  { %3853 = vmatpush1.bf16.msra.mxu0 %v11196_v58  ;;  %9173 = vmatpush3.bf16.msra.mxu1 %v9668_v46  ;;  %v11477_v58 = vld [vmem:[%s12801_s2 + $0xac] ss:$12 sps:$4 sm:$0xff]  }
 0x520   :  { %3854 = vmatprep.subr.bf16.mxu0 %v11206_v10  ;;  %9174 = vmatprep.subr.bf16.mxu1 %v12837_v7  ;;  %v11482_v10 = vld [vmem:[%s12805_s6 + $0x2] sm:$0x3] }
 0x523   :  { %3855 = vmatpush1.bf16.msra.mxu0 %v11212_v19  ;;  %9175 = vmatpush3.bf16.msra.mxu1 %v9669_v51  ;;  %v11488_v19 = vld [vmem:[%s12801_s2 + $0xa8] ss:$12 sps:$4 sm:$0xff]  }
 0x524   :  { %3856 = vmatprep.subr.bf16.mxu0 %v11222_v2  ;;  %9176 = vmatprep.subr.bf16.mxu1 %v12837_v7  ;;  %v9676_v2 = vld [vmem:[%s12801_s2 + $0xb0] ss:$12 sps:$4 sm:$0xff]  }
 0x525   :  { %v11721_v51 = vld [vmem:[%s12802_s3 + $0x1c] ss:$12 sps:$4 sm:$0xff]  }
 0x527   :  { %3857 = vmatpush1.bf16.msra.mxu0 %v11228_v1  ;;  %9177 = vmatpush3.bf16.msra.mxu1 %v9670_v39  ;;  %v3685_v1 = vpack.c.bf16 %v11482_v10, %v11482_v10  ;;  %v11727_v39 = vld [vmem:[%s12802_s3 + $0x18] ss:$12 sps:$4 sm:$0xff]  }
 0x528   :  { %3858 = vmatprep.subr.bf16.mxu0 %v11238_v33  ;;  %9178 = vmatprep.subr.bf16.mxu1 %v12837_v7  ;;  %v11500_v33 = vld [vmem:[%s12801_s2 + $0x94] ss:$12 sps:$4 sm:$0xff]   ;;  %12844 = vst [vmem:[#allocation8_spill] sm:$0xff] %v11727_v39 }
 0x52b   :  { %3859 = vmatpush1.bf16.msra.mxu0 %v11244_v49  ;;  %9179 = vmatpush3.bf16.msra.mxu1 %v9671_v25  ;;  %v11506_v49 = vld [vmem:[%s12801_s2 + $0x90] ss:$12 sps:$4 sm:$0xff]   ;;  %v9732_v25 = vld [vmem:[%s12802_s3 + $0x20] ss:$12 sps:$4 sm:$0xff]  }
 0x52c   :  { %3860 = vmatprep.subr.bf16.mxu0 %v11254_v44  ;;  %9180 = vmatprep.subr.bf16.mxu1 %v12837_v7  ;;  %v9680_v44 = vld [vmem:[%s12801_s2 + $0x98] ss:$12 sps:$4 sm:$0xff]  }
 0x52f   :  { %3861 = vmatpush1.bf16.msra.mxu0 %v11260_v54  ;;  %9181 = vmatpush3.bf16.msra.mxu1 %v9672_v63  ;;  %v11516_v54 = vld [vmem:[%s12801_s2 + $0x7c] ss:$12 sps:$4 sm:$0xff]  }
 0x530   :  { %4137 = vmatprep.subr.bf16.mxu0 %v11477_v58  ;;  %9186 = vmatprep.subr.bf16.mxu1 %v12837_v7 }
 0x532   :  { %3879 = vmatmul.mubr.bf16.vlgmr.msra.gmra.mxu0 %v3685_v1  ;;  %9183 = vmatmul.mubr.bf16.vlgmr.msra.gmra.mxu1 %v3685_v1  ;;  %v11737_v1 = vld [vmem:[%s12802_s3 + $0x4] ss:$12 sps:$4 sm:$0xff]  }
 0x533   :  { %4138 = vmatpush1.bf16.msra.mxu0 %v11488_v19  ;;  %9187 = vmatpush3.bf16.msra.mxu1 %v9676_v2  ;;  %12845 = vst [vmem:[#allocation9_spill] sm:$0xff] %v11737_v1 }
 0x534   :  { %4139 = vmatprep.subr.bf16.mxu0 %v11500_v33  ;;  %9188 = vmatprep.subr.bf16.mxu1 %v12837_v7 }
 0x535   :  { %4169 = vmatprep.mubr.bf16.mxu0 %v12838_v8  ;;  %9202 = vmatprep.mubr.msk.bf16.mxu1 %vm10098_vm0, %v12837_v7 }
 0x537   :  { %4140 = vmatpush1.bf16.msra.mxu0 %v11506_v49  ;;  %9189 = vmatpush3.bf16.msra.mxu1 %v9680_v44 }
 0x538   :  { %4141 = vmatprep.subr.bf16.mxu0 %v11516_v54  ;;  %9190 = vmatprep.subr.bf16.mxu1 %v12837_v7 }
 0x53b   :  { %4142 = vmatpush1.bf16.msra.mxu0 %v11525_v15  ;;  %9191 = vmatpush3.bf16.msra.mxu1 %v9684_v17 }
 0x53c   :  { %4143 = vmatprep.subr.bf16.mxu0 %v11535_v26  ;;  %9192 = vmatprep.subr.bf16.mxu1 %v12837_v7 }
 0x53f   :  { %4144 = vmatpush1.bf16.msra.mxu0 %v11541_v40  ;;  %9193 = vmatpush3.bf16.msra.mxu1 %v9688_v11  ;;  %v11743_v11 = vld [vmem:[%s12802_s3] ss:$12 sps:$4 sm:$0xff]  }
 0x540   :  { %4145 = vmatprep.subr.bf16.mxu0 %v11551_v3  ;;  %9194 = vmatprep.subr.bf16.mxu1 %v12837_v7  ;;  %12846 = vst [vmem:[#allocation10_spill] sm:$0xff] %v11743_v11 }
 0x543   :  { %4146 = vmatpush1.bf16.msra.mxu0 %v11557_v14  ;;  %9195 = vmatpush3.bf16.msra.mxu1 %v9692_v50  ;;  %v9736_v50 = vld [vmem:[%s12802_s3 + $0x8] ss:$12 sps:$4 sm:$0xff]  }
 0x544   :  { %4147 = vmatprep.subr.bf16.mxu0 %v11567_v18  ;;  %9196 = vmatprep.subr.bf16.mxu1 %v12837_v7 }
 0x547   :  { %4148 = vmatpush1.bf16.msra.mxu0 %v11573_v22  ;;  %9197 = vmatpush3.bf16.msra.mxu1 %v9696_v6 }
 0x548   :  { %4149 = vmatprep.subr.bf16.mxu0 %v11583_v24  ;;  %9198 = vmatprep.subr.bf16.mxu1 %v12837_v7 }
 0x54b   :  { %4150 = vmatpush1.bf16.msra.mxu0 %v11589_v27  ;;  %9199 = vmatpush3.bf16.msra.mxu1 %v9700_v23 }
 0x54c   :  { %4151 = vmatprep.subr.bf16.mxu0 %v11599_v34  ;;  %9200 = vmatprep.subr.bf16.mxu1 %v12837_v7 }
 0x54f   :  { %4152 = vmatpush1.bf16.msra.mxu0 %v11605_v43  ;;  %9201 = vmatpush3.bf16.msra.mxu1 %v9704_v12  ;;  %v11753_v12 = vld [vmem:[%s12801_s2 + $0x16c] ss:$12 sps:$4 sm:$0xff]  }
 0x550   :  { %9206 = vmatprep.subr.bf16.mxu1 %v12837_v7  ;;  %4567 = vmatprep.subr.bf16.mxu0 %v11627_v60  ;;  %12847 = vst [vmem:[#allocation11_spill] sm:$0xff] %v11753_v12 }
 0x552   :  { %4170 = vmatmul.mubr.bf16.vlgmr.msra.gmra.mxu0 %v3976_v59  ;;  %9203 = vmatmul.mubr.bf16.vlgmr.msra.gmra.mxu1 %v3976_v59 }
 0x553   :  { %4599 = vmatprep.mubr.bf16.mxu0 %v12838_v8  ;;  %9222 = vmatprep.mubr.msk.bf16.mxu1 %vm10098_vm0, %v12837_v7 }
 0x554   :  { %4568 = vmatpush1.bf16.msra.mxu0 %v11632_v32  ;;  %9207 = vmatpush3.bf16.msra.mxu1 %v9708_v13 }
 0x555   :  { %9208 = vmatprep.subr.bf16.mxu1 %v12837_v7  ;;  %4569 = vmatprep.subr.bf16.mxu0 %v11642_v35 }
 0x558   :  { %4570 = vmatpush1.bf16.msra.mxu0 %v11648_v45  ;;  %9209 = vmatpush3.bf16.msra.mxu1 %v9712_v62 }
 0x559   :  { %9210 = vmatprep.subr.bf16.mxu1 %v12837_v7  ;;  %4571 = vmatprep.subr.bf16.mxu0 %v11658_v56 }
 0x55c   :  { %4572 = vmatpush1.bf16.msra.mxu0 %v11664_v61  ;;  %9211 = vmatpush3.bf16.msra.mxu1 %v9716_v36 }
 0x55d   :  { %9212 = vmatprep.subr.bf16.mxu1 %v12837_v7  ;;  %4573 = vmatprep.subr.bf16.mxu0 %v11674_v48 }
 0x560   :  { %4574 = vmatpush1.bf16.msra.mxu0 %v11680_v53  ;;  %9213 = vmatpush3.bf16.msra.mxu1 %v9720_v55 }
 0x561   :  { %9214 = vmatprep.subr.bf16.mxu1 %v12837_v7  ;;  %4575 = vmatprep.subr.bf16.mxu0 %v11690_v57 }
 0x564   :  { %4576 = vmatpush1.bf16.msra.mxu0 %v11696_v16  ;;  %9215 = vmatpush3.bf16.msra.mxu1 %v9724_v42 }
 0x565   :  { %9216 = vmatprep.subr.bf16.mxu1 %v12837_v7  ;;  %4577 = vmatprep.subr.bf16.mxu0 %v11706_v21 }
 0x568   :  { %4578 = vmatpush1.bf16.msra.mxu0 %v11712_v28  ;;  %9217 = vmatpush3.bf16.msra.mxu1 %v9728_v37 }
 0x569   :  { %4579 = vmatprep.subr.bf16.mxu0 %v11721_v51  ;;  %9218 = vmatprep.subr.bf16.mxu1 %v12837_v7 }
 0x56c   :  { %4580 = vmatpush1.bf16.msra.mxu0 %v11727_v39  ;;  %9219 = vmatpush3.bf16.msra.mxu1 %v9732_v25 }
 0x56d   :  { %4581 = vmatprep.subr.bf16.mxu0 %v11737_v1  ;;  %9220 = vmatprep.subr.bf16.mxu1 %v12837_v7 }
 0x570   :  { %4582 = vmatpush1.bf16.msra.mxu0 %v11743_v11  ;;  %9221 = vmatpush3.bf16.msra.mxu1 %v9736_v50 }
 0x571   :  { %4809 = vmatprep.subr.bf16.mxu0 %v11753_v12  ;;  %9226 = vmatprep.subr.bf16.mxu1 %v12837_v7 }
 0x5d2   :  { %v3638_v9 = vpop.f32.mrf.mxu0  ;;  %v3679_v46 = vpop.f32.mrf.mxu1 }
 0x5d3   :  { %v3639_v62 = vadd.f32 %v3638_v9, %v10711_v4 }
 0x5d4   :  { %v3640_v63 = vpop.f32.mrf.mxu0  ;;  %v9164_v2 = vpop.f32.mrf.mxu1 }
 0x5d6   :  { %v3642_v44 = vpop.f32.mrf.mxu0  ;;  %v3682_v17 = vpop.f32.mrf.mxu1 }
 0x5d8   :  { %v3643_v6 = vpop.f32.mrf.mxu0  ;;  %v9165_v23 = vpop.f32.mrf.mxu1 }
 0x5d9   :  { %v3641_v23 = vadd.f32 %v3640_v63, %v10724_v30 }
 0x5f2   :  { %v3880_v59 = vpop.f32.mrf.mxu0  ;;  %v3921_v13 = vpop.f32.mrf.mxu1 }
 0x5f3   :  { %v3881_v36 = vadd.f32 %v3880_v59, %v10714_v5  ;;  %v3922_v9 = vadd.f32 %v3921_v13, %v10732_v41 }
 0x5f4   :  { %v3882_v55 = vpop.f32.mrf.mxu0  ;;  %v9184_v42 = vpop.f32.mrf.mxu1 }
 0x5f5   :  { %v3927_v37 = vadd.f32 %v3881_v36, %v3639_v62  ;;  %v3883_v50 = vadd.f32 %v3882_v55, %v10722_v29  ;;  %v3680_v62 = vadd.f32 %v3679_v46, %v10734_v47 }
 0x5f6   :  { %v3884_v25 = vpop.f32.mrf.mxu0  ;;  %v3924_v2 = vpop.f32.mrf.mxu1 }
 0x5f7   :  { %v3928_v44 = vmul.f32 0.5, %v3927_v37  ;;  %v3932_v12 = vadd.f32 %v3883_v50, %v3641_v23 }
 0x5f8   :  { %v3885_v17 = vpop.f32.mrf.mxu0  ;;  %v9185_v6 = vpop.f32.mrf.mxu1 }
 0x5f9   :  { %9979 = vtanh.f32 %v3928_v44  ;;  %v3933_v11 = vmul.f32 0.5, %v3932_v12  ;;  %v8287_v17 = vld [vmem:[%s12799_s0 + $0x1c] ss:$8 sm:$0x7] }
 0x5fb   :  { %9981 = vtanh.f32 %v3933_v11 }
 0x606   :  { %v9980_v1 = vpop.eup %9979 }
 0x607   :  { %v3930_v39 = vadd.f32 1.0, %v9980_v1  ;;  %v8286_v1 = vld [vmem:[%s12799_s0 + $0x4] ss:$8 sm:$0x7] }
 0x608   :  { %v9982_v12 = vpop.eup %9981 }
 0x609   :  { %v3931_v59 = vmul.f32 0.5, %v3930_v39  ;;  %v3935_v23 = vadd.f32 1.0, %v9982_v12 }
 0x60b   :  { %v3937_v36 = vmul.f32 %v3931_v59, %v3922_v9 }
 0x60d   :  { %v3938_v42 = vadd.f32 %v3937_v36, %v3680_v62 }
 0x60f   :  { %9983 = vtanh.f32 %v3938_v42 }
 0x612   :  { %v4171_v37 = vpop.f32.mrf.mxu0  ;;  %v4212_v25 = vpop.f32.mrf.mxu1 }
 0x613   :  { %v4172_v2 = vadd.f32 %v4171_v37, %v12841_v38  ;;  %v3936_v37 = vmul.f32 0.5, %v3935_v23 }
 0x614   :  { %v4173_v55 = vpop.f32.mrf.mxu0  ;;  %v9204_v44 = vpop.f32.mrf.mxu1 }
 0x615   :  { %v4225_v63 = vrot.slane %v4172_v2, %v10387_v0 }
 0x616   :  { %v4175_v39 = vpop.f32.mrf.mxu0  ;;  %v4215_v11 = vpop.f32.mrf.mxu1 }
 0x617   :  { %v4226_v13 = vcombine.high %v4225_v63, %v4225_v63  ;;  %v4233_v46 = vrot.slane %v4225_v63, %v10387_v0  ;;  %v4213_v11 = vadd.f32 %v4212_v25, %v12842_v20 }
 0x618   :  { %v4176_v6 = vpop.f32.mrf.mxu0  ;;  %v9205_v50 = vpop.f32.mrf.mxu1 }
 0x619   :  { %v4240_v9 = vrot.slane %v4226_v13, %v10387_v0  ;;  %v4243_v59 = vadd.f32 %v8286_v1, %v4233_v46  ;;  %v4174_v13 = vadd.f32 %v4173_v55, %v12843_v31 }
 0x61b   :  { %v4244_v62 = vadd.f32 %v8287_v17, %v4240_v9  ;;  %v4245_v36 = vmul.f32 0.5, %v4243_v59  ;;  %v4266_v6 = vrot.slane %v4174_v13, %v10387_v0 }
 0x61c   :  { %v9984_v42 = vpop.eup %9983 }
 0x61d   :  { %v3940_v2 = vsub.f32 %v11482_v10, %v9984_v42  ;;  %v4246_v44 = vmul.f32 0.5, %v4244_v62  ;;  %9985 = vtanh.f32 %v4245_v36  ;;  %v4301_v10 = vrot.slane %v4213_v11, %v10387_v0 }
 0x61e   :  { %v4267_v59 = vcombine.high %v4266_v6, %v4266_v6  ;;  %v4321_v36 = vrot.slane %v8286_v1, 2  ;;  %v4274_v55 = vrot.slane %v4266_v6, %v10387_v0 }
 0x61f   :  { %v3941_v39 = vmul.f32 %v3940_v2, %v3936_v37  ;;  %9987 = vtanh.f32 %v4246_v44  ;;  %v4302_v9 = vcombine.high %v4301_v10, %v4301_v10  ;;  %v4309_v25 = vrot.slane %v4301_v10, %v10387_v0 }
 0x620   :  { %v4322_v44 = vrot.slane %v8287_v17, 2  ;;  %v4281_v13 = vrot.slane %v4267_v59, %v10387_v0 }
 0x621   :  { %v3942_v63 = vadd.f32 %v9984_v42, %v3941_v39  ;;  %v4255_v42 = vrot.slane %v8286_v1, 1  ;;  %v4256_v39 = vrot.slane %v8287_v17, 1 }
 0x623   :  { %8283 = vst [vmem:[%s12805_s6 + $0x2] sm:$0x3] %v3942_v63  ;;  %v3951_v12 = vrot.slane %v3942_v63, %v10387_v0  ;;  %v4284_v31 = vadd.f32 %v4274_v55, %v4255_v42  ;;  %v4285_v38 = vadd.f32 %v4281_v13, %v4256_v39 }
 0x625   :  { %v3952_v46 = vcombine.high %v3951_v12, %v3951_v12  ;;  %8284 = vst.sshfl [vmem:[#allocation2 + $0x3] sm:$0x1 pattern:$0x73625140] %v3951_v12  ;;  %v4316_v12 = vrot.slane %v4302_v9, %v10387_v0  ;;  %v4286_v1 = vmul.f32 0.5, %v4284_v31 }
 0x627   :  { %8285 = vst.sshfl [vmem:[#allocation2 + $0xb] sm:$0x1 pattern:$0x73625140] %v3952_v46 }
 0x62a   :  { %v9986_v50 = vpop.eup %9985 }
 0x62b   :  { %v4249_v23 = vadd.f32 1.0, %v9986_v50 }
 0x62c   :  { %v9988_v62 = vpop.eup %9987 }
 0x62d   :  { %v4250_v37 = vadd.f32 1.0, %v9988_v62  ;;  %v4251_v2 = vmul.f32 0.5, %v4249_v23  ;;  %v4287_v23 = vmul.f32 0.5, %v4285_v38 }
 0x62f   :  { %v4252_v63 = vmul.f32 0.5, %v4250_v37  ;;  %v4319_v11 = vmul.f32 %v4309_v25, %v4251_v2 }
 0x631   :  { %v4320_v46 = vmul.f32 %v4316_v12, %v4252_v63  ;;  %v4325_v50 = vadd.f32 %v4321_v36, %v4319_v11 }
 0x633   :  { %v4326_v20 = vadd.f32 %v4322_v44, %v4320_v46  ;;  %9989 = vtanh.f32 %v4325_v50 }
 0x635   :  { %9991 = vtanh.f32 %v4326_v20 }
 0x636   :  { %9993 = vtanh.f32 %v4286_v1 }
 0x637   :  { %9995 = vtanh.f32 %v4287_v23 }
 0x640   :  { %v9990_v10 = vpop.eup %9989 }
 0x642   :  { %v9992_v6 = vpop.eup %9991 }
 0x643   :  { %v4331_v17 = vcombine.low %v9990_v10, %v9992_v6  ;;  %v9994_v9 = vpop.eup %9993 }
 0x644   :  { %v9996_v59 = vpop.eup %9995  ;;  %v4290_v2 = vadd.f32 1.0, %v9994_v9 }
 0x645   :  { %v4338_v62 = vrot.slane %v4331_v17, %v10387_v0  ;;  %v4291_v42 = vadd.f32 1.0, %v9996_v59  ;;  %v11815_v59 = vld [vmem:[%s12801_s2 + $0x150] ss:$12 sps:$4 sm:$0xff]  }
 0x646   :  { %v4292_v20 = vmul.f32 0.5, %v4290_v2  ;;  %v9744_v2 = vld [vmem:[%s12801_s2 + $0x158] ss:$12 sps:$4 sm:$0xff]  }
 0x647   :  { %v4345_v37 = vrot.slane %v4338_v62, %v10387_v0  ;;  %v4293_v55 = vmul.f32 0.5, %v4291_v42  ;;  %v11800_v62 = vld [vmem:[%s12801_s2 + $0x168] ss:$12 sps:$4 sm:$0xff]   ;;  %v11834_v42 = vld [vmem:[%s12801_s2 + $0x138] ss:$12 sps:$4 sm:$0xff]  }
 0x649   :  { %v4347_v36 = vsub.f32 %v11615_v52, %v4345_v37  ;;  %v11809_v37 = vld [vmem:[%s12801_s2 + $0x154] ss:$12 sps:$4 sm:$0xff]  }
 0x64b   :  { %v4355_v25 = vrot.slane %v4347_v36, %v10387_v0  ;;  %v11825_v36 = vld [vmem:[%s12801_s2 + $0x13c] ss:$12 sps:$4 sm:$0xff]  }
 0x64d   :  { %v4356_v31 = vcombine.high %v4355_v25, %v4355_v25  ;;  %v4363_v38 = vrot.slane %v4355_v25, %v10387_v0  ;;  %v9748_v25 = vld [vmem:[%s12801_s2 + $0x140] ss:$12 sps:$4 sm:$0xff]  }
 0x64f   :  { %v4370_v44 = vrot.slane %v4356_v31, %v10387_v0  ;;  %v4373_v39 = vmul.f32 %v4363_v38, %v4292_v20  ;;  %v11844_v20 = vld [vmem:[%s12801_s2 + $0x124] ss:$12 sps:$4 sm:$0xff]   ;;  %v11850_v31 = vld [vmem:[%s12801_s2 + $0x120] ss:$12 sps:$4 sm:$0xff]   ;;  %v9752_v38 = vld [vmem:[%s12801_s2 + $0x128] ss:$12 sps:$4 sm:$0xff]  }
 0x651   :  { %v4374_v63 = vmul.f32 %v4370_v44, %v4293_v55  ;;  %v4375_v12 = vadd.f32 %v9990_v10, %v4373_v39  ;;  %v11860_v55 = vld [vmem:[%s12801_s2 + $0x10c] ss:$12 sps:$4 sm:$0xff]   ;;  %v11866_v44 = vld [vmem:[%s12801_s2 + $0x108] ss:$12 sps:$4 sm:$0xff]   ;;  %v9756_v39 = vld [vmem:[%s12801_s2 + $0x110] ss:$12 sps:$4 sm:$0xff]  }
 0x653   :  { %v4376_v11 = vadd.f32 %v9992_v6, %v4374_v63  ;;  %v4397_v46 = vpack.c.bf16 %v4375_v12, %v4375_v12  ;;  %v9740_v6 = vld [vmem:[%s12801_s2 + $0x170] ss:$12 sps:$4 sm:$0xff]   ;;  %v11876_v63 = vld [vmem:[%s12801_s2 + $0xf4] ss:$12 sps:$4 sm:$0xff]  }
 0x655   :  { %v4379_v13 = vcombine.low %v4375_v12, %v4376_v11  ;;  %v4398_v50 = vpack.c.bf16 %v4376_v11, %v4376_v11  ;;  %v4433_v23 = vunpack.c.l.b16 %v4397_v46  ;;  %v11882_v12 = vld [vmem:[%s12801_s2 + $0xf0] ss:$12 sps:$4 sm:$0xff]   ;;  %v9760_v11 = vld [vmem:[%s12801_s2 + $0xf8] ss:$12 sps:$4 sm:$0xff]  }
 0x656   :  { %v11898_v46 = vld [vmem:[%s12801_s2 + $0xd8] ss:$12 sps:$4 sm:$0xff]  }
 0x657   :  { %v4386_v1 = vrot.slane %v4379_v13, %v10387_v0  ;;  %v4434_v52 = vunpack.c.l.b16 %v4398_v50  ;;  %v11892_v13 = vld [vmem:[%s12801_s2 + $0xdc] ss:$12 sps:$4 sm:$0xff]   ;;  %v9764_v50 = vld [vmem:[%s12801_s2 + $0xe0] ss:$12 sps:$4 sm:$0xff]  }
 0x659   :  { %v4435_v17 = vrot.slane %v4434_v52, 7  ;;  %8312 = vst.sshfl [vmem:[%s12805_s6] sm:$0x5 pattern:$0x73625140] %v4386_v1  ;;  %v11908_v1 = vld [vmem:[%s12801_s2 + $0xc4] ss:$12 sps:$4 sm:$0xff]  }
 0x65a   :  { %v11914_v52 = vld [vmem:[%s12801_s2 + $0xc0] ss:$12 sps:$4 sm:$0xff]  }
 0x65b   :  { %v4436_v10 = vsel %vm555_vm1, %v4435_v17, %v4433_v23  ;;  %v9768_v23 = vld [vmem:[%s12801_s2 + $0xc8] ss:$12 sps:$4 sm:$0xff]   ;;  %v11924_v17 = vld [vmem:[%s12805_s6 + $0x2] sm:$0x3] }
 0x65c   :  { %v4437_v9 = vpack.c.b16 %v4436_v10, %v4436_v10  ;;  %v9769_v10 = vld [vmem:[%s12801_s2 + $0xb0] ss:$12 sps:$4 sm:$0xff]  }
 0x65e   :  { %4600 = vmatmul.mubr.bf16.vlgmr.msra.gmra.mxu0 %v4437_v9  ;;  %9223 = vmatmul.mubr.bf16.vlgmr.msra.gmra.mxu1 %v4437_v9  ;;  %v9770_v9 = vld [vmem:[%s12801_s2 + $0x98] ss:$12 sps:$4 sm:$0xff]  }
 0x65f   :  { %4810 = vmatpush1.bf16.msra.mxu0 %v11800_v62  ;;  %9227 = vmatpush3.bf16.msra.mxu1 %v9740_v6  ;;  %v4648_v6 = vpack.c.bf16 %v11924_v17, %v11924_v17 }
 0x660   :  { %4811 = vmatprep.subr.bf16.mxu0 %v11809_v37  ;;  %9228 = vmatprep.subr.bf16.mxu1 %v12837_v7 }
 0x661   :  { %4841 = vmatprep.mubr.bf16.mxu0 %v12838_v8  ;;  %9242 = vmatprep.mubr.msk.bf16.mxu1 %vm10098_vm0, %v12837_v7 }
 0x663   :  { %4812 = vmatpush1.bf16.msra.mxu0 %v11815_v59  ;;  %9229 = vmatpush3.bf16.msra.mxu1 %v9744_v2 }
 0x664   :  { %4813 = vmatprep.subr.bf16.mxu0 %v11825_v36  ;;  %9230 = vmatprep.subr.bf16.mxu1 %v12837_v7 }
 0x667   :  { %4814 = vmatpush1.bf16.msra.mxu0 %v11834_v42  ;;  %9231 = vmatpush3.bf16.msra.mxu1 %v9748_v25 }
 0x668   :  { %4815 = vmatprep.subr.bf16.mxu0 %v11844_v20  ;;  %9232 = vmatprep.subr.bf16.mxu1 %v12837_v7 }
 0x66b   :  { %4816 = vmatpush1.bf16.msra.mxu0 %v11850_v31  ;;  %9233 = vmatpush3.bf16.msra.mxu1 %v9752_v38 }
 0x66c   :  { %4817 = vmatprep.subr.bf16.mxu0 %v11860_v55  ;;  %9234 = vmatprep.subr.bf16.mxu1 %v12837_v7 }
 0x66f   :  { %4818 = vmatpush1.bf16.msra.mxu0 %v11866_v44  ;;  %9235 = vmatpush3.bf16.msra.mxu1 %v9756_v39 }
 0x670   :  { %4819 = vmatprep.subr.bf16.mxu0 %v11876_v63  ;;  %9236 = vmatprep.subr.bf16.mxu1 %v12837_v7 }
 0x673   :  { %4820 = vmatpush1.bf16.msra.mxu0 %v11882_v12  ;;  %9237 = vmatpush3.bf16.msra.mxu1 %v9760_v11 }
 0x674   :  { %4821 = vmatprep.subr.bf16.mxu0 %v11892_v13  ;;  %9238 = vmatprep.subr.bf16.mxu1 %v12837_v7 }
 0x677   :  { %4822 = vmatpush1.bf16.msra.mxu0 %v11898_v46  ;;  %9239 = vmatpush3.bf16.msra.mxu1 %v9764_v50 }
 0x678   :  { %4823 = vmatprep.subr.bf16.mxu0 %v11908_v1  ;;  %9240 = vmatprep.subr.bf16.mxu1 %v12837_v7 }
 0x67b   :  { %4824 = vmatpush1.bf16.msra.mxu0 %v11914_v52  ;;  %9241 = vmatpush3.bf16.msra.mxu1 %v9768_v23 }
 0x67c   :  { %5100 = vmatprep.subr.bf16.mxu0 %v11477_v58  ;;  %9246 = vmatprep.subr.bf16.mxu1 %v12837_v7  ;;  %v9771_v58 = vld [vmem:[%s12801_s2 + $0x80] ss:$12 sps:$4 sm:$0xff]  }
 0x67e   :  { %4842 = vmatmul.mubr.bf16.vlgmr.msra.gmra.mxu0 %v4648_v6  ;;  %9243 = vmatmul.mubr.bf16.vlgmr.msra.gmra.mxu1 %v4648_v6 }
 0x67f   :  { %5101 = vmatpush1.bf16.msra.mxu0 %v11488_v19  ;;  %9247 = vmatpush3.bf16.msra.mxu1 %v9769_v10  ;;  %v9772_v19 = vld [vmem:[%s12801_s2 + $0x68] ss:$12 sps:$4 sm:$0xff]  }
 0x680   :  { %5102 = vmatprep.subr.bf16.mxu0 %v11500_v33  ;;  %9248 = vmatprep.subr.bf16.mxu1 %v12837_v7  ;;  %v9773_v33 = vld [vmem:[%s12801_s2 + $0x50] ss:$12 sps:$4 sm:$0xff]  }
 0x681   :  { %5132 = vmatprep.mubr.bf16.mxu0 %v12838_v8  ;;  %9262 = vmatprep.mubr.msk.bf16.mxu1 %vm10098_vm0, %v12837_v7 }
 0x683   :  { %5103 = vmatpush1.bf16.msra.mxu0 %v11506_v49  ;;  %9249 = vmatpush3.bf16.msra.mxu1 %v9770_v9  ;;  %v9774_v49 = vld [vmem:[%s12801_s2 + $0x38] ss:$12 sps:$4 sm:$0xff]  }
 0x684   :  { %5104 = vmatprep.subr.bf16.mxu0 %v11516_v54  ;;  %9250 = vmatprep.subr.bf16.mxu1 %v12837_v7  ;;  %v9775_v54 = vld [vmem:[%s12801_s2 + $0x20] ss:$12 sps:$4 sm:$0xff]  }
 0x687   :  { %5105 = vmatpush1.bf16.msra.mxu0 %v11525_v15  ;;  %9251 = vmatpush3.bf16.msra.mxu1 %v9771_v58  ;;  %v9776_v15 = vld [vmem:[%s12801_s2 + $0x8] ss:$12 sps:$4 sm:$0xff]  }
 0x688   :  { %5106 = vmatprep.subr.bf16.mxu0 %v11535_v26  ;;  %9252 = vmatprep.subr.bf16.mxu1 %v12837_v7  ;;  %v11982_v26 = vld [vmem:[%s12805_s6] sm:$0x3] }
 0x68b   :  { %5107 = vmatpush1.bf16.msra.mxu0 %v11541_v40  ;;  %9253 = vmatpush3.bf16.msra.mxu1 %v9772_v19  ;;  %v4939_v40 = vpack.c.bf16 %v11982_v26, %v11982_v26 }
 0x68c   :  { %5108 = vmatprep.subr.bf16.mxu0 %v11551_v3  ;;  %9254 = vmatprep.subr.bf16.mxu1 %v12837_v7  ;;  %v12848_v3 = vld [vmem:[#allocation8_spill] sm:$0xff] }
 0x68f   :  { %5109 = vmatpush1.bf16.msra.mxu0 %v11557_v14  ;;  %9255 = vmatpush3.bf16.msra.mxu1 %v9773_v33  ;;  %v12849_v14 = vld [vmem:[#allocation9_spill] sm:$0xff] }
 0x690   :  { %5110 = vmatprep.subr.bf16.mxu0 %v11567_v18  ;;  %9256 = vmatprep.subr.bf16.mxu1 %v12837_v7  ;;  %v12850_v18 = vld [vmem:[#allocation10_spill] sm:$0xff] }
 0x693   :  { %5111 = vmatpush1.bf16.msra.mxu0 %v11573_v22  ;;  %9257 = vmatpush3.bf16.msra.mxu1 %v9774_v49  ;;  %v12851_v22 = vld [vmem:[#allocation11_spill] sm:$0xff] }
 0x694   :  { %5112 = vmatprep.subr.bf16.mxu0 %v11583_v24  ;;  %9258 = vmatprep.subr.bf16.mxu1 %v12837_v7  ;;  %v9777_v24 = vld [vmem:[%s12802_s3 + $0xb0] ss:$12 sps:$4 sm:$0xff]  }
 0x697   :  { %5113 = vmatpush1.bf16.msra.mxu0 %v11589_v27  ;;  %9259 = vmatpush3.bf16.msra.mxu1 %v9775_v54  ;;  %v9778_v27 = vld [vmem:[%s12802_s3 + $0x98] ss:$12 sps:$4 sm:$0xff]  }
 0x698   :  { %5114 = vmatprep.subr.bf16.mxu0 %v11599_v34  ;;  %9260 = vmatprep.subr.bf16.mxu1 %v12837_v7  ;;  %v9779_v34 = vld [vmem:[%s12802_s3 + $0x80] ss:$12 sps:$4 sm:$0xff]  }
 0x69b   :  { %5115 = vmatpush1.bf16.msra.mxu0 %v11605_v43  ;;  %9261 = vmatpush3.bf16.msra.mxu1 %v9776_v15  ;;  %v9780_v43 = vld [vmem:[%s12802_s3 + $0x68] ss:$12 sps:$4 sm:$0xff]  }
 0x69c   :  { %5530 = vmatprep.subr.bf16.mxu0 %v11627_v60  ;;  %9266 = vmatprep.subr.bf16.mxu1 %v12837_v7  ;;  %v9781_v60 = vld [vmem:[%s12802_s3 + $0x50] ss:$12 sps:$4 sm:$0xff]  }
 0x69e   :  { %5133 = vmatmul.mubr.bf16.vlgmr.msra.gmra.mxu0 %v4939_v40  ;;  %9263 = vmatmul.mubr.bf16.vlgmr.msra.gmra.mxu1 %v4939_v40 }
 0x69f   :  { %5531 = vmatpush1.bf16.msra.mxu0 %v11632_v32  ;;  %5562 = vmatprep.mubr.bf16.mxu0 %v12838_v8  ;;  %v9782_v32 = vld [vmem:[%s12802_s3 + $0x38] ss:$12 sps:$4 sm:$0xff]  }
 0x6a0   :  { %5532 = vmatprep.subr.bf16.mxu0 %v11642_v35  ;;  %9282 = vmatprep.mubr.msk.bf16.mxu1 %vm10098_vm0, %v12837_v7 }
 0x6a1   :  { %9267 = vmatpush3.bf16.msra.mxu1 %v9777_v24 }
 0x6a2   :  { %9268 = vmatprep.subr.bf16.mxu1 %v12837_v7 }
 0x6a3   :  { %5533 = vmatpush1.bf16.msra.mxu0 %v11648_v45 }
 0x6a4   :  { %5534 = vmatprep.subr.bf16.mxu0 %v11658_v56  ;;  %v9783_v56 = vld [vmem:[%s12802_s3 + $0x20] ss:$12 sps:$4 sm:$0xff]  }
 0x6a5   :  { %9269 = vmatpush3.bf16.msra.mxu1 %v9778_v27 }
 0x6a6   :  { %9270 = vmatprep.subr.bf16.mxu1 %v12837_v7 }
 0x6a7   :  { %5535 = vmatpush1.bf16.msra.mxu0 %v11664_v61 }
 0x6a8   :  { %5536 = vmatprep.subr.bf16.mxu0 %v11674_v48 }
 0x6a9   :  { %9271 = vmatpush3.bf16.msra.mxu1 %v9779_v34 }
 0x6aa   :  { %9272 = vmatprep.subr.bf16.mxu1 %v12837_v7 }
 0x6ab   :  { %5537 = vmatpush1.bf16.msra.mxu0 %v11680_v53 }
 0x6ac   :  { %5538 = vmatprep.subr.bf16.mxu0 %v11690_v57 }
 0x6ad   :  { %9273 = vmatpush3.bf16.msra.mxu1 %v9780_v43  ;;  %v12852_v43 = vld [vmem:[#allocation5_spill] sm:$0xff] }
 0x6ae   :  { %9274 = vmatprep.subr.bf16.mxu1 %v12837_v7 }
 0x6af   :  { %5539 = vmatpush1.bf16.msra.mxu0 %v11696_v16  ;;  %v9784_v16 = vld [vmem:[%s12802_s3 + $0x8] ss:$12 sps:$4 sm:$0xff]  }
 0x6b0   :  { %5540 = vmatprep.subr.bf16.mxu0 %v11706_v21 }
 0x6b1   :  { %9275 = vmatpush3.bf16.msra.mxu1 %v9781_v60 }
 0x6b2   :  { %9276 = vmatprep.subr.bf16.mxu1 %v12837_v7 }
 0x6b3   :  { %5541 = vmatpush1.bf16.msra.mxu0 %v11712_v28 }
 0x6b4   :  { %5542 = vmatprep.subr.bf16.mxu0 %v11721_v51 }
 0x6b5   :  { %9277 = vmatpush3.bf16.msra.mxu1 %v9782_v32 }
 0x6b6   :  { %9278 = vmatprep.subr.bf16.mxu1 %v12837_v7 }
 0x6b7   :  { %5543 = vmatpush1.bf16.msra.mxu0 %v12848_v3 }
 0x6b8   :  { %5544 = vmatprep.subr.bf16.mxu0 %v12849_v14 }
 0x6b9   :  { %9279 = vmatpush3.bf16.msra.mxu1 %v9783_v56 }
 0x6ba   :  { %9280 = vmatprep.subr.bf16.mxu1 %v12837_v7 }
 0x6bb   :  { %5545 = vmatpush1.bf16.msra.mxu0 %v12850_v18 }
 0x6bc   :  { %5772 = vmatprep.subr.bf16.mxu0 %v12851_v22 }
 0x6bd   :  { %9281 = vmatpush3.bf16.msra.mxu1 %v9784_v16 }
 0x6be   :  { %9286 = vmatprep.subr.bf16.mxu1 %v12837_v7 }
 0x71e   :  { %v4601_v35 = vpop.f32.mrf.mxu0  ;;  %v4642_v45 = vpop.f32.mrf.mxu1 }
 0x71f   :  { %v4602_v25 = vadd.f32 %v4601_v35, %v10711_v4  ;;  %v4643_v18 = vadd.f32 %v4642_v45, %v10734_v47 }
 0x720   :  { %v4603_v61 = vpop.f32.mrf.mxu0  ;;  %v9224_v48 = vpop.f32.mrf.mxu1 }
 0x721   :  { %v4604_v33 = vadd.f32 %v4603_v61, %v10724_v30  ;;  %v8397_v48 = vld [vmem:[%s12799_s0 + $0x5] ss:$8 sm:$0x7] }
 0x722   :  { %v4605_v53 = vpop.f32.mrf.mxu0  ;;  %v4645_v57 = vpop.f32.mrf.mxu1 }
 0x724   :  { %v4606_v21 = vpop.f32.mrf.mxu0  ;;  %v9225_v28 = vpop.f32.mrf.mxu1 }
 0x725   :  { %v8398_v21 = vld [vmem:[%s12799_s0 + $0x1d] ss:$8 sm:$0x7] }
 0x73e   :  { %v4843_v51 = vpop.f32.mrf.mxu0  ;;  %v4884_v2 = vpop.f32.mrf.mxu1 }
 0x73f   :  { %v4844_v38 = vadd.f32 %v4843_v51, %v10714_v5  ;;  %v4885_v3 = vadd.f32 %v4884_v2, %v10732_v41 }
 0x740   :  { %v4845_v39 = vpop.f32.mrf.mxu0  ;;  %v9244_v11 = vpop.f32.mrf.mxu1 }
 0x741   :  { %v4890_v50 = vadd.f32 %v4844_v38, %v4602_v25  ;;  %v4846_v19 = vadd.f32 %v4845_v39, %v10722_v29 }
 0x742   :  { %v4847_v23 = vpop.f32.mrf.mxu0  ;;  %v4887_v10 = vpop.f32.mrf.mxu1 }
 0x743   :  { %v4891_v6 = vmul.f32 0.5, %v4890_v50  ;;  %v4895_v49 = vadd.f32 %v4846_v19, %v4604_v33  ;;  %v12853_v33 = vld [vmem:[#allocation6_spill] sm:$0xff] }
 0x744   :  { %v4848_v9 = vpop.f32.mrf.mxu0  ;;  %v9245_v58 = vpop.f32.mrf.mxu1 }
 0x745   :  { %9997 = vtanh.f32 %v4891_v6  ;;  %v4896_v54 = vmul.f32 0.5, %v4895_v49 }
 0x747   :  { %9999 = vtanh.f32 %v4896_v54  ;;  %v12854_v54 = vld [vmem:[#allocation7_spill] sm:$0xff] }
 0x752   :  { %v9998_v15 = vpop.eup %9997 }
 0x753   :  { %v4893_v40 = vadd.f32 1.0, %v9998_v15 }
 0x754   :  { %v10000_v61 = vpop.eup %9999 }
 0x755   :  { %v4894_v14 = vmul.f32 0.5, %v4893_v40  ;;  %v4898_v2 = vadd.f32 1.0, %v10000_v61 }
 0x757   :  { %v4900_v22 = vmul.f32 %v4894_v14, %v4885_v3  ;;  %v4899_v23 = vmul.f32 0.5, %v4898_v2 }
 0x759   :  { %v4901_v24 = vadd.f32 %v4900_v22, %v4643_v18 }
 0x75b   :  { %10001 = vtanh.f32 %v4901_v24 }
 0x75e   :  { %v5134_v27 = vpop.f32.mrf.mxu0  ;;  %v5175_v34 = vpop.f32.mrf.mxu1 }
 0x75f   :  { %v5135_v60 = vadd.f32 %v5134_v27, %v12852_v43  ;;  %v5176_v49 = vadd.f32 %v5175_v34, %v12853_v33 }
 0x760   :  { %v5136_v32 = vpop.f32.mrf.mxu0  ;;  %v9264_v35 = vpop.f32.mrf.mxu1 }
 0x761   :  { %v5188_v56 = vrot.slane %v5135_v60, %v10387_v0  ;;  %v5137_v15 = vadd.f32 %v5136_v32, %v12854_v54  ;;  %v5284_v60 = vrot.slane %v8397_v48, 2  ;;  %v5218_v35 = vrot.slane %v8397_v48, 1 }
 0x762   :  { %v5138_v53 = vpop.f32.mrf.mxu0  ;;  %v5178_v57 = vpop.f32.mrf.mxu1 }
 0x763   :  { %v5189_v16 = vcombine.high %v5188_v56, %v5188_v56  ;;  %v5196_v45 = vrot.slane %v5188_v56, %v10387_v0  ;;  %v5229_v3 = vrot.slane %v5137_v15, %v10387_v0  ;;  %v5285_v53 = vrot.slane %v8398_v21, 2 }
 0x764   :  { %v5139_v28 = vpop.f32.mrf.mxu0  ;;  %v9265_v51 = vpop.f32.mrf.mxu1  ;;  %v5219_v57 = vrot.slane %v8398_v21, 1 }
 0x765   :  { %v5203_v25 = vrot.slane %v5189_v16, %v10387_v0  ;;  %v5206_v38 = vadd.f32 %v8397_v48, %v5196_v45  ;;  %v5230_v24 = vcombine.high %v5229_v3, %v5229_v3  ;;  %v5237_v32 = vrot.slane %v5229_v3, %v10387_v0 }
 0x767   :  { %v5207_v39 = vadd.f32 %v8398_v21, %v5203_v25  ;;  %v5208_v11 = vmul.f32 0.5, %v5206_v38  ;;  %v5244_v51 = vrot.slane %v5230_v24, %v10387_v0  ;;  %v5247_v38 = vadd.f32 %v5237_v32, %v5218_v35 }
 0x768   :  { %v10002_v50 = vpop.eup %10001 }
 0x769   :  { %v4903_v10 = vsub.f32 %v11924_v17, %v10002_v50  ;;  %v5209_v6 = vmul.f32 0.5, %v5207_v39  ;;  %10003 = vtanh.f32 %v5208_v11  ;;  %v5264_v17 = vrot.slane %v5176_v49, %v10387_v0 }
 0x76a   :  { %v5248_v11 = vadd.f32 %v5244_v51, %v5219_v57  ;;  %v5249_v48 = vmul.f32 0.5, %v5247_v38  ;;  %v9804_v38 = vld [vmem:[%s12801_s2 + $0x80] ss:$12 sps:$4 sm:$0xff]  }
 0x76b   :  { %v4904_v9 = vmul.f32 %v4903_v10, %v4899_v23  ;;  %10005 = vtanh.f32 %v5209_v6  ;;  %v5265_v22 = vcombine.high %v5264_v17, %v5264_v17  ;;  %v5272_v34 = vrot.slane %v5264_v17, %v10387_v0 }
 0x76d   :  { %v4905_v58 = vadd.f32 %v10002_v50, %v4904_v9  ;;  %v5279_v45 = vrot.slane %v5265_v22, %v10387_v0  ;;  %v5250_v50 = vmul.f32 0.5, %v5248_v11  ;;  %v12195_v11 = vld [vmem:[%s12801_s2 + $0x60] ss:$12 sps:$4 sm:$0xff]  }
 0x76f   :  { %8394 = vst [vmem:[%s12805_s6 + $0x2] sm:$0x3] %v4905_v58  ;;  %v4914_v19 = vrot.slane %v4905_v58, %v10387_v0 }
 0x771   :  { %v4915_v40 = vcombine.high %v4914_v19, %v4914_v19  ;;  %8395 = vst.sshfl [vmem:[#allocation2 + $0x4] sm:$0x1 pattern:$0x73625140] %v4914_v19 }
 0x773   :  { %8396 = vst.sshfl [vmem:[#allocation2 + $0xc] sm:$0x1 pattern:$0x73625140] %v4915_v40 }
 0x776   :  { %v10004_v14 = vpop.eup %10003 }
 0x777   :  { %v5212_v18 = vadd.f32 1.0, %v10004_v14 }
 0x778   :  { %v10006_v27 = vpop.eup %10005 }
 0x779   :  { %v5213_v56 = vadd.f32 1.0, %v10006_v27  ;;  %v5214_v61 = vmul.f32 0.5, %v5212_v18 }
 0x77b   :  { %v5215_v16 = vmul.f32 0.5, %v5213_v56  ;;  %v5282_v28 = vmul.f32 %v5272_v34, %v5214_v61 }
 0x77d   :  { %v5283_v2 = vmul.f32 %v5279_v45, %v5215_v16  ;;  %v5288_v25 = vadd.f32 %v5284_v60, %v5282_v28  ;;  %v9785_v28 = vld [vmem:[%s12801_s2 + $0x170] ss:$12 sps:$4 sm:$0xff]  }
 0x77f   :  { %v5289_v39 = vadd.f32 %v5285_v53, %v5283_v2  ;;  %10007 = vtanh.f32 %v5288_v25  ;;  %v9786_v2 = vld [vmem:[%s12801_s2 + $0x158] ss:$12 sps:$4 sm:$0xff]  }
 0x780   :  { %v12179_v25 = vld [vmem:[%s12801_s2 + $0x78] ss:$12 sps:$4 sm:$0xff]  }
 0x781   :  { %10009 = vtanh.f32 %v5289_v39  ;;  %v12189_v39 = vld [vmem:[%s12801_s2 + $0x64] ss:$12 sps:$4 sm:$0xff]  }
 0x782   :  { %10011 = vtanh.f32 %v5249_v48  ;;  %v9808_v48 = vld [vmem:[%s12801_s2 + $0x68] ss:$12 sps:$4 sm:$0xff]  }
 0x783   :  { %10013 = vtanh.f32 %v5250_v50  ;;  %v12205_v50 = vld [vmem:[%s12801_s2 + $0x4c] ss:$12 sps:$4 sm:$0xff]  }
 0x78c   :  { %v10008_v23 = vpop.eup %10007 }
 0x78e   :  { %v10010_v10 = vpop.eup %10009 }
 0x78f   :  { %v5294_v21 = vcombine.low %v10008_v23, %v10010_v10  ;;  %v10012_v9 = vpop.eup %10011 }
 0x790   :  { %v10014_v19 = vpop.eup %10013  ;;  %v5253_v49 = vadd.f32 1.0, %v10012_v9  ;;  %v9816_v9 = vld [vmem:[%s12801_s2 + $0x38] ss:$12 sps:$4 sm:$0xff]  }
 0x791   :  { %v5301_v6 = vrot.slane %v5294_v21, %v10387_v0  ;;  %v5254_v40 = vadd.f32 1.0, %v10014_v19  ;;  %v12221_v21 = vld [vmem:[%s12801_s2 + $0x34] ss:$12 sps:$4 sm:$0xff]   ;;  %v12243_v19 = vld [vmem:[%s12801_s2 + $0x18] ss:$12 sps:$4 sm:$0xff]  }
 0x792   :  { %v5255_v3 = vmul.f32 0.5, %v5253_v49  ;;  %v9820_v49 = vld [vmem:[%s12801_s2 + $0x20] ss:$12 sps:$4 sm:$0xff]  }
 0x793   :  { %v5308_v58 = vrot.slane %v5301_v6, %v10387_v0  ;;  %v5256_v22 = vmul.f32 0.5, %v5254_v40  ;;  %v12227_v6 = vld [vmem:[%s12801_s2 + $0x30] ss:$12 sps:$4 sm:$0xff]   ;;  %v12259_v40 = vld [vmem:[%s12801_s2] ss:$12 sps:$4 sm:$0xff]  }
 0x795   :  { %v5310_v15 = vsub.f32 %v11982_v26, %v5308_v58  ;;  %v12237_v58 = vld [vmem:[%s12801_s2 + $0x1c] ss:$12 sps:$4 sm:$0xff]  }
 0x797   :  { %v5318_v17 = vrot.slane %v5310_v15, %v10387_v0  ;;  %v12253_v15 = vld [vmem:[%s12801_s2 + $0x4] ss:$12 sps:$4 sm:$0xff]  }
 0x799   :  { %v5319_v14 = vcombine.high %v5318_v17, %v5318_v17  ;;  %v5326_v18 = vrot.slane %v5318_v17, %v10387_v0  ;;  %v9824_v17 = vld [vmem:[%s12801_s2 + $0x8] ss:$12 sps:$4 sm:$0xff]  }
 0x79b   :  { %v5333_v24 = vrot.slane %v5319_v14, %v10387_v0  ;;  %v5336_v27 = vmul.f32 %v5326_v18, %v5255_v3  ;;  %v12281_v18 = vld [vmem:[%s12802_s3 + $0xac] ss:$12 sps:$4 sm:$0xff]  }
 0x79d   :  { %v5337_v60 = vmul.f32 %v5333_v24, %v5256_v22  ;;  %v5338_v35 = vadd.f32 %v10008_v23, %v5336_v27  ;;  %v12211_v23 = vld [vmem:[%s12801_s2 + $0x48] ss:$12 sps:$4 sm:$0xff]   ;;  %v9828_v24 = vld [vmem:[%s12802_s3 + $0xb0] ss:$12 sps:$4 sm:$0xff]  }
 0x79e   :  { %v12286_v22 = vld [vmem:[%s12802_s3 + $0xa8] ss:$12 sps:$4 sm:$0xff]  }
 0x79f   :  { %v5339_v56 = vadd.f32 %v10010_v10, %v5337_v60  ;;  %v5360_v34 = vpack.c.bf16 %v5338_v35, %v5338_v35  ;;  %v9812_v10 = vld [vmem:[%s12801_s2 + $0x50] ss:$12 sps:$4 sm:$0xff]   ;;  %v12296_v27 = vld [vmem:[%s12802_s3 + $0x94] ss:$12 sps:$4 sm:$0xff]  }
 0x7a0   :  { %v12302_v60 = vld [vmem:[%s12802_s3 + $0x90] ss:$12 sps:$4 sm:$0xff]  }
 0x7a1   :  { %v5342_v61 = vcombine.low %v5338_v35, %v5339_v56  ;;  %v5361_v32 = vpack.c.bf16 %v5339_v56, %v5339_v56  ;;  %v5396_v57 = vunpack.c.l.b16 %v5360_v34  ;;  %v9832_v35 = vld [vmem:[%s12802_s3 + $0x98] ss:$12 sps:$4 sm:$0xff]   ;;  %v12312_v56 = vld [vmem:[%s12802_s3 + $0x7c] ss:$12 sps:$4 sm:$0xff]   ;;  %v9836_v34 = vld [vmem:[%s12802_s3 + $0x80] ss:$12 sps:$4 sm:$0xff]  }
 0x7a3   :  { %v5349_v53 = vrot.slane %v5342_v61, %v10387_v0  ;;  %v5397_v26 = vunpack.c.l.b16 %v5361_v32  ;;  %v12318_v61 = vld [vmem:[%s12802_s3 + $0x78] ss:$12 sps:$4 sm:$0xff]  }
 0x7a4   :  { %v12328_v32 = vld [vmem:[%s12802_s3 + $0x64] ss:$12 sps:$4 sm:$0xff]  }
 0x7a5   :  { %v5398_v16 = vrot.slane %v5397_v26, 7  ;;  %8423 = vst.sshfl [vmem:[%s12805_s6] sm:$0x5 pattern:$0x73625140] %v5349_v53  ;;  %v12334_v53 = vld [vmem:[%s12802_s3 + $0x60] ss:$12 sps:$4 sm:$0xff]  }
 0x7a6   :  { %v9840_v26 = vld [vmem:[%s12802_s3 + $0x68] ss:$12 sps:$4 sm:$0xff]  }
 0x7a7   :  { %v5399_v45 = vsel %vm555_vm1, %v5398_v16, %v5396_v57  ;;  %v12344_v57 = vld [vmem:[%s12802_s3 + $0x4c] ss:$12 sps:$4 sm:$0xff]   ;;  %v12350_v16 = vld [vmem:[%s12802_s3 + $0x48] ss:$12 sps:$4 sm:$0xff]  }
 0x7a8   :  { %v5400_v51 = vpack.c.b16 %v5399_v45, %v5399_v45  ;;  %v9844_v45 = vld [vmem:[%s12802_s3 + $0x50] ss:$12 sps:$4 sm:$0xff]  }
 0x7aa   :  { %5563 = vmatmul.mubr.bf16.vlgmr.msra.gmra.mxu0 %v5400_v51  ;;  %9283 = vmatmul.mubr.bf16.vlgmr.msra.gmra.mxu1 %v5400_v51  ;;  %v12366_v51 = vld [vmem:[%s12802_s3 + $0x30] ss:$12 sps:$4 sm:$0xff]  }
 0x7ab   :  { %5773 = vmatpush1.bf16.msra.mxu0 %v11800_v62  ;;  %9287 = vmatpush3.bf16.msra.mxu1 %v9785_v28  ;;  %v9787_v62 = vld [vmem:[%s12801_s2 + $0x140] ss:$12 sps:$4 sm:$0xff]  }
 0x7ac   :  { %5774 = vmatprep.subr.bf16.mxu0 %v11809_v37  ;;  %9288 = vmatprep.subr.bf16.mxu1 %v12837_v7  ;;  %v9788_v37 = vld [vmem:[%s12801_s2 + $0x128] ss:$12 sps:$4 sm:$0xff]   ;;  %v12269_v3 = vld [vmem:[%s12805_s6] sm:$0x3] }
 0x7ad   :  { %5804 = vmatprep.mubr.bf16.mxu0 %v12838_v8  ;;  %9302 = vmatprep.mubr.msk.bf16.mxu1 %vm10098_vm0, %v12837_v7  ;;  %v5902_v14 = vpack.c.bf16 %v12269_v3, %v12269_v3  ;;  %v12360_v28 = vld [vmem:[%s12802_s3 + $0x34] ss:$12 sps:$4 sm:$0xff]  }
 0x7af   :  { %5775 = vmatpush1.bf16.msra.mxu0 %v11815_v59  ;;  %9289 = vmatpush3.bf16.msra.mxu1 %v9786_v2  ;;  %v9789_v59 = vld [vmem:[%s12801_s2 + $0x110] ss:$12 sps:$4 sm:$0xff]   ;;  %v9848_v2 = vld [vmem:[%s12802_s3 + $0x38] ss:$12 sps:$4 sm:$0xff]  }
 0x7b0   :  { %5776 = vmatprep.subr.bf16.mxu0 %v11825_v36  ;;  %9290 = vmatprep.subr.bf16.mxu1 %v12837_v7  ;;  %v9790_v36 = vld [vmem:[%s12801_s2 + $0xf8] ss:$12 sps:$4 sm:$0xff]  }
 0x7b3   :  { %5777 = vmatpush1.bf16.msra.mxu0 %v11834_v42  ;;  %9291 = vmatpush3.bf16.msra.mxu1 %v9787_v62  ;;  %v9791_v42 = vld [vmem:[%s12801_s2 + $0xe0] ss:$12 sps:$4 sm:$0xff]  }
 0x7b4   :  { %5778 = vmatprep.subr.bf16.mxu0 %v11844_v20  ;;  %9292 = vmatprep.subr.bf16.mxu1 %v12837_v7  ;;  %v9792_v20 = vld [vmem:[%s12801_s2 + $0xc8] ss:$12 sps:$4 sm:$0xff]  }
 0x7b7   :  { %5779 = vmatpush1.bf16.msra.mxu0 %v11850_v31  ;;  %9293 = vmatpush3.bf16.msra.mxu1 %v9788_v37  ;;  %v12131_v31 = vld [vmem:[%s12801_s2 + $0xac] ss:$12 sps:$4 sm:$0xff]  }
 0x7b8   :  { %5780 = vmatprep.subr.bf16.mxu0 %v11860_v55  ;;  %9294 = vmatprep.subr.bf16.mxu1 %v12837_v7  ;;  %v12136_v55 = vld [vmem:[%s12805_s6 + $0x2] sm:$0x3] }
 0x7bb   :  { %5781 = vmatpush1.bf16.msra.mxu0 %v11866_v44  ;;  %9295 = vmatpush3.bf16.msra.mxu1 %v9789_v59  ;;  %v12142_v44 = vld [vmem:[%s12801_s2 + $0xa8] ss:$12 sps:$4 sm:$0xff]  }
 0x7bc   :  { %5782 = vmatprep.subr.bf16.mxu0 %v11876_v63  ;;  %9296 = vmatprep.subr.bf16.mxu1 %v12837_v7  ;;  %v9796_v63 = vld [vmem:[%s12801_s2 + $0xb0] ss:$12 sps:$4 sm:$0xff]  }
 0x7bd   :  { %v12375_v59 = vld [vmem:[%s12802_s3 + $0x1c] ss:$12 sps:$4 sm:$0xff]  }
 0x7bf   :  { %5783 = vmatpush1.bf16.msra.mxu0 %v11882_v12  ;;  %9297 = vmatpush3.bf16.msra.mxu1 %v9790_v36  ;;  %v5611_v12 = vpack.c.bf16 %v12136_v55, %v12136_v55  ;;  %v12381_v36 = vld [vmem:[%s12802_s3 + $0x18] ss:$12 sps:$4 sm:$0xff]  }
 0x7c0   :  { %5784 = vmatprep.subr.bf16.mxu0 %v11892_v13  ;;  %9298 = vmatprep.subr.bf16.mxu1 %v12837_v7  ;;  %v12154_v13 = vld [vmem:[%s12801_s2 + $0x94] ss:$12 sps:$4 sm:$0xff]   ;;  %12855 = vst [vmem:[#allocation8_spill] sm:$0xff] %v12381_v36 }
 0x7c3   :  { %5785 = vmatpush1.bf16.msra.mxu0 %v11898_v46  ;;  %9299 = vmatpush3.bf16.msra.mxu1 %v9791_v42  ;;  %v12160_v46 = vld [vmem:[%s12801_s2 + $0x90] ss:$12 sps:$4 sm:$0xff]   ;;  %v9852_v42 = vld [vmem:[%s12802_s3 + $0x20] ss:$12 sps:$4 sm:$0xff]  }
 0x7c4   :  { %5786 = vmatprep.subr.bf16.mxu0 %v11908_v1  ;;  %9300 = vmatprep.subr.bf16.mxu1 %v12837_v7  ;;  %v9800_v1 = vld [vmem:[%s12801_s2 + $0x98] ss:$12 sps:$4 sm:$0xff]  }
 0x7c7   :  { %5787 = vmatpush1.bf16.msra.mxu0 %v11914_v52  ;;  %9301 = vmatpush3.bf16.msra.mxu1 %v9792_v20  ;;  %v12170_v52 = vld [vmem:[%s12801_s2 + $0x7c] ss:$12 sps:$4 sm:$0xff]  }
 0x7c8   :  { %6063 = vmatprep.subr.bf16.mxu0 %v12131_v31  ;;  %9306 = vmatprep.subr.bf16.mxu1 %v12837_v7 }
 0x7ca   :  { %5805 = vmatmul.mubr.bf16.vlgmr.msra.gmra.mxu0 %v5611_v12  ;;  %9303 = vmatmul.mubr.bf16.vlgmr.msra.gmra.mxu1 %v5611_v12  ;;  %v12391_v12 = vld [vmem:[%s12802_s3 + $0x4] ss:$12 sps:$4 sm:$0xff]  }
 0x7cb   :  { %6064 = vmatpush1.bf16.msra.mxu0 %v12142_v44  ;;  %9307 = vmatpush3.bf16.msra.mxu1 %v9796_v63  ;;  %12856 = vst [vmem:[#allocation9_spill] sm:$0xff] %v12391_v12 }
 0x7cc   :  { %6065 = vmatprep.subr.bf16.mxu0 %v12154_v13  ;;  %9308 = vmatprep.subr.bf16.mxu1 %v12837_v7 }
 0x7cd   :  { %6095 = vmatprep.mubr.bf16.mxu0 %v12838_v8  ;;  %9322 = vmatprep.mubr.msk.bf16.mxu1 %vm10098_vm0, %v12837_v7 }
 0x7cf   :  { %6066 = vmatpush1.bf16.msra.mxu0 %v12160_v46  ;;  %9309 = vmatpush3.bf16.msra.mxu1 %v9800_v1 }
 0x7d0   :  { %6067 = vmatprep.subr.bf16.mxu0 %v12170_v52  ;;  %9310 = vmatprep.subr.bf16.mxu1 %v12837_v7 }
 0x7d3   :  { %6068 = vmatpush1.bf16.msra.mxu0 %v12179_v25  ;;  %9311 = vmatpush3.bf16.msra.mxu1 %v9804_v38 }
 0x7d4   :  { %6069 = vmatprep.subr.bf16.mxu0 %v12189_v39  ;;  %9312 = vmatprep.subr.bf16.mxu1 %v12837_v7 }
 0x7d7   :  { %6070 = vmatpush1.bf16.msra.mxu0 %v12195_v11  ;;  %9313 = vmatpush3.bf16.msra.mxu1 %v9808_v48  ;;  %v12397_v48 = vld [vmem:[%s12802_s3] ss:$12 sps:$4 sm:$0xff]  }
 0x7d8   :  { %6071 = vmatprep.subr.bf16.mxu0 %v12205_v50  ;;  %9314 = vmatprep.subr.bf16.mxu1 %v12837_v7  ;;  %12857 = vst [vmem:[#allocation10_spill] sm:$0xff] %v12397_v48 }
 0x7db   :  { %6072 = vmatpush1.bf16.msra.mxu0 %v12211_v23  ;;  %9315 = vmatpush3.bf16.msra.mxu1 %v9812_v10  ;;  %v9856_v10 = vld [vmem:[%s12802_s3 + $0x8] ss:$12 sps:$4 sm:$0xff]  }
 0x7dc   :  { %6073 = vmatprep.subr.bf16.mxu0 %v12221_v21  ;;  %9316 = vmatprep.subr.bf16.mxu1 %v12837_v7 }
 0x7df   :  { %6074 = vmatpush1.bf16.msra.mxu0 %v12227_v6  ;;  %9317 = vmatpush3.bf16.msra.mxu1 %v9816_v9 }
 0x7e0   :  { %6075 = vmatprep.subr.bf16.mxu0 %v12237_v58  ;;  %9318 = vmatprep.subr.bf16.mxu1 %v12837_v7 }
 0x7e3   :  { %6076 = vmatpush1.bf16.msra.mxu0 %v12243_v19  ;;  %9319 = vmatpush3.bf16.msra.mxu1 %v9820_v49 }
 0x7e4   :  { %6077 = vmatprep.subr.bf16.mxu0 %v12253_v15  ;;  %9320 = vmatprep.subr.bf16.mxu1 %v12837_v7 }
 0x7e7   :  { %6078 = vmatpush1.bf16.msra.mxu0 %v12259_v40  ;;  %9321 = vmatpush3.bf16.msra.mxu1 %v9824_v17  ;;  %v12407_v17 = vld [vmem:[%s12801_s2 + $0x16c] ss:$12 sps:$4 sm:$0xff]  }
 0x7e8   :  { %9326 = vmatprep.subr.bf16.mxu1 %v12837_v7  ;;  %6493 = vmatprep.subr.bf16.mxu0 %v12281_v18  ;;  %12858 = vst [vmem:[#allocation11_spill] sm:$0xff] %v12407_v17 }
 0x7ea   :  { %6096 = vmatmul.mubr.bf16.vlgmr.msra.gmra.mxu0 %v5902_v14  ;;  %9323 = vmatmul.mubr.bf16.vlgmr.msra.gmra.mxu1 %v5902_v14 }
 0x7eb   :  { %6525 = vmatprep.mubr.bf16.mxu0 %v12838_v8  ;;  %9342 = vmatprep.mubr.msk.bf16.mxu1 %vm10098_vm0, %v12837_v7 }
 0x7ec   :  { %6494 = vmatpush1.bf16.msra.mxu0 %v12286_v22  ;;  %9327 = vmatpush3.bf16.msra.mxu1 %v9828_v24 }
 0x7ed   :  { %9328 = vmatprep.subr.bf16.mxu1 %v12837_v7  ;;  %6495 = vmatprep.subr.bf16.mxu0 %v12296_v27 }
 0x7f0   :  { %6496 = vmatpush1.bf16.msra.mxu0 %v12302_v60  ;;  %9329 = vmatpush3.bf16.msra.mxu1 %v9832_v35 }
 0x7f1   :  { %9330 = vmatprep.subr.bf16.mxu1 %v12837_v7  ;;  %6497 = vmatprep.subr.bf16.mxu0 %v12312_v56 }
 0x7f4   :  { %6498 = vmatpush1.bf16.msra.mxu0 %v12318_v61  ;;  %9331 = vmatpush3.bf16.msra.mxu1 %v9836_v34 }
 0x7f5   :  { %9332 = vmatprep.subr.bf16.mxu1 %v12837_v7  ;;  %6499 = vmatprep.subr.bf16.mxu0 %v12328_v32 }
 0x7f8   :  { %6500 = vmatpush1.bf16.msra.mxu0 %v12334_v53  ;;  %9333 = vmatpush3.bf16.msra.mxu1 %v9840_v26 }
 0x7f9   :  { %9334 = vmatprep.subr.bf16.mxu1 %v12837_v7  ;;  %6501 = vmatprep.subr.bf16.mxu0 %v12344_v57 }
 0x7fc   :  { %6502 = vmatpush1.bf16.msra.mxu0 %v12350_v16  ;;  %9335 = vmatpush3.bf16.msra.mxu1 %v9844_v45 }
 0x7fd   :  { %9336 = vmatprep.subr.bf16.mxu1 %v12837_v7  ;;  %6503 = vmatprep.subr.bf16.mxu0 %v12360_v28 }
 0x800   :  { %6504 = vmatpush1.bf16.msra.mxu0 %v12366_v51  ;;  %9337 = vmatpush3.bf16.msra.mxu1 %v9848_v2 }
 0x801   :  { %6505 = vmatprep.subr.bf16.mxu0 %v12375_v59  ;;  %9338 = vmatprep.subr.bf16.mxu1 %v12837_v7 }
 0x804   :  { %6506 = vmatpush1.bf16.msra.mxu0 %v12381_v36  ;;  %9339 = vmatpush3.bf16.msra.mxu1 %v9852_v42 }
 0x805   :  { %6507 = vmatprep.subr.bf16.mxu0 %v12391_v12  ;;  %9340 = vmatprep.subr.bf16.mxu1 %v12837_v7 }
 0x808   :  { %6508 = vmatpush1.bf16.msra.mxu0 %v12397_v48  ;;  %9341 = vmatpush3.bf16.msra.mxu1 %v9856_v10 }
 0x809   :  { %6735 = vmatprep.subr.bf16.mxu0 %v12407_v17  ;;  %9346 = vmatprep.subr.bf16.mxu1 %v12837_v7 }
 0x86a   :  { %v5564_v62 = vpop.f32.mrf.mxu0  ;;  %v5605_v37 = vpop.f32.mrf.mxu1 }
 0x86b   :  { %v5565_v35 = vadd.f32 %v5564_v62, %v10711_v4 }
 0x86c   :  { %v5566_v20 = vpop.f32.mrf.mxu0  ;;  %v9284_v63 = vpop.f32.mrf.mxu1 }
 0x86e   :  { %v5568_v1 = vpop.f32.mrf.mxu0  ;;  %v5608_v38 = vpop.f32.mrf.mxu1 }
 0x870   :  { %v5569_v9 = vpop.f32.mrf.mxu0  ;;  %v9285_v49 = vpop.f32.mrf.mxu1 }
 0x871   :  { %v5567_v49 = vadd.f32 %v5566_v20, %v10724_v30 }
 0x88a   :  { %v5806_v14 = vpop.f32.mrf.mxu0  ;;  %v5847_v24 = vpop.f32.mrf.mxu1 }
 0x88b   :  { %v5807_v34 = vadd.f32 %v5806_v14, %v10714_v5  ;;  %v5848_v62 = vadd.f32 %v5847_v24, %v10732_v41 }
 0x88c   :  { %v5808_v26 = vpop.f32.mrf.mxu0  ;;  %v9304_v45 = vpop.f32.mrf.mxu1 }
 0x88d   :  { %v5853_v2 = vadd.f32 %v5807_v34, %v5565_v35  ;;  %v5809_v10 = vadd.f32 %v5808_v26, %v10722_v29  ;;  %v5606_v35 = vadd.f32 %v5605_v37, %v10734_v47 }
 0x88e   :  { %v5810_v42 = vpop.f32.mrf.mxu0  ;;  %v5850_v63 = vpop.f32.mrf.mxu1 }
 0x88f   :  { %v5854_v1 = vmul.f32 0.5, %v5853_v2  ;;  %v5858_v17 = vadd.f32 %v5809_v10, %v5567_v49 }
 0x890   :  { %v5811_v38 = vpop.f32.mrf.mxu0  ;;  %v9305_v9 = vpop.f32.mrf.mxu1 }
 0x891   :  { %10015 = vtanh.f32 %v5854_v1  ;;  %v5859_v48 = vmul.f32 0.5, %v5858_v17  ;;  %v8509_v38 = vld [vmem:[%s12799_s0 + $0x1e] ss:$8 sm:$0x7] }
 0x893   :  { %10017 = vtanh.f32 %v5859_v48 }
 0x89e   :  { %v10016_v12 = vpop.eup %10015 }
 0x89f   :  { %v5856_v36 = vadd.f32 1.0, %v10016_v12  ;;  %v8508_v12 = vld [vmem:[%s12799_s0 + $0x6] ss:$8 sm:$0x7] }
 0x8a0   :  { %v10018_v17 = vpop.eup %10017 }
 0x8a1   :  { %v5857_v14 = vmul.f32 0.5, %v5856_v36  ;;  %v5861_v49 = vadd.f32 1.0, %v10018_v17 }
 0x8a3   :  { %v5863_v34 = vmul.f32 %v5857_v14, %v5848_v62 }
 0x8a5   :  { %v5864_v45 = vadd.f32 %v5863_v34, %v5606_v35 }
 0x8a7   :  { %10019 = vtanh.f32 %v5864_v45 }
 0x8aa   :  { %v6097_v2 = vpop.f32.mrf.mxu0  ;;  %v6138_v42 = vpop.f32.mrf.mxu1 }
 0x8ab   :  { %v6098_v63 = vadd.f32 %v6097_v2, %v12852_v43  ;;  %v5862_v2 = vmul.f32 0.5, %v5861_v49  ;;  %v6139_v17 = vadd.f32 %v6138_v42, %v12853_v33 }
 0x8ac   :  { %v6099_v26 = vpop.f32.mrf.mxu0  ;;  %v9324_v1 = vpop.f32.mrf.mxu1 }
 0x8ad   :  { %v6151_v20 = vrot.slane %v6098_v63, %v10387_v0 }
 0x8ae   :  { %v6101_v36 = vpop.f32.mrf.mxu0  ;;  %v6141_v48 = vpop.f32.mrf.mxu1 }
 0x8af   :  { %v6152_v24 = vcombine.high %v6151_v20, %v6151_v20  ;;  %v6159_v37 = vrot.slane %v6151_v20, %v10387_v0 }
 0x8b0   :  { %v6102_v9 = vpop.f32.mrf.mxu0  ;;  %v9325_v10 = vpop.f32.mrf.mxu1 }
 0x8b1   :  { %v6166_v62 = vrot.slane %v6152_v24, %v10387_v0  ;;  %v6169_v14 = vadd.f32 %v8508_v12, %v6159_v37  ;;  %v6100_v24 = vadd.f32 %v6099_v26, %v12854_v54 }
 0x8b3   :  { %v6170_v35 = vadd.f32 %v8509_v38, %v6166_v62  ;;  %v6171_v34 = vmul.f32 0.5, %v6169_v14  ;;  %v6192_v9 = vrot.slane %v6100_v24, %v10387_v0 }
 0x8b4   :  { %v10020_v45 = vpop.eup %10019 }
 0x8b5   :  { %v5866_v63 = vsub.f32 %v12136_v55, %v10020_v45  ;;  %v6172_v1 = vmul.f32 0.5, %v6170_v35  ;;  %10021 = vtanh.f32 %v6171_v34  ;;  %v6227_v55 = vrot.slane %v6139_v17, %v10387_v0 }
 0x8b6   :  { %v6193_v14 = vcombine.high %v6192_v9, %v6192_v9  ;;  %v6247_v34 = vrot.slane %v8508_v12, 2  ;;  %v6200_v26 = vrot.slane %v6192_v9, %v10387_v0 }
 0x8b7   :  { %v5867_v36 = vmul.f32 %v5866_v63, %v5862_v2  ;;  %10023 = vtanh.f32 %v6172_v1  ;;  %v6228_v62 = vcombine.high %v6227_v55, %v6227_v55  ;;  %v6235_v42 = vrot.slane %v6227_v55, %v10387_v0 }
 0x8b8   :  { %v6248_v1 = vrot.slane %v8509_v38, 2  ;;  %v6207_v24 = vrot.slane %v6193_v14, %v10387_v0 }
 0x8b9   :  { %v5868_v20 = vadd.f32 %v10020_v45, %v5867_v36  ;;  %v6181_v45 = vrot.slane %v8508_v12, 1  ;;  %v6182_v36 = vrot.slane %v8509_v38, 1 }
 0x8bb   :  { %v5877_v48 = vrot.slane %v5868_v20, %v10387_v0  ;;  %8505 = vst [vmem:[%s12805_s6 + $0x2] sm:$0x3] %v5868_v20  ;;  %v6210_v54 = vadd.f32 %v6200_v26, %v6181_v45  ;;  %v6211_v43 = vadd.f32 %v6207_v24, %v6182_v36 }
 0x8bd   :  { %v5878_v37 = vcombine.high %v5877_v48, %v5877_v48  ;;  %8506 = vst.sshfl [vmem:[#allocation2 + $0x5] sm:$0x1 pattern:$0x73625140] %v5877_v48  ;;  %v6242_v48 = vrot.slane %v6228_v62, %v10387_v0  ;;  %v6212_v12 = vmul.f32 0.5, %v6210_v54 }
 0x8bf   :  { %8507 = vst.sshfl [vmem:[#allocation2 + $0xd] sm:$0x1 pattern:$0x73625140] %v5878_v37 }
 0x8c2   :  { %v10022_v10 = vpop.eup %10021 }
 0x8c3   :  { %v6175_v49 = vadd.f32 1.0, %v10022_v10 }
 0x8c4   :  { %v10024_v35 = vpop.eup %10023 }
 0x8c5   :  { %v6176_v2 = vadd.f32 1.0, %v10024_v35  ;;  %v6177_v63 = vmul.f32 0.5, %v6175_v49  ;;  %v6213_v49 = vmul.f32 0.5, %v6211_v43 }
 0x8c7   :  { %v6178_v20 = vmul.f32 0.5, %v6176_v2  ;;  %v6245_v17 = vmul.f32 %v6235_v42, %v6177_v63 }
 0x8c9   :  { %v6246_v37 = vmul.f32 %v6242_v48, %v6178_v20  ;;  %v6251_v10 = vadd.f32 %v6247_v34, %v6245_v17 }
 0x8cb   :  { %v6252_v33 = vadd.f32 %v6248_v1, %v6246_v37  ;;  %10025 = vtanh.f32 %v6251_v10 }
 0x8cd   :  { %10027 = vtanh.f32 %v6252_v33 }
 0x8ce   :  { %10029 = vtanh.f32 %v6212_v12 }
 0x8cf   :  { %10031 = vtanh.f32 %v6213_v49 }
 0x8d8   :  { %v10026_v55 = vpop.eup %10025 }
 0x8da   :  { %v10028_v9 = vpop.eup %10027 }
 0x8db   :  { %v6257_v38 = vcombine.low %v10026_v55, %v10028_v9  ;;  %v10030_v62 = vpop.eup %10029 }
 0x8dc   :  { %v10032_v14 = vpop.eup %10031  ;;  %v6216_v63 = vadd.f32 1.0, %v10030_v62 }
 0x8dd   :  { %v6264_v35 = vrot.slane %v6257_v38, %v10387_v0  ;;  %v6217_v45 = vadd.f32 1.0, %v10032_v14  ;;  %v12469_v14 = vld [vmem:[%s12801_s2 + $0x150] ss:$12 sps:$4 sm:$0xff]  }
 0x8de   :  { %v6218_v33 = vmul.f32 0.5, %v6216_v63  ;;  %v9864_v63 = vld [vmem:[%s12801_s2 + $0x158] ss:$12 sps:$4 sm:$0xff]  }
 0x8df   :  { %v6271_v2 = vrot.slane %v6264_v35, %v10387_v0  ;;  %v6219_v26 = vmul.f32 0.5, %v6217_v45  ;;  %v12454_v35 = vld [vmem:[%s12801_s2 + $0x168] ss:$12 sps:$4 sm:$0xff]   ;;  %v12488_v45 = vld [vmem:[%s12801_s2 + $0x138] ss:$12 sps:$4 sm:$0xff]  }
 0x8e1   :  { %v6273_v34 = vsub.f32 %v12269_v3, %v6271_v2  ;;  %v12463_v2 = vld [vmem:[%s12801_s2 + $0x154] ss:$12 sps:$4 sm:$0xff]  }
 0x8e3   :  { %v6281_v42 = vrot.slane %v6273_v34, %v10387_v0  ;;  %v12479_v34 = vld [vmem:[%s12801_s2 + $0x13c] ss:$12 sps:$4 sm:$0xff]  }
 0x8e5   :  { %v6282_v54 = vcombine.high %v6281_v42, %v6281_v42  ;;  %v6289_v43 = vrot.slane %v6281_v42, %v10387_v0  ;;  %v9868_v42 = vld [vmem:[%s12801_s2 + $0x140] ss:$12 sps:$4 sm:$0xff]  }
 0x8e7   :  { %v6296_v1 = vrot.slane %v6282_v54, %v10387_v0  ;;  %v6299_v36 = vmul.f32 %v6289_v43, %v6218_v33  ;;  %v12498_v33 = vld [vmem:[%s12801_s2 + $0x124] ss:$12 sps:$4 sm:$0xff]   ;;  %v12504_v54 = vld [vmem:[%s12801_s2 + $0x120] ss:$12 sps:$4 sm:$0xff]   ;;  %v9872_v43 = vld [vmem:[%s12801_s2 + $0x128] ss:$12 sps:$4 sm:$0xff]  }
 0x8e9   :  { %v6300_v20 = vmul.f32 %v6296_v1, %v6219_v26  ;;  %v6301_v48 = vadd.f32 %v10026_v55, %v6299_v36  ;;  %v12514_v26 = vld [vmem:[%s12801_s2 + $0x10c] ss:$12 sps:$4 sm:$0xff]   ;;  %v12520_v1 = vld [vmem:[%s12801_s2 + $0x108] ss:$12 sps:$4 sm:$0xff]   ;;  %v9876_v36 = vld [vmem:[%s12801_s2 + $0x110] ss:$12 sps:$4 sm:$0xff]  }
 0x8eb   :  { %v6302_v17 = vadd.f32 %v10028_v9, %v6300_v20  ;;  %v6323_v37 = vpack.c.bf16 %v6301_v48, %v6301_v48  ;;  %v9860_v9 = vld [vmem:[%s12801_s2 + $0x170] ss:$12 sps:$4 sm:$0xff]   ;;  %v12530_v20 = vld [vmem:[%s12801_s2 + $0xf4] ss:$12 sps:$4 sm:$0xff]  }
 0x8ed   :  { %v6305_v24 = vcombine.low %v6301_v48, %v6302_v17  ;;  %v6324_v10 = vpack.c.bf16 %v6302_v17, %v6302_v17  ;;  %v6359_v49 = vunpack.c.l.b16 %v6323_v37  ;;  %v12536_v48 = vld [vmem:[%s12801_s2 + $0xf0] ss:$12 sps:$4 sm:$0xff]   ;;  %v9880_v17 = vld [vmem:[%s12801_s2 + $0xf8] ss:$12 sps:$4 sm:$0xff]  }
 0x8ee   :  { %v12552_v37 = vld [vmem:[%s12801_s2 + $0xd8] ss:$12 sps:$4 sm:$0xff]  }
 0x8ef   :  { %v6312_v12 = vrot.slane %v6305_v24, %v10387_v0  ;;  %v6360_v3 = vunpack.c.l.b16 %v6324_v10  ;;  %v12546_v24 = vld [vmem:[%s12801_s2 + $0xdc] ss:$12 sps:$4 sm:$0xff]   ;;  %v9884_v10 = vld [vmem:[%s12801_s2 + $0xe0] ss:$12 sps:$4 sm:$0xff]  }
 0x8f1   :  { %v6361_v38 = vrot.slane %v6360_v3, 7  ;;  %8534 = vst.sshfl [vmem:[%s12805_s6] sm:$0x5 pattern:$0x73625140] %v6312_v12  ;;  %v12562_v12 = vld [vmem:[%s12801_s2 + $0xc4] ss:$12 sps:$4 sm:$0xff]  }
 0x8f2   :  { %v12568_v3 = vld [vmem:[%s12801_s2 + $0xc0] ss:$12 sps:$4 sm:$0xff]  }
 0x8f3   :  { %v6362_v55 = vsel %vm555_vm1, %v6361_v38, %v6359_v49  ;;  %v9888_v49 = vld [vmem:[%s12801_s2 + $0xc8] ss:$12 sps:$4 sm:$0xff]   ;;  %v12578_v38 = vld [vmem:[%s12805_s6 + $0x2] sm:$0x3] }
 0x8f4   :  { %v6363_v62 = vpack.c.b16 %v6362_v55, %v6362_v55  ;;  %v9889_v55 = vld [vmem:[%s12801_s2 + $0xb0] ss:$12 sps:$4 sm:$0xff]  }
 0x8f6   :  { %6526 = vmatmul.mubr.bf16.vlgmr.msra.gmra.mxu0 %v6363_v62  ;;  %9343 = vmatmul.mubr.bf16.vlgmr.msra.gmra.mxu1 %v6363_v62  ;;  %v9890_v62 = vld [vmem:[%s12801_s2 + $0x98] ss:$12 sps:$4 sm:$0xff]  }
 0x8f7   :  { %6736 = vmatpush1.bf16.msra.mxu0 %v12454_v35  ;;  %9347 = vmatpush3.bf16.msra.mxu1 %v9860_v9  ;;  %v6574_v9 = vpack.c.bf16 %v12578_v38, %v12578_v38 }
 0x8f8   :  { %6737 = vmatprep.subr.bf16.mxu0 %v12463_v2  ;;  %9348 = vmatprep.subr.bf16.mxu1 %v12837_v7 }
 0x8f9   :  { %6767 = vmatprep.mubr.bf16.mxu0 %v12838_v8  ;;  %9362 = vmatprep.mubr.msk.bf16.mxu1 %vm10098_vm0, %v12837_v7 }
 0x8fb   :  { %6738 = vmatpush1.bf16.msra.mxu0 %v12469_v14  ;;  %9349 = vmatpush3.bf16.msra.mxu1 %v9864_v63 }
 0x8fc   :  { %6739 = vmatprep.subr.bf16.mxu0 %v12479_v34  ;;  %9350 = vmatprep.subr.bf16.mxu1 %v12837_v7 }
 0x8ff   :  { %6740 = vmatpush1.bf16.msra.mxu0 %v12488_v45  ;;  %9351 = vmatpush3.bf16.msra.mxu1 %v9868_v42 }
 0x900   :  { %6741 = vmatprep.subr.bf16.mxu0 %v12498_v33  ;;  %9352 = vmatprep.subr.bf16.mxu1 %v12837_v7 }
 0x903   :  { %6742 = vmatpush1.bf16.msra.mxu0 %v12504_v54  ;;  %9353 = vmatpush3.bf16.msra.mxu1 %v9872_v43 }
 0x904   :  { %6743 = vmatprep.subr.bf16.mxu0 %v12514_v26  ;;  %9354 = vmatprep.subr.bf16.mxu1 %v12837_v7 }
 0x907   :  { %6744 = vmatpush1.bf16.msra.mxu0 %v12520_v1  ;;  %9355 = vmatpush3.bf16.msra.mxu1 %v9876_v36 }
 0x908   :  { %6745 = vmatprep.subr.bf16.mxu0 %v12530_v20  ;;  %9356 = vmatprep.subr.bf16.mxu1 %v12837_v7 }
 0x90b   :  { %6746 = vmatpush1.bf16.msra.mxu0 %v12536_v48  ;;  %9357 = vmatpush3.bf16.msra.mxu1 %v9880_v17 }
 0x90c   :  { %6747 = vmatprep.subr.bf16.mxu0 %v12546_v24  ;;  %9358 = vmatprep.subr.bf16.mxu1 %v12837_v7 }
 0x90f   :  { %6748 = vmatpush1.bf16.msra.mxu0 %v12552_v37  ;;  %9359 = vmatpush3.bf16.msra.mxu1 %v9884_v10 }
 0x910   :  { %6749 = vmatprep.subr.bf16.mxu0 %v12562_v12  ;;  %9360 = vmatprep.subr.bf16.mxu1 %v12837_v7 }
 0x913   :  { %6750 = vmatpush1.bf16.msra.mxu0 %v12568_v3  ;;  %9361 = vmatpush3.bf16.msra.mxu1 %v9888_v49 }
 0x914   :  { %7026 = vmatprep.subr.bf16.mxu0 %v12131_v31  ;;  %9366 = vmatprep.subr.bf16.mxu1 %v12837_v7  ;;  %v9891_v31 = vld [vmem:[%s12801_s2 + $0x80] ss:$12 sps:$4 sm:$0xff]  }
 0x916   :  { %6768 = vmatmul.mubr.bf16.vlgmr.msra.gmra.mxu0 %v6574_v9  ;;  %9363 = vmatmul.mubr.bf16.vlgmr.msra.gmra.mxu1 %v6574_v9 }
 0x917   :  { %7027 = vmatpush1.bf16.msra.mxu0 %v12142_v44  ;;  %9367 = vmatpush3.bf16.msra.mxu1 %v9889_v55  ;;  %v9892_v44 = vld [vmem:[%s12801_s2 + $0x68] ss:$12 sps:$4 sm:$0xff]  }
 0x918   :  { %7028 = vmatprep.subr.bf16.mxu0 %v12154_v13  ;;  %9368 = vmatprep.subr.bf16.mxu1 %v12837_v7  ;;  %v9893_v13 = vld [vmem:[%s12801_s2 + $0x50] ss:$12 sps:$4 sm:$0xff]  }
 0x919   :  { %7058 = vmatprep.mubr.bf16.mxu0 %v12838_v8  ;;  %9382 = vmatprep.mubr.msk.bf16.mxu1 %vm10098_vm0, %v12837_v7 }
 0x91b   :  { %7029 = vmatpush1.bf16.msra.mxu0 %v12160_v46  ;;  %9369 = vmatpush3.bf16.msra.mxu1 %v9890_v62  ;;  %v9894_v46 = vld [vmem:[%s12801_s2 + $0x38] ss:$12 sps:$4 sm:$0xff]  }
 0x91c   :  { %7030 = vmatprep.subr.bf16.mxu0 %v12170_v52  ;;  %9370 = vmatprep.subr.bf16.mxu1 %v12837_v7  ;;  %v9895_v52 = vld [vmem:[%s12801_s2 + $0x20] ss:$12 sps:$4 sm:$0xff]  }
 0x91f   :  { %7031 = vmatpush1.bf16.msra.mxu0 %v12179_v25  ;;  %9371 = vmatpush3.bf16.msra.mxu1 %v9891_v31  ;;  %v9896_v25 = vld [vmem:[%s12801_s2 + $0x8] ss:$12 sps:$4 sm:$0xff]  }
 0x920   :  { %7032 = vmatprep.subr.bf16.mxu0 %v12189_v39  ;;  %9372 = vmatprep.subr.bf16.mxu1 %v12837_v7  ;;  %v12636_v39 = vld [vmem:[%s12805_s6] sm:$0x3] }
 0x923   :  { %7033 = vmatpush1.bf16.msra.mxu0 %v12195_v11  ;;  %9373 = vmatpush3.bf16.msra.mxu1 %v9892_v44  ;;  %v6865_v11 = vpack.c.bf16 %v12636_v39, %v12636_v39 }
 0x924   :  { %7034 = vmatprep.subr.bf16.mxu0 %v12205_v50  ;;  %9374 = vmatprep.subr.bf16.mxu1 %v12837_v7  ;;  %v12859_v50 = vld [vmem:[#allocation8_spill] sm:$0xff] }
 0x927   :  { %7035 = vmatpush1.bf16.msra.mxu0 %v12211_v23  ;;  %9375 = vmatpush3.bf16.msra.mxu1 %v9893_v13  ;;  %v12860_v23 = vld [vmem:[#allocation9_spill] sm:$0xff] }
 0x928   :  { %7036 = vmatprep.subr.bf16.mxu0 %v12221_v21  ;;  %9376 = vmatprep.subr.bf16.mxu1 %v12837_v7  ;;  %v12861_v21 = vld [vmem:[#allocation10_spill] sm:$0xff] }
 0x92b   :  { %7037 = vmatpush1.bf16.msra.mxu0 %v12227_v6  ;;  %9377 = vmatpush3.bf16.msra.mxu1 %v9894_v46  ;;  %v12862_v6 = vld [vmem:[#allocation11_spill] sm:$0xff] }
 0x92c   :  { %7038 = vmatprep.subr.bf16.mxu0 %v12237_v58  ;;  %9378 = vmatprep.subr.bf16.mxu1 %v12837_v7  ;;  %v9897_v58 = vld [vmem:[%s12802_s3 + $0xb0] ss:$12 sps:$4 sm:$0xff]  }
 0x92f   :  { %7039 = vmatpush1.bf16.msra.mxu0 %v12243_v19  ;;  %9379 = vmatpush3.bf16.msra.mxu1 %v9895_v52  ;;  %v9898_v19 = vld [vmem:[%s12802_s3 + $0x98] ss:$12 sps:$4 sm:$0xff]  }
 0x930   :  { %7040 = vmatprep.subr.bf16.mxu0 %v12253_v15  ;;  %9380 = vmatprep.subr.bf16.mxu1 %v12837_v7  ;;  %v9899_v15 = vld [vmem:[%s12802_s3 + $0x80] ss:$12 sps:$4 sm:$0xff]  }
 0x933   :  { %7041 = vmatpush1.bf16.msra.mxu0 %v12259_v40  ;;  %9381 = vmatpush3.bf16.msra.mxu1 %v9896_v25  ;;  %v9900_v40 = vld [vmem:[%s12802_s3 + $0x68] ss:$12 sps:$4 sm:$0xff]  }
 0x934   :  { %7456 = vmatprep.subr.bf16.mxu0 %v12281_v18  ;;  %9386 = vmatprep.subr.bf16.mxu1 %v12837_v7  ;;  %v9901_v18 = vld [vmem:[%s12802_s3 + $0x50] ss:$12 sps:$4 sm:$0xff]  }
 0x936   :  { %7059 = vmatmul.mubr.bf16.vlgmr.msra.gmra.mxu0 %v6865_v11  ;;  %9383 = vmatmul.mubr.bf16.vlgmr.msra.gmra.mxu1 %v6865_v11 }
 0x937   :  { %7457 = vmatpush1.bf16.msra.mxu0 %v12286_v22  ;;  %7488 = vmatprep.mubr.bf16.mxu0 %v12838_v8  ;;  %v9902_v22 = vld [vmem:[%s12802_s3 + $0x38] ss:$12 sps:$4 sm:$0xff]  }
 0x938   :  { %7458 = vmatprep.subr.bf16.mxu0 %v12296_v27  ;;  %9402 = vmatprep.mubr.msk.bf16.mxu1 %vm10098_vm0, %v12837_v7 }
 0x939   :  { %9387 = vmatpush3.bf16.msra.mxu1 %v9897_v58 }
 0x93a   :  { %9388 = vmatprep.subr.bf16.mxu1 %v12837_v7 }
 0x93b   :  { %7459 = vmatpush1.bf16.msra.mxu0 %v12302_v60 }
 0x93c   :  { %7460 = vmatprep.subr.bf16.mxu0 %v12312_v56  ;;  %v9903_v56 = vld [vmem:[%s12802_s3 + $0x20] ss:$12 sps:$4 sm:$0xff]  }
 0x93d   :  { %9389 = vmatpush3.bf16.msra.mxu1 %v9898_v19 }
 0x93e   :  { %9390 = vmatprep.subr.bf16.mxu1 %v12837_v7 }
 0x93f   :  { %7461 = vmatpush1.bf16.msra.mxu0 %v12318_v61 }
 0x940   :  { %7462 = vmatprep.subr.bf16.mxu0 %v12328_v32 }
 0x941   :  { %9391 = vmatpush3.bf16.msra.mxu1 %v9899_v15 }
 0x942   :  { %9392 = vmatprep.subr.bf16.mxu1 %v12837_v7 }
 0x943   :  { %7463 = vmatpush1.bf16.msra.mxu0 %v12334_v53 }
 0x944   :  { %7464 = vmatprep.subr.bf16.mxu0 %v12344_v57 }
 0x945   :  { %9393 = vmatpush3.bf16.msra.mxu1 %v9900_v40  ;;  %v12863_v40 = vld [vmem:[#allocation5_spill] sm:$0xff] }
 0x946   :  { %9394 = vmatprep.subr.bf16.mxu1 %v12837_v7 }
 0x947   :  { %7465 = vmatpush1.bf16.msra.mxu0 %v12350_v16  ;;  %v9904_v16 = vld [vmem:[%s12802_s3 + $0x8] ss:$12 sps:$4 sm:$0xff]  }
 0x948   :  { %7466 = vmatprep.subr.bf16.mxu0 %v12360_v28 }
 0x949   :  { %9395 = vmatpush3.bf16.msra.mxu1 %v9901_v18 }
 0x94a   :  { %9396 = vmatprep.subr.bf16.mxu1 %v12837_v7 }
 0x94b   :  { %7467 = vmatpush1.bf16.msra.mxu0 %v12366_v51 }
 0x94c   :  { %7468 = vmatprep.subr.bf16.mxu0 %v12375_v59 }
 0x94d   :  { %9397 = vmatpush3.bf16.msra.mxu1 %v9902_v22 }
 0x94e   :  { %9398 = vmatprep.subr.bf16.mxu1 %v12837_v7 }
 0x94f   :  { %7469 = vmatpush1.bf16.msra.mxu0 %v12859_v50 }
 0x950   :  { %7470 = vmatprep.subr.bf16.mxu0 %v12860_v23 }
 0x951   :  { %9399 = vmatpush3.bf16.msra.mxu1 %v9903_v56 }
 0x952   :  { %9400 = vmatprep.subr.bf16.mxu1 %v12837_v7 }
 0x953   :  { %7471 = vmatpush1.bf16.msra.mxu0 %v12861_v21 }
 0x954   :  { %7698 = vmatprep.subr.bf16.mxu0 %v12862_v6 }
 0x955   :  { %9401 = vmatpush3.bf16.msra.mxu1 %v9904_v16 }
 0x956   :  { %9406 = vmatprep.subr.bf16.mxu1 %v12837_v7 }
 0x9b6   :  { %v6527_v27 = vpop.f32.mrf.mxu0  ;;  %v6568_v60 = vpop.f32.mrf.mxu1 }
 0x9b7   :  { %v6528_v42 = vadd.f32 %v6527_v27, %v10711_v4  ;;  %v6569_v21 = vadd.f32 %v6568_v60, %v10734_v47 }
 0x9b8   :  { %v6529_v61 = vpop.f32.mrf.mxu0  ;;  %v9344_v32 = vpop.f32.mrf.mxu1 }
 0x9b9   :  { %v6530_v13 = vadd.f32 %v6529_v61, %v10724_v30  ;;  %v8619_v32 = vld [vmem:[%s12799_s0 + $0x7] ss:$8 sm:$0x7] }
 0x9ba   :  { %v6531_v53 = vpop.f32.mrf.mxu0  ;;  %v6571_v57 = vpop.f32.mrf.mxu1 }
 0x9bc   :  { %v6532_v28 = vpop.f32.mrf.mxu0  ;;  %v9345_v51 = vpop.f32.mrf.mxu1 }
 0x9bd   :  { %v8620_v28 = vld [vmem:[%s12799_s0 + $0x1f] ss:$8 sm:$0x7] }
 0x9d6   :  { %v6769_v59 = vpop.f32.mrf.mxu0  ;;  %v6810_v63 = vpop.f32.mrf.mxu1 }
 0x9d7   :  { %v6770_v43 = vadd.f32 %v6769_v59, %v10714_v5  ;;  %v6811_v50 = vadd.f32 %v6810_v63, %v10732_v41 }
 0x9d8   :  { %v6771_v36 = vpop.f32.mrf.mxu0  ;;  %v9364_v17 = vpop.f32.mrf.mxu1 }
 0x9d9   :  { %v6816_v10 = vadd.f32 %v6770_v43, %v6528_v42  ;;  %v6772_v44 = vadd.f32 %v6771_v36, %v10722_v29 }
 0x9da   :  { %v6773_v49 = vpop.f32.mrf.mxu0  ;;  %v6813_v55 = vpop.f32.mrf.mxu1 }
 0x9db   :  { %v6817_v9 = vmul.f32 0.5, %v6816_v10  ;;  %v6821_v46 = vadd.f32 %v6772_v44, %v6530_v13  ;;  %v12864_v13 = vld [vmem:[#allocation6_spill] sm:$0xff] }
 0x9dc   :  { %v6774_v62 = vpop.f32.mrf.mxu0  ;;  %v9365_v31 = vpop.f32.mrf.mxu1 }
 0x9dd   :  { %10033 = vtanh.f32 %v6817_v9  ;;  %v6822_v52 = vmul.f32 0.5, %v6821_v46 }
 0x9df   :  { %10035 = vtanh.f32 %v6822_v52  ;;  %v12865_v52 = vld [vmem:[#allocation7_spill] sm:$0xff] }
 0x9ea   :  { %v10034_v25 = vpop.eup %10033 }
 0x9eb   :  { %v6819_v11 = vadd.f32 1.0, %v10034_v25 }
 0x9ec   :  { %v10036_v61 = vpop.eup %10035 }
 0x9ed   :  { %v6820_v23 = vmul.f32 0.5, %v6819_v11  ;;  %v6824_v63 = vadd.f32 1.0, %v10036_v61  ;;  %v7211_v61 = vrot.slane %v8620_v28, 2 }
 0x9ef   :  { %v6826_v6 = vmul.f32 %v6820_v23, %v6811_v50  ;;  %v6825_v49 = vmul.f32 0.5, %v6824_v63 }
 0x9f1   :  { %v6827_v58 = vadd.f32 %v6826_v6, %v6569_v21 }
 0x9f3   :  { %10037 = vtanh.f32 %v6827_v58 }
 0x9f6   :  { %v7060_v19 = vpop.f32.mrf.mxu0  ;;  %v7101_v15 = vpop.f32.mrf.mxu1 }
 0x9f7   :  { %v7061_v18 = vadd.f32 %v7060_v19, %v12863_v40  ;;  %v7102_v46 = vadd.f32 %v7101_v15, %v12864_v13  ;;  %v7210_v40 = vrot.slane %v8619_v32, 2 }
 0x9f8   :  { %v7062_v22 = vpop.f32.mrf.mxu0  ;;  %v9384_v27 = vpop.f32.mrf.mxu1 }
 0x9f9   :  { %v7114_v56 = vrot.slane %v7061_v18, %v10387_v0  ;;  %v7063_v25 = vadd.f32 %v7062_v22, %v12865_v52  ;;  %v7144_v18 = vrot.slane %v8619_v32, 1 }
 0x9fa   :  { %v7064_v53 = vpop.f32.mrf.mxu0  ;;  %v7104_v57 = vpop.f32.mrf.mxu1 }
 0x9fb   :  { %v7115_v16 = vcombine.high %v7114_v56, %v7114_v56  ;;  %v7122_v60 = vrot.slane %v7114_v56, %v10387_v0  ;;  %v7155_v50 = vrot.slane %v7063_v25, %v10387_v0  ;;  %v7145_v53 = vrot.slane %v8620_v28, 1 }
 0x9fc   :  { %v7065_v51 = vpop.f32.mrf.mxu0  ;;  %v9385_v59 = vpop.f32.mrf.mxu1 }
 0x9fd   :  { %v7129_v42 = vrot.slane %v7115_v16, %v10387_v0  ;;  %v7132_v43 = vadd.f32 %v8619_v32, %v7122_v60  ;;  %v7156_v58 = vcombine.high %v7155_v50, %v7155_v50  ;;  %v7163_v22 = vrot.slane %v7155_v50, %v10387_v0 }
 0x9ff   :  { %v7133_v36 = vadd.f32 %v8620_v28, %v7129_v42  ;;  %v7134_v17 = vmul.f32 0.5, %v7132_v43  ;;  %v7170_v51 = vrot.slane %v7156_v58, %v10387_v0  ;;  %v7173_v42 = vadd.f32 %v7163_v22, %v7144_v18 }
 0xa00   :  { %v10038_v10 = vpop.eup %10037 }
 0xa01   :  { %v6829_v55 = vsub.f32 %v12578_v38, %v10038_v10  ;;  %v7135_v9 = vmul.f32 0.5, %v7133_v36  ;;  %10039 = vtanh.f32 %v7134_v17  ;;  %v7190_v38 = vrot.slane %v7102_v46, %v10387_v0 }
 0xa02   :  { %v7174_v36 = vadd.f32 %v7170_v51, %v7145_v53  ;;  %v7175_v32 = vmul.f32 0.5, %v7173_v42  ;;  %v9905_v53 = vld [vmem:[%s12801_s2 + $0x170] ss:$12 sps:$4 sm:$0xff]  }
 0xa03   :  { %v6830_v62 = vmul.f32 %v6829_v55, %v6825_v49  ;;  %10041 = vtanh.f32 %v7135_v9  ;;  %v7191_v6 = vcombine.high %v7190_v38, %v7190_v38  ;;  %v7198_v15 = vrot.slane %v7190_v38, %v10387_v0 }
 0xa04   :  { %v7176_v17 = vmul.f32 0.5, %v7174_v36 }
 0xa05   :  { %v6831_v31 = vadd.f32 %v10038_v10, %v6830_v62  ;;  %v7205_v16 = vrot.slane %v7191_v6, %v10387_v0 }
 0xa07   :  { %v6840_v44 = vrot.slane %v6831_v31, %v10387_v0  ;;  %8616 = vst [vmem:[%s12805_s6 + $0x2] sm:$0x3] %v6831_v31 }
 0xa09   :  { %v6841_v11 = vcombine.high %v6840_v44, %v6840_v44  ;;  %8617 = vst.sshfl [vmem:[#allocation2 + $0x6] sm:$0x1 pattern:$0x73625140] %v6840_v44 }
 0xa0b   :  { %8618 = vst.sshfl [vmem:[#allocation2 + $0xe] sm:$0x1 pattern:$0x73625140] %v6841_v11 }
 0xa0e   :  { %v10040_v23 = vpop.eup %10039 }
 0xa0f   :  { %v7138_v21 = vadd.f32 1.0, %v10040_v23 }
 0xa10   :  { %v10042_v19 = vpop.eup %10041 }
 0xa11   :  { %v7139_v27 = vadd.f32 1.0, %v10042_v19  ;;  %v7140_v56 = vmul.f32 0.5, %v7138_v21 }
 0xa13   :  { %v7141_v57 = vmul.f32 0.5, %v7139_v27  ;;  %v7208_v60 = vmul.f32 %v7198_v15, %v7140_v56 }
 0xa15   :  { %v7209_v59 = vmul.f32 %v7205_v16, %v7141_v57  ;;  %v7214_v63 = vadd.f32 %v7210_v40, %v7208_v60  ;;  %v9906_v16 = vld [vmem:[%s12801_s2 + $0x158] ss:$12 sps:$4 sm:$0xff]  }
 0xa17   :  { %v7215_v43 = vadd.f32 %v7211_v61, %v7209_v59  ;;  %10043 = vtanh.f32 %v7214_v63 }
 0xa19   :  { %10045 = vtanh.f32 %v7215_v43 }
 0xa1a   :  { %10047 = vtanh.f32 %v7175_v32 }
 0xa1b   :  { %10049 = vtanh.f32 %v7176_v17 }
 0xa24   :  { %v10044_v10 = vpop.eup %10043 }
 0xa26   :  { %v10046_v49 = vpop.eup %10045 }
 0xa27   :  { %v7220_v28 = vcombine.low %v10044_v10, %v10046_v49  ;;  %v10048_v9 = vpop.eup %10047 }
 0xa28   :  { %v10050_v31 = vpop.eup %10049  ;;  %v7179_v44 = vadd.f32 1.0, %v10048_v9 }
 0xa29   :  { %v7227_v55 = vrot.slane %v7220_v28, %v10387_v0  ;;  %v7180_v46 = vadd.f32 1.0, %v10050_v31 }
 0xa2a   :  { %v7181_v25 = vmul.f32 0.5, %v7179_v44 }
 0xa2b   :  { %v7234_v62 = vrot.slane %v7227_v55, %v10387_v0  ;;  %v7182_v50 = vmul.f32 0.5, %v7180_v46 }
 0xa2d   :  { %v7236_v13 = vsub.f32 %v12636_v39, %v7234_v62 }
 0xa2f   :  { %v7244_v52 = vrot.slane %v7236_v13, %v10387_v0 }
 0xa31   :  { %v7245_v11 = vcombine.high %v7244_v52, %v7244_v52  ;;  %v7252_v38 = vrot.slane %v7244_v52, %v10387_v0 }
 0xa33   :  { %v7259_v23 = vrot.slane %v7245_v11, %v10387_v0  ;;  %v7262_v21 = vmul.f32 %v7252_v38, %v7181_v25 }
 0xa35   :  { %v7263_v6 = vmul.f32 %v7259_v23, %v7182_v50  ;;  %v7264_v58 = vadd.f32 %v10044_v10, %v7262_v21 }
 0xa37   :  { %v7265_v19 = vadd.f32 %v10046_v49, %v7263_v6  ;;  %v7286_v18 = vpack.c.bf16 %v7264_v58, %v7264_v58 }
 0xa39   :  { %v7268_v40 = vcombine.low %v7264_v58, %v7265_v19  ;;  %v7287_v27 = vpack.c.bf16 %v7265_v19, %v7265_v19  ;;  %v7322_v15 = vunpack.c.l.b16 %v7286_v18 }
 0xa3b   :  { %v7275_v56 = vrot.slane %v7268_v40, %v10387_v0  ;;  %v7323_v39 = vunpack.c.l.b16 %v7287_v27 }
 0xa3d   :  { %8645 = vst.sshfl [vmem:[%s12805_s6] sm:$0x5 pattern:$0x73625140] %v7275_v56  ;;  %v7324_v22 = vrot.slane %v7323_v39, 7 }
 0xa3f   :  { %v7325_v61 = vsel %vm555_vm1, %v7324_v22, %v7322_v15 }
 0xa40   :  { %v7326_v57 = vpack.c.b16 %v7325_v61, %v7325_v61 }
 0xa42   :  { %7489 = vmatmul.mubr.bf16.vlgmr.msra.gmra.mxu0 %v7326_v57  ;;  %9403 = vmatmul.mubr.bf16.vlgmr.msra.gmra.mxu1 %v7326_v57 }
 0xa43   :  { %7699 = vmatpush1.bf16.msra.mxu0 %v12454_v35  ;;  %9407 = vmatpush3.bf16.msra.mxu1 %v9905_v53  ;;  %v9907_v35 = vld [vmem:[%s12801_s2 + $0x140] ss:$12 sps:$4 sm:$0xff]  }
 0xa44   :  { %7700 = vmatprep.subr.bf16.mxu0 %v12463_v2  ;;  %9408 = vmatprep.subr.bf16.mxu1 %v12837_v7  ;;  %v9909_v2 = vld [vmem:[%s12801_s2 + $0x110] ss:$12 sps:$4 sm:$0xff]  }
 0xa45   :  { %7730 = vmatprep.mubr.bf16.mxu0 %v12838_v8  ;;  %9422 = vmatprep.mubr.msk.bf16.mxu1 %vm10098_vm0, %v12837_v7  ;;  %v9908_v8 = vld [vmem:[%s12801_s2 + $0x128] ss:$12 sps:$4 sm:$0xff]  }
 0xa47   :  { %7701 = vmatpush1.bf16.msra.mxu0 %v12469_v14  ;;  %9409 = vmatpush3.bf16.msra.mxu1 %v9906_v16  ;;  %v9910_v14 = vld [vmem:[%s12801_s2 + $0xf8] ss:$12 sps:$4 sm:$0xff]  }
 0xa48   :  { %7702 = vmatprep.subr.bf16.mxu0 %v12479_v34  ;;  %9410 = vmatprep.subr.bf16.mxu1 %v12837_v7  ;;  %v9911_v34 = vld [vmem:[%s12801_s2 + $0xe0] ss:$12 sps:$4 sm:$0xff]  }
 0xa4b   :  { %7703 = vmatpush1.bf16.msra.mxu0 %v12488_v45  ;;  %9411 = vmatpush3.bf16.msra.mxu1 %v9907_v35  ;;  %v9912_v45 = vld [vmem:[%s12801_s2 + $0xc8] ss:$12 sps:$4 sm:$0xff]   ;;  %s10100_s2 = smov [#allocation2]  }
 0xa4c   :  { %7704 = vmatprep.subr.bf16.mxu0 %v12498_v33  ;;  %9412 = vmatprep.subr.bf16.mxu1 %v12837_v7  ;;  %v8646_v33 = vld [vmem:[%s12805_s6 + $0x2] sm:$0x3]  ;;  %s7828_s30 = sshll.u32 %s10100_s2, 4  ;;  %s7829_s30 = int_to_ptr.vmem [resolvable:$true] %s7828_s30 }
 0xa4d   :  { %s10074_s8 = scalar_lea.vmem %s7829_s30, 256  ;;  %p10079_p1 = scmp.lt.s32.totalorder %s7829_s30, %s7829_s30 }
 0xa4e   :  { %p10075_p0 = scmp.ne.s32.totalorder %s7829_s30, %s10074_s8  ;;  %p10080_p2 = scmp.lt.s32.totalorder %s10074_s8, %s10074_s8 }
 0xa4f   :  { %7705 = vmatpush1.bf16.msra.mxu0 %v12504_v54  ;;  %9413 = vmatpush3.bf16.msra.mxu1 %v9908_v8  ;;  %v7537_v54 = vpack.c.bf16 %v8646_v33, %v8646_v33 }
 0xa50   :  { %7706 = vmatprep.subr.bf16.mxu0 %v12514_v26  ;;  %9414 = vmatprep.subr.bf16.mxu1 %v12837_v7  ;;  %p10081_p3 = por %p10080_p2, %p10079_p1 }
 0xa52   :  { %p10082_p4 = pnand %p10081_p3, %p10075_p0 }
 0xa53   :  { %7707 = vmatpush1.bf16.msra.mxu0 %v12520_v1  ;;  %9415 = vmatpush3.bf16.msra.mxu1 %v9909_v2 }
 0xa54   :  { %7708 = vmatprep.subr.bf16.mxu0 %v12530_v20  ;;  %9416 = vmatprep.subr.bf16.mxu1 %v12837_v7 }
 0xa57   :  { %7709 = vmatpush1.bf16.msra.mxu0 %v12536_v48  ;;  %9417 = vmatpush3.bf16.msra.mxu1 %v9910_v14 }
 0xa58   :  { %7710 = vmatprep.subr.bf16.mxu0 %v12546_v24  ;;  %9418 = vmatprep.subr.bf16.mxu1 %v12837_v7 }
 0xa5b   :  { %7711 = vmatpush1.bf16.msra.mxu0 %v12552_v37  ;;  %9419 = vmatpush3.bf16.msra.mxu1 %v9911_v34 }
 0xa5c   :  { %7712 = vmatprep.subr.bf16.mxu0 %v12562_v12  ;;  %9420 = vmatprep.subr.bf16.mxu1 %v12837_v7 }
 0xa5f   :  { %7713 = vmatpush1.bf16.msra.mxu0 %v12568_v3  ;;  %9421 = vmatpush3.bf16.msra.mxu1 %v9912_v45 }
 0xa62   :  { %7731 = vmatmul.mubr.bf16.vlgmr.msra.gmra.mxu0 %v7537_v54  ;;  %9423 = vmatmul.mubr.bf16.vlgmr.msra.gmra.mxu1 %v7537_v54 }
 0xb02   :  { %v7490_v26 = vpop.f32.mrf.mxu0  ;;  %v7531_v1 = vpop.f32.mrf.mxu1 }
 0xb03   :  { %v7491_v59 = vadd.f32 %v7490_v26, %v10711_v4  ;;  %v7532_v13 = vadd.f32 %v7531_v1, %v10734_v47 }
 0xb04   :  { %v7492_v20 = vpop.f32.mrf.mxu0  ;;  %v9404_v48 = vpop.f32.mrf.mxu1 }
 0xb05   :  { %v7493_v55 = vadd.f32 %v7492_v20, %v10724_v30 }
 0xb06   :  { %v7494_v24 = vpop.f32.mrf.mxu0  ;;  %v7534_v37 = vpop.f32.mrf.mxu1 }
 0xb08   :  { %v7495_v60 = vpop.f32.mrf.mxu0  ;;  %v9405_v12 = vpop.f32.mrf.mxu1 }
 0xb22   :  { %v7732_v51 = vpop.f32.mrf.mxu0  ;;  %v7773_v7 = vpop.f32.mrf.mxu1 }
 0xb23   :  { %v7733_v63 = vadd.f32 %v7732_v51, %v10714_v5  ;;  %v7774_v4 = vadd.f32 %v7773_v7, %v10732_v41 }
 0xb24   :  { %v7734_v42 = vpop.f32.mrf.mxu0  ;;  %v9424_v3 = vpop.f32.mrf.mxu1 }
 0xb25   :  { %v7779_v43 = vadd.f32 %v7733_v63, %v7491_v59  ;;  %v7735_v28 = vadd.f32 %v7734_v42, %v10722_v29 }
 0xb26   :  { %v7736_v36 = vpop.f32.mrf.mxu0  ;;  %v7776_v32 = vpop.f32.mrf.mxu1 }
 0xb27   :  { %v7780_v17 = vmul.f32 0.5, %v7779_v43  ;;  %v7784_v9 = vadd.f32 %v7735_v28, %v7493_v55 }
 0xb28   :  { %v7737_v10 = vpop.f32.mrf.mxu0  ;;  %v9425_v49 = vpop.f32.mrf.mxu1 }
 0xb29   :  { %10051 = vtanh.f32 %v7780_v17  ;;  %v7785_v62 = vmul.f32 0.5, %v7784_v9 }
 0xb2b   :  { %10053 = vtanh.f32 %v7785_v62 }
 0xb36   :  { %v10052_v31 = vpop.eup %10051 }
 0xb37   :  { %v7782_v44 = vadd.f32 1.0, %v10052_v31 }
 0xb38   :  { %v10054_v25 = vpop.eup %10053 }
 0xb39   :  { %v7783_v5 = vmul.f32 0.5, %v7782_v44  ;;  %v7787_v11 = vadd.f32 1.0, %v10054_v25 }
 0xb3b   :  { %v7789_v46 = vmul.f32 %v7783_v5, %v7774_v4  ;;  %v7788_v50 = vmul.f32 0.5, %v7787_v11 }
 0xb3d   :  { %v7790_v52 = vadd.f32 %v7789_v46, %v7532_v13 }
 0xb3f   :  { %10055 = vtanh.f32 %v7790_v52 }
 0xb4c   :  { %v10056_v38 = vpop.eup %10055 }
 0xb4d   :  { %v7792_v29 = vsub.f32 %v8646_v33, %v10056_v38 }
 0xb4f   :  { %v7793_v23 = vmul.f32 %v7792_v29, %v7788_v50 }
 0xb51   :  { %v7794_v30 = vadd.f32 %v10056_v38, %v7793_v23 }
 0xb53   :  { %8727 = vst [vmem:[%s12805_s6 + $0x2] sm:$0x3] %v7794_v30  ;;  %v7803_v41 = vrot.slane %v7794_v30, %v10387_v0 }
 0xb55   :  { %v7804_v47 = vcombine.high %v7803_v41, %v7803_v41  ;;  %8728 = vst.sshfl [vmem:[#allocation2 + $0x7] sm:$0x1 pattern:$0x73625140] %v7803_v41 }
 0xb57   :  { %8729 = vst.sshfl [vmem:[#allocation2 + $0xf] sm:$0x1 pattern:$0x73625140] %v7804_v47 }
 0xb58   :  { %10085 = shalt.err (!%p10082_p4)
}
 0xb59   :  { %s10101_s9 = smov 128   ;;  %s10102_s4 = smov 8  }
 0xb5a   :  { %7834 = dma.vmem_to_hbm [thread:$0]  %s7829_s30, 256, %s12804_s5, [#allocation3], %s10101_s9, %s10101_s9, %s10102_s4  }
 0xb5b   :  { %10094 = dma.done.wait [#allocation3], 256  }
 0xb5c   :  { %10095 = vsyncadd [#allocation3], 4294967040 }
 0xb5d   :  { %7842 = vsyncpa [#allocation3], 1 }

</bundles_post_ra>
